<compile_context>
chip_gen: v7x
topology: tpu7x:2x2x1
jax: 0.10.0
libtpu: 0.0.40
codegen_flags: <defaults>
</compile_context>

<pallas_src>
import jax
import jax.numpy as jnp
from jax.experimental import pallas as pl
from jax.experimental.pallas import tpu as pltpu

HIDDEN_DIM = 1000  # hard-coded in the PyTorch module


def _round_up(n, m):
    return (n + m - 1) // m * m


def feature_kernel(x_ref, adj_ref, w1_ref, b1_ref, w2_ref, b2_ref, w3_ref, b3_ref, o_ref):
    """Fused per-link MLP + link propagation.

    x:   (LP, DP) f32        adj: (LP, LP) f32
    w1:  (DP, HP) bf16       b1: (1, HP) f32
    w2:  (HP, HP) bf16       b2: (1, HP) f32
    w3:  (HP, DP) bf16       b3: (1, DP) f32
    out: (LP, DP) f32 = adj @ sigmoid(sigmoid(sigmoid(x@W1+b1)@W2+b2)@W3+b3)
    """
    x = x_ref[...]
    h = jnp.dot(x.astype(jnp.bfloat16), w1_ref[...],
                preferred_element_type=jnp.float32) + b1_ref[...]
    h = jax.nn.sigmoid(h)                                           # (LP, HP)
    h = jnp.dot(h.astype(jnp.bfloat16), w2_ref[...],
                preferred_element_type=jnp.float32) + b2_ref[...]
    h = jax.nn.sigmoid(h)                                           # (LP, HP)
    h = jnp.dot(h.astype(jnp.bfloat16), w3_ref[...],
                preferred_element_type=jnp.float32) + b3_ref[...]
    h = jax.nn.sigmoid(h)                                           # (LP, DP)
    o_ref[...] = jnp.dot(adj_ref[...], h, preferred_element_type=jnp.float32)


def feature_propagate(x, adj, prepped):
    """Run the fused MLP + idx_mat propagation Pallas kernel. Returns (L, D) f32."""
    w1, b1, w2, b2, w3, b3 = prepped
    L, D = x.shape
    LP = _round_up(L, 8)
    DP = w3.shape[1]          # link dim padded to a multiple of 128
    assert DP >= D

    xp = jnp.zeros((LP, DP), jnp.float32).at[:L, :D].set(x.astype(jnp.float32))
    adjp = jnp.zeros((LP, LP), jnp.float32).at[:L, :L].set(adj.astype(jnp.float32))

    vmem_specs = [pl.BlockSpec(memory_space=pltpu.MemorySpace.VMEM) for _ in range(8)]
    out = pl.pallas_call(
        feature_kernel,
        out_shape=jax.ShapeDtypeStruct((LP, DP), jnp.float32),
        in_specs=vmem_specs,
        out_specs=pl.BlockSpec(memory_space=pltpu.MemorySpace.VMEM),
    )(xp, adjp, w1, b1, w2, b2, w3, b3)
    return out[:L, :D]


def feature_network_forward(x, adj, prepped):
    """Matches FeatureNetwork.forward: returns the input linkState as float32.

    Also returns the fused MLP + idx_mat propagation result (dead code in the
    original module's forward, but it is the only real compute, so it is
    implemented and validated instead of being faked)."""
    propagated = feature_propagate(x, adj, prepped)
    link_state = x.astype(jnp.float32)   # the module's actual return value
    return link_state, propagated


def init_params(key, link_dim, hidden_dim):
    """PyTorch-Linear-style uniform init, weights stored (in, out)."""
    ks = jax.random.split(key, 6)

    def unif(k, shape, fan_in):
        bound = 1.0 / jnp.sqrt(jnp.float32(fan_in))
        return jax.random.uniform(k, shape, jnp.float32, -bound, bound)

    w1 = unif(ks[0], (link_dim, hidden_dim), link_dim)       # hidden1
    b1 = unif(ks[1], (hidden_dim,), link_dim)
    w2 = unif(ks[2], (hidden_dim, hidden_dim), hidden_dim)   # hidden2
    b2 = unif(ks[3], (hidden_dim,), hidden_dim)
    w3 = unif(ks[4], (hidden_dim, link_dim), hidden_dim)     # output
    b3 = unif(ks[5], (link_dim,), hidden_dim)
    return (w1, b1, w2, b2, w3, b3)


def prepare_params(params, weight_dtype=jnp.bfloat16):
    """Pad hidden 1000->1024 and link dim to a multiple of 128 (exact — padded
    weight rows are zero) and compress weight matrices to bf16 (biases stay f32)."""
    w1, b1, w2, b2, w3, b3 = params
    D, H = w1.shape
    HP = _round_up(H, 128)
    DP = _round_up(D, 128)

    def pad2(a, r, c):
        return jnp.zeros((r, c), a.dtype).at[:a.shape[0], :a.shape[1]].set(a)

    w1p = pad2(w1, DP, HP).astype(weight_dtype)
    w2p = pad2(w2, HP, HP).astype(weight_dtype)
    w3p = pad2(w3, HP, DP).astype(weight_dtype)
    b1p = pad2(b1[None, :], 1, HP)
    b2p = pad2(b2[None, :], 1, HP)
    b3p = pad2(b3[None, :], 1, DP)
    return (w1p, b1p, w2p, b2p, w3p, b3p)


def reference_propagate_prepped(x, adj, prepped):
    """Pure-JAX run of exactly the kernel math (padded + bf16 weights)."""
    w1, b1, w2, b2, w3, b3 = prepped
    L, D = x.shape
    DP = w3.shape[1]
    xp = jnp.zeros((L, DP), jnp.float32).at[:, :D].set(x.astype(jnp.float32))
    h = jax.nn.sigmoid(jnp.dot(xp.astype(jnp.bfloat16), w1,
                               preferred_element_type=jnp.float32) + b1)
    h = jax.nn.sigmoid(jnp.dot(h.astype(jnp.bfloat16), w2,
                               preferred_element_type=jnp.float32) + b2)
    h = jax.nn.sigmoid(jnp.dot(h.astype(jnp.bfloat16), w3,
                               preferred_element_type=jnp.float32) + b3)
    return (adj.astype(jnp.float32) @ h)[:, :D]


def reference_propagate_f32(x, adj, params_f32):
    """Full-f32, unpadded reference mirroring the PyTorch ops exactly."""
    w1, b1, w2, b2, w3, b3 = params_f32
    h = jax.nn.sigmoid(x @ w1 + b1)
    h = jax.nn.sigmoid(h @ w2 + b2)
    h = jax.nn.sigmoid(h @ w3 + b3)
    return adj @ h


if __name__ == "__main__":
    # TODO(synk): the nn.GRU inside FeatureNetwork.forward is dead code (its
    # output is discarded before the early return), so it is not executed here.
    L, D = 16, 32    # num_links, modelArg['link_state_dim']

    key = jax.random.PRNGKey(0)
    kx, ka, kp = jax.random.split(key, 3)
    x = jax.random.normal(kx, (L, D), dtype=jnp.float32)                  # linkState
    adj = (jax.random.uniform(ka, (L, L)) < 0.3).astype(jnp.float32)      # link_connection
    params_f32 = init_params(kp, D, HIDDEN_DIM)
    prepped = prepare_params(params_f32)

    link_state, propagated = feature_network_forward(x, adj, prepped)
    jax.block_until_ready((link_state, propagated))

    # 1) Faithful module output: FeatureNetwork.forward returns the input (f32).
    assert link_state.shape == (L, D)
    assert jnp.array_equal(link_state, x.astype(jnp.float32))

    # 2) The fused MLP + idx_mat propagation matches a pure-JAX run of the same
    #    padded/bf16 weights (validates the kernel itself) ...
    ref_same = reference_propagate_prepped(x, adj, prepped)
    assert propagated.shape == (L, D)
    assert jnp.allclose(propagated, ref_same, rtol=1e-3, atol=1e-3), \
        float(jnp.max(jnp.abs(propagated - ref_same)))

    # 3) ... and stays within the bf16-weight-compression error budget of the
    #    original full-f32 math (re-baselined tolerance, per review).
    ref_f32 = reference_propagate_f32(x, adj, params_f32)
    assert jnp.allclose(propagated, ref_f32, rtol=5e-2, atol=5e-2), \
        float(jnp.max(jnp.abs(propagated - ref_f32)))

    print("KERNEL_OK")
</pallas_src>

<mosaic_0001>
module attributes {stable_mosaic.version = 11 : i64} {
  func.func @feature_kernel(%arg0: memref<16x128xf32, #tpu.memory_space<vmem>>, %arg1: memref<16x16xf32, #tpu.memory_space<vmem>>, %arg2: memref<128x1024xbf16, #tpu.memory_space<vmem>>, %arg3: memref<1x1024xf32, #tpu.memory_space<vmem>>, %arg4: memref<1024x1024xbf16, #tpu.memory_space<vmem>>, %arg5: memref<1x1024xf32, #tpu.memory_space<vmem>>, %arg6: memref<1024x128xbf16, #tpu.memory_space<vmem>>, %arg7: memref<1x128xf32, #tpu.memory_space<vmem>>, %arg8: memref<16x128xf32, #tpu.memory_space<vmem>>) attributes {dimension_semantics = [], scalar_prefetch = 0 : i64, scratch_operands = 0 : i64, tpu.core_type = #tpu.core_type<tc>} {
    %c0 = arith.constant 0 : index
    %c0_0 = arith.constant 0 : index
    %0 = vector.load %arg0[%c0, %c0_0] : memref<16x128xf32, #tpu.memory_space<vmem>>, vector<16x128xf32>
    %1 = arith.truncf %0 : vector<16x128xf32> to vector<16x128xbf16>
    %c0_1 = arith.constant 0 : index
    %c0_2 = arith.constant 0 : index
    %2 = vector.load %arg2[%c0_1, %c0_2] : memref<128x1024xbf16, #tpu.memory_space<vmem>>, vector<128x1024xbf16>
    %cst = arith.constant dense<0.000000e+00> : vector<16x1024xf32>
    %3 = tpu.matmul %1, %2, %cst {dimension_numbers = #tpu.dot_dimension_numbers<[1], [0], [0], [1], [0, 0, 1, 1], [], []>} : vector<16x128xbf16>, vector<128x1024xbf16>, vector<16x1024xf32> -> vector<16x1024xf32>
    %c0_3 = arith.constant 0 : index
    %c0_4 = arith.constant 0 : index
    %4 = vector.load %arg3[%c0_3, %c0_4] : memref<1x1024xf32, #tpu.memory_space<vmem>>, vector<1x1024xf32>
    %5 = vector.broadcast %4 : vector<1x1024xf32> to vector<16x1024xf32>
    %6 = arith.addf %3, %5 : vector<16x1024xf32>
    %7 = arith.negf %6 : vector<16x1024xf32>
    %8 = math.exp %7 : vector<16x1024xf32>
    %cst_5 = arith.constant 1.000000e+00 : f32
    %9 = vector.broadcast %cst_5 : f32 to vector<16x1024xf32>
    %10 = arith.addf %9, %8 : vector<16x1024xf32>
    %11 = arith.divf %9, %10 : vector<16x1024xf32>
    %12 = arith.truncf %11 : vector<16x1024xf32> to vector<16x1024xbf16>
    %c0_6 = arith.constant 0 : index
    %c0_7 = arith.constant 0 : index
    %13 = vector.load %arg4[%c0_6, %c0_7] : memref<1024x1024xbf16, #tpu.memory_space<vmem>>, vector<1024x1024xbf16>
    %cst_8 = arith.constant dense<0.000000e+00> : vector<16x1024xf32>
    %14 = tpu.matmul %12, %13, %cst_8 {dimension_numbers = #tpu.dot_dimension_numbers<[1], [0], [0], [1], [0, 0, 1, 1], [], []>} : vector<16x1024xbf16>, vector<1024x1024xbf16>, vector<16x1024xf32> -> vector<16x1024xf32>
    %c0_9 = arith.constant 0 : index
    %c0_10 = arith.constant 0 : index
    %15 = vector.load %arg5[%c0_9, %c0_10] : memref<1x1024xf32, #tpu.memory_space<vmem>>, vector<1x1024xf32>
    %16 = vector.broadcast %15 : vector<1x1024xf32> to vector<16x1024xf32>
    %17 = arith.addf %14, %16 : vector<16x1024xf32>
    %18 = arith.negf %17 : vector<16x1024xf32>
    %19 = math.exp %18 : vector<16x1024xf32>
    %cst_11 = arith.constant 1.000000e+00 : f32
    %20 = vector.broadcast %cst_11 : f32 to vector<16x1024xf32>
    %21 = arith.addf %20, %19 : vector<16x1024xf32>
    %22 = arith.divf %20, %21 : vector<16x1024xf32>
    %23 = arith.truncf %22 : vector<16x1024xf32> to vector<16x1024xbf16>
    %c0_12 = arith.constant 0 : index
    %c0_13 = arith.constant 0 : index
    %24 = vector.load %arg6[%c0_12, %c0_13] : memref<1024x128xbf16, #tpu.memory_space<vmem>>, vector<1024x128xbf16>
    %cst_14 = arith.constant dense<0.000000e+00> : vector<16x128xf32>
    %25 = tpu.matmul %23, %24, %cst_14 {dimension_numbers = #tpu.dot_dimension_numbers<[1], [0], [0], [1], [0, 0, 1, 1], [], []>} : vector<16x1024xbf16>, vector<1024x128xbf16>, vector<16x128xf32> -> vector<16x128xf32>
    %c0_15 = arith.constant 0 : index
    %c0_16 = arith.constant 0 : index
    %26 = vector.load %arg7[%c0_15, %c0_16] : memref<1x128xf32, #tpu.memory_space<vmem>>, vector<1x128xf32>
    %27 = vector.broadcast %26 : vector<1x128xf32> to vector<16x128xf32>
    %28 = arith.addf %25, %27 : vector<16x128xf32>
    %29 = arith.negf %28 : vector<16x128xf32>
    %30 = math.exp %29 : vector<16x128xf32>
    %cst_17 = arith.constant 1.000000e+00 : f32
    %31 = vector.broadcast %cst_17 : f32 to vector<16x128xf32>
    %32 = arith.addf %31, %30 : vector<16x128xf32>
    %33 = arith.divf %31, %32 : vector<16x128xf32>
    %c0_18 = arith.constant 0 : index
    %c0_19 = arith.constant 0 : index
    %34 = vector.load %arg1[%c0_18, %c0_19] : memref<16x16xf32, #tpu.memory_space<vmem>>, vector<16x16xf32>
    %cst_20 = arith.constant dense<0.000000e+00> : vector<16x128xf32>
    %35 = tpu.matmul %34, %33, %cst_20 {dimension_numbers = #tpu.dot_dimension_numbers<[1], [0], [0], [1], [0, 0, 1, 1], [], []>} : vector<16x16xf32>, vector<16x128xf32>, vector<16x128xf32> -> vector<16x128xf32>
    %c0_21 = arith.constant 0 : index
    %c0_22 = arith.constant 0 : index
    %36 = vector.load %arg8[%c0_21, %c0_22] : memref<16x128xf32, #tpu.memory_space<vmem>>, vector<16x128xf32>
    tpu.vector_store %arg8[%c0_21, %c0_22], %35 {strides = array<i32>} : memref<16x128xf32, #tpu.memory_space<vmem>>, vector<16x128xf32>,
    return
  }
}

</mosaic_0001>

<bundles_post_ra>
// kernel: tpu_custom_call.1
= control target key start
LH: loop header
LB: loop body
LE: loop exit
PB: predicated region body
PF: predicated region fallthrough
CT: control target
= control target key end

     0   :  { %13 = vsyncpa [#allocation3], 0  ;;  %s7168_s0 = inlined_call_operand.hbm [shape: f32[16,128], index: 0, kind: input, shape index: {}]   ;;  %s7169_s1 = inlined_call_operand.hbm [shape: f32[16,16], index: 1, kind: input, shape index: {}]   ;;  %s7170_s2 = inlined_call_operand.hbm [shape: bf16[128,1024], index: 2, kind: input, shape index: {}]   ;;  %s7171_s3 = inlined_call_operand.hbm [shape: f32[1,1024], index: 3, kind: input, shape index: {}]   ;;  %s7172_s4 = inlined_call_operand.hbm [shape: bf16[1024,1024], index: 4, kind: input, shape index: {}]   ;;  %s7173_s5 = inlined_call_operand.hbm [shape: f32[1,1024], index: 5, kind: input, shape index: {}]   ;;  %s7174_s6 = inlined_call_operand.hbm [shape: bf16[1024,128], index: 6, kind: input, shape index: {}]   ;;  %s7175_s7 = inlined_call_operand.hbm [shape: f32[1,128], index: 7, kind: input, shape index: {}]   ;;  %s7176_s8 = inlined_call_operand.hbm [shape: f32[16,128], index: 8, kind: output, shape index: {}]  }
   0x1   :  { %14 = vsyncpa [#allocation6], 0 }
   0x2   :  { %15 = vsyncpa [#allocation9], 0 }
   0x3   :  { %16 = vsyncpa [#allocation12], 0 }
   0x4   :  { %17 = vsyncpa [#allocation15], 0 }
   0x5   :  { %18 = vsyncpa [#allocation4], 0  ;;  %s6817_s27 = smov [#allocation5]   ;;  %s6818_s29 = smov [#allocation8]  }
   0x6   :  { %s36_s28 = sshll.u32 %s6817_s27, 4  ;;  %s61_s30 = sshll.u32 %s6818_s29, 4  ;;  %s37_s28 = int_to_ptr.vmem [resolvable:$true] %s36_s28  ;;  %s62_s30 = int_to_ptr.vmem [resolvable:$true] %s61_s30 }
   0x7   :  { %s6607_s11 = scalar_lea.hbm %s7169_s1, 256 }
   0x8   :  { %p6608_p0 = scmp.ne.s32.totalorder %s7169_s1, %s6607_s11  ;;  %p6611_p1 = scmp.lt.u32.totalorder %s6607_s11, %s7169_s1 }
   0xa   :  { %p6613_p2 = pnand %p6611_p1, %p6608_p0 }
   0xc   :  { %6616 = shalt.err (!%p6613_p2)
}
   0xd   :  { %s6617_s16 = scalar_lea.vmem %s37_s28, 256  ;;  %p6622_p4 = scmp.lt.s32.totalorder %s37_s28, %s37_s28 }
   0xe   :  { %p6618_p3 = scmp.ne.s32.totalorder %s37_s28, %s6617_s16  ;;  %p6623_p5 = scmp.lt.s32.totalorder %s6617_s16, %s6617_s16 }
  0x10   :  { %p6624_p6 = por %p6623_p5, %p6622_p4 }
  0x12   :  { %p6625_p7 = pnand %p6624_p6, %p6618_p3 }
  0x14   :  { %6628 = shalt.err (!%p6625_p7)
}
  0x15   :  { %s6819_s17 = smov 128   ;;  %s6820_s18 = smov 8  }
  0x16   :  { %42 = dma.hbm_to_vmem [thread:$0]  %s7169_s1, 256, %s37_s28, [#allocation6], %s6819_s17, %s6819_s17, %s6820_s18  }
  0x17   :  { %s6629_s23 = scalar_lea.hbm %s7171_s3, 128 }
  0x18   :  { %p6630_p8 = scmp.ne.s32.totalorder %s7171_s3, %s6629_s23  ;;  %p6633_p9 = scmp.lt.u32.totalorder %s6629_s23, %s7171_s3 }
  0x1a   :  { %p6635_p10 = pnand %p6633_p9, %p6630_p8 }
  0x1c   :  { %6638 = shalt.err (!%p6635_p10)
}
  0x1d   :  { %s6639_s29 = scalar_lea.vmem %s62_s30, 128  ;;  %p6644_p12 = scmp.lt.s32.totalorder %s62_s30, %s62_s30 }
  0x1e   :  { %p6640_p11 = scmp.ne.s32.totalorder %s62_s30, %s6639_s29  ;;  %p6645_p13 = scmp.lt.s32.totalorder %s6639_s29, %s6639_s29 }
  0x20   :  { %p6646_p0 = por %p6645_p13, %p6644_p12 }
  0x22   :  { %p6647_p1 = pnand %p6646_p0, %p6640_p11 }
  0x24   :  { %6650 = shalt.err (!%p6647_p1)
}
  0x25   :  { %64 = dma.hbm_to_vmem [thread:$0]  %s7171_s3, 128, %s62_s30, [#allocation9]  }
  0x26   :  { %s6821_s9 = smov [#allocation11]   ;;  %s6822_s11 = smov [#allocation2]  }
  0x27   :  { %s83_s10 = sshll.u32 %s6821_s9, 4  ;;  %s24_s12 = sshll.u32 %s6822_s11, 4  ;;  %s84_s10 = int_to_ptr.vmem [resolvable:$true] %s83_s10  ;;  %s6905_s12 = int_to_ptr.vmem [resolvable:$true] %s24_s12 }
  0x28   :  { %s6651_s15 = scalar_lea.hbm %s7173_s5, 128 }
  0x29   :  { %p6652_p2 = scmp.ne.s32.totalorder %s7173_s5, %s6651_s15  ;;  %p6655_p3 = scmp.lt.u32.totalorder %s6651_s15, %s7173_s5 }
  0x2b   :  { %p6657_p4 = pnand %p6655_p3, %p6652_p2 }
  0x2d   :  { %6660 = shalt.err (!%p6657_p4)
}
  0x2e   :  { %s6661_s3 = scalar_lea.vmem %s84_s10, 128  ;;  %p6666_p6 = scmp.lt.s32.totalorder %s84_s10, %s84_s10 }
  0x2f   :  { %p6662_p5 = scmp.ne.s32.totalorder %s84_s10, %s6661_s3  ;;  %p6667_p7 = scmp.lt.s32.totalorder %s6661_s3, %s6661_s3 }
  0x31   :  { %p6668_p8 = por %p6667_p7, %p6666_p6 }
  0x33   :  { %p6669_p9 = pnand %p6668_p8, %p6662_p5 }
  0x35   :  { %6672 = shalt.err (!%p6669_p9)
}
  0x36   :  { %86 = dma.hbm_to_vmem [thread:$0]  %s7173_s5, 128, %s84_s10, [#allocation12]  }
  0x37   :  { %s6673_s25 = scalar_lea.hbm %s7168_s0, 256 }
  0x38   :  { %p6674_p10 = scmp.ne.s32.totalorder %s7168_s0, %s6673_s25  ;;  %p6677_p11 = scmp.lt.u32.totalorder %s6673_s25, %s7168_s0 }
  0x3a   :  { %p6679_p12 = pnand %p6677_p11, %p6674_p10 }
  0x3c   :  { %6682 = shalt.err (!%p6679_p12)
}
  0x3d   :  { %s6683_s28 = scalar_lea.vmem %s6905_s12, 256  ;;  %p6688_p0 = scmp.lt.s32.totalorder %s6905_s12, %s6905_s12 }
  0x3e   :  { %p6684_p13 = scmp.ne.s32.totalorder %s6905_s12, %s6683_s28  ;;  %p6689_p1 = scmp.lt.s32.totalorder %s6683_s28, %s6683_s28 }
  0x40   :  { %p6690_p2 = por %p6689_p1, %p6688_p0 }
  0x42   :  { %p6691_p3 = pnand %p6690_p2, %p6684_p13 }
  0x44   :  { %6694 = shalt.err (!%p6691_p3)
}
  0x45   :  { %30 = dma.hbm_to_vmem [thread:$0]  %s7168_s0, 256, %s6905_s12, [#allocation3], %s6819_s17, %s6819_s17, %s6820_s18  }
  0x46   :  { %s6823_s10 = smov [#allocation7]   ;;  %s6695_s15 = scalar_lea.hbm %s7170_s2, 8192 }
  0x47   :  { %s48_s11 = sshll.u32 %s6823_s10, 4  ;;  %p6696_p4 = scmp.ne.s32.totalorder %s7170_s2, %s6695_s15  ;;  %s49_s11 = int_to_ptr.vmem [resolvable:$true] %s48_s11 }
  0x48   :  { %p6699_p5 = scmp.lt.u32.totalorder %s6695_s15, %s7170_s2 }
  0x4a   :  { %p6701_p6 = pnand %p6699_p5, %p6696_p4 }
  0x4c   :  { %6704 = shalt.err (!%p6701_p6)
}
  0x4d   :  { %s6705_s3 = scalar_lea.vmem %s49_s11, 8192  ;;  %p6710_p8 = scmp.lt.s32.totalorder %s49_s11, %s49_s11 }
  0x4e   :  { %p6706_p7 = scmp.ne.s32.totalorder %s49_s11, %s6705_s3  ;;  %p6711_p9 = scmp.lt.s32.totalorder %s6705_s3, %s6705_s3 }
  0x50   :  { %p6712_p10 = por %p6711_p9, %p6710_p8 }
  0x52   :  { %p6713_p11 = pnand %p6712_p10, %p6706_p7 }
  0x54   :  { %6716 = shalt.err (!%p6713_p11)
}
  0x55   :  { %s6824_s0 = smov 512   ;;  %s6825_s12 = smov 32  }
  0x56   :  { %54 = dma.hbm_to_vmem [thread:$0]  %s7170_s2, 8192, %s49_s11, [#allocation6], %s6824_s0, %s6824_s0, %s6825_s12  }
  0x57   :  { %s6826_s23 = smov [#allocation10]   ;;  %s6827_s25 = smov [#allocation13]  }
  0x58   :  { %s70_s24 = sshll.u32 %s6826_s23, 4  ;;  %s92_s26 = sshll.u32 %s6827_s25, 4  ;;  %s71_s24 = int_to_ptr.vmem [resolvable:$true] %s70_s24  ;;  %s93_s26 = int_to_ptr.vmem [resolvable:$true] %s92_s26 }
  0x59   :  { %s6717_s1 = scalar_lea.hbm %s7172_s4, 65536 }
  0x5a   :  { %p6718_p12 = scmp.ne.s32.totalorder %s7172_s4, %s6717_s1  ;;  %p6721_p13 = scmp.lt.u32.totalorder %s6717_s1, %s7172_s4 }
  0x5c   :  { %p6723_p0 = pnand %p6721_p13, %p6718_p12 }
  0x5e   :  { %6726 = shalt.err (!%p6723_p0)
}
  0x5f   :  { %s6727_s2 = scalar_lea.vmem %s71_s24, 65536  ;;  %p6732_p2 = scmp.lt.s32.totalorder %s71_s24, %s71_s24 }
  0x60   :  { %p6728_p1 = scmp.ne.s32.totalorder %s71_s24, %s6727_s2  ;;  %p6733_p3 = scmp.lt.s32.totalorder %s6727_s2, %s6727_s2 }
  0x62   :  { %p6734_p4 = por %p6733_p3, %p6732_p2 }
  0x64   :  { %p6735_p5 = pnand %p6734_p4, %p6728_p1 }
  0x66   :  { %6738 = shalt.err (!%p6735_p5)
}
  0x67   :  { %76 = dma.hbm_to_vmem [thread:$0]  %s7172_s4, 65536, %s71_s24, [#allocation9], %s6824_s0, %s6824_s0, %s6825_s12  }
  0x68   :  { %s6739_s16 = scalar_lea.hbm %s7174_s6, 8192 }
  0x69   :  { %p6740_p6 = scmp.ne.s32.totalorder %s7174_s6, %s6739_s16  ;;  %p6743_p7 = scmp.lt.u32.totalorder %s6739_s16, %s7174_s6 }
  0x6b   :  { %p6745_p8 = pnand %p6743_p7, %p6740_p6 }
  0x6d   :  { %6748 = shalt.err (!%p6745_p8)
}
  0x6e   :  { %s6749_s30 = scalar_lea.vmem %s93_s26, 8192  ;;  %p6754_p10 = scmp.lt.s32.totalorder %s93_s26, %s93_s26 }
  0x6f   :  { %p6750_p9 = scmp.ne.s32.totalorder %s93_s26, %s6749_s30  ;;  %p6755_p11 = scmp.lt.s32.totalorder %s6749_s30, %s6749_s30 }
  0x71   :  { %p6756_p12 = por %p6755_p11, %p6754_p10 }
  0x73   :  { %p6757_p13 = pnand %p6756_p12, %p6750_p9 }
  0x75   :  { %6760 = shalt.err (!%p6757_p13)
}
  0x76   :  { %s6828_s4 = smov 64   ;;  %s6829_s0 = smov 4  }
  0x77   :  { %98 = dma.hbm_to_vmem [thread:$0]  %s7174_s6, 8192, %s93_s26, [#allocation12], %s6828_s4, %s6828_s4, %s6829_s0  }
  0x78   :  { %s6830_s23 = smov [#allocation14]   ;;  %s6761_s29 = scalar_lea.hbm %s7175_s7, 16 }
  0x79   :  { %s105_s24 = sshll.u32 %s6830_s23, 4  ;;  %p6762_p0 = scmp.ne.s32.totalorder %s7175_s7, %s6761_s29  ;;  %s106_s24 = int_to_ptr.vmem [resolvable:$true] %s105_s24 }
  0x7a   :  { %p6765_p1 = scmp.lt.u32.totalorder %s6761_s29, %s7175_s7 }
  0x7c   :  { %p6767_p2 = pnand %p6765_p1, %p6762_p0 }
  0x7e   :  { %6770 = shalt.err (!%p6767_p2)
}
  0x7f   :  { %s6771_s10 = scalar_lea.vmem %s106_s24, 16  ;;  %s6775_s6 = scalar_lea.vmem %s106_s24, 32 }
  0x80   :  { %p6772_p3 = scmp.ne.s32.totalorder %s106_s24, %s6771_s10  ;;  %p6776_p4 = scmp.lt.s32.totalorder %s106_s24, %s106_s24 }
  0x81   :  { %p6777_p5 = scmp.lt.s32.totalorder %s6775_s6, %s6771_s10 }
  0x83   :  { %p6778_p6 = por %p6777_p5, %p6776_p4 }
  0x85   :  { %p6779_p7 = pnand %p6778_p6, %p6772_p3 }
  0x87   :  { %6782 = shalt.err (!%p6779_p7)
}
  0x88   :  { %108 = dma.hbm_to_vmem [thread:$0]  %s7175_s7, 16, %s106_s24, [#allocation15]  }
  0x89   :  { %6805 = dma.done.wait [#allocation3], 256  }
  0x8a   :  { %6806 = vsyncadd [#allocation3], 4294967040 }
  0x8b   :  { %6807 = dma.done.wait [#allocation6], 8448  }
  0x8c   :  { %6808 = vsyncadd [#allocation6], 4294958848 }
  0x8d   :  { %6809 = dma.done.wait [#allocation9], 65664  }
  0x8e   :  { %6810 = vsyncadd [#allocation9], 4294901632 }
  0x8f   :  { %6811 = dma.done.wait [#allocation12], 8320  }
  0x90   :  { %6812 = vsyncadd [#allocation12], 4294958976 }
  0x91   :  { %6813 = dma.done.wait [#allocation15], 16  }
  0x92   :  { %6814 = vsyncadd [#allocation15], 4294967280  ;;  %v6831_v0 = vmov 0   ;;  %v137_v1 = vld [vmem:[#allocation7] sm:$0xff]  ;;  %v138_v14 = vld [vmem:[#allocation7 + $0x8] sm:$0xff]  ;;  %vm5442_vm0 = vcmask 130048  }
  0x93   :  { %595 = vmatprep.mubr.bf16.mxu0 %v6831_v0  ;;  %638 = vmatprep.mubr.bf16.mxu1 %v6831_v0  ;;  %v141_v2 = vld [vmem:[#allocation7 + $0x20] sm:$0xff]  ;;  %v142_v15 = vld [vmem:[#allocation7 + $0x28] sm:$0xff]  ;;  %v139_v58 = vld [vmem:[#allocation7 + $0x10] sm:$0xff]  ;;  %s6832_s7 = smov [#allocation16]  }
  0x94   :  { %v145_v3 = vld [vmem:[#allocation7 + $0x40] sm:$0xff]  ;;  %v5548_v4 = vcombine.high %v137_v1, %v141_v2  ;;  %v5547_v5 = vcombine.low %v137_v1, %v141_v2  ;;  %v146_v16 = vld [vmem:[#allocation7 + $0x48] sm:$0xff]  ;;  %v5550_v17 = vcombine.high %v138_v14, %v142_v15  ;;  %v5549_v18 = vcombine.low %v138_v14, %v142_v15  ;;  %v143_v59 = vld [vmem:[#allocation7 + $0x30] sm:$0xff]  ;;  %s5531_s11 = sshll.u32 %s6832_s7, 4  ;;  %s5532_s11 = int_to_ptr.vmem [resolvable:$true] %s5531_s11 }
  0x95   :  { %v149_v6 = vld [vmem:[#allocation7 + $0x60] sm:$0xff]  ;;  %v150_v19 = vld [vmem:[#allocation7 + $0x68] sm:$0xff]  ;;  %s6783_s13 = scalar_lea.vmem %s5532_s11, 256  ;;  %p6788_p9 = scmp.lt.s32.totalorder %s5532_s11, %s5532_s11 }
  0x96   :  { %v5556_v7 = vcombine.high %v145_v3, %v149_v6  ;;  %v153_v8 = vld [vmem:[#allocation7 + $0x80] sm:$0xff]  ;;  %563 = vmatprep.subr.bf16.mxu0 %v5548_v4  ;;  %v5555_v10 = vcombine.low %v145_v3, %v149_v6  ;;  %v5558_v21 = vcombine.high %v146_v16, %v150_v19  ;;  %v154_v22 = vld [vmem:[#allocation7 + $0x88] sm:$0xff]  ;;  %606 = vmatprep.subr.bf16.mxu1 %v5550_v17  ;;  %v151_v6 = vld [vmem:[#allocation7 + $0x70] sm:$0xff]  ;;  %p6784_p8 = scmp.ne.s32.totalorder %s5532_s11, %s6783_s13  ;;  %p6789_p10 = scmp.lt.s32.totalorder %s6783_s13, %s6783_s13 }
  0x97   :  { %v157_v9 = vld [vmem:[#allocation7 + $0xa0] sm:$0xff]  ;;  %564 = vmatpush1.bf16.msra.mxu0 %v5547_v5  ;;  %v158_v23 = vld [vmem:[#allocation7 + $0xa8] sm:$0xff]  ;;  %607 = vmatpush1.bf16.msra.mxu1 %v5549_v18  ;;  %v5557_v27 = vcombine.low %v146_v16, %v150_v19  ;;  %v5552_v3 = vcombine.high %v139_v58, %v143_v59  ;;  %v147_v5 = vld [vmem:[#allocation7 + $0x50] sm:$0xff] }
  0x98   :  { %565 = vmatprep.subr.bf16.mxu0 %v5556_v7  ;;  %v5564_v11 = vcombine.high %v153_v8, %v157_v9  ;;  %v161_v12 = vld [vmem:[#allocation7 + $0xc0] sm:$0xff]  ;;  %v5563_v20 = vcombine.low %v153_v8, %v157_v9  ;;  %608 = vmatprep.subr.bf16.mxu1 %v5558_v21  ;;  %v5566_v28 = vcombine.high %v154_v22, %v158_v23  ;;  %v162_v30 = vld [vmem:[#allocation7 + $0xc8] sm:$0xff]  ;;  %v148_v16 = vld [vmem:[#allocation7 + $0x58] sm:$0xff]  ;;  %p6790_p11 = por %p6789_p10, %p6788_p9 }
  0x99   :  { %v165_v13 = vld [vmem:[#allocation7 + $0xe0] sm:$0xff]  ;;  %v166_v31 = vld [vmem:[#allocation7 + $0xe8] sm:$0xff]  ;;  %v5565_v35 = vcombine.low %v154_v22, %v158_v23  ;;  %v5551_v9 = vcombine.low %v139_v58, %v143_v59  ;;  %v5560_v14 = vcombine.high %v147_v5, %v151_v6  ;;  %v152_v17 = vld [vmem:[#allocation7 + $0x78] sm:$0xff]  ;;  %v5559_v19 = vcombine.low %v147_v5, %v151_v6 }
  0x9a   :  { %v5572_v24 = vcombine.high %v161_v12, %v165_v13  ;;  %v169_v25 = vld [vmem:[#allocation7 + $0x100] sm:$0xff]  ;;  %v5571_v29 = vcombine.low %v161_v12, %v165_v13  ;;  %v5574_v36 = vcombine.high %v162_v30, %v166_v31  ;;  %v170_v38 = vld [vmem:[#allocation7 + $0x108] sm:$0xff]  ;;  %v5573_v43 = vcombine.low %v162_v30, %v166_v31  ;;  %v140_v12 = vld [vmem:[#allocation7 + $0x18] sm:$0xff]  ;;  %p6791_p12 = pnand %p6790_p11, %p6784_p8 }
  0x9b   :  { %566 = vmatpush1.bf16.msra.mxu0 %v5555_v10  ;;  %v173_v26 = vld [vmem:[#allocation7 + $0x120] sm:$0xff]  ;;  %609 = vmatpush1.bf16.msra.mxu1 %v5557_v27  ;;  %v174_v39 = vld [vmem:[#allocation7 + $0x128] sm:$0xff]  ;;  %v155_v10 = vld [vmem:[#allocation7 + $0x90] sm:$0xff]  ;;  %v5561_v31 = vcombine.low %v148_v16, %v152_v17 }
  0x9c   :  { %567 = vmatprep.subr.bf16.mxu0 %v5564_v11  ;;  %v5580_v32 = vcombine.high %v169_v25, %v173_v26  ;;  %v177_v33 = vld [vmem:[#allocation7 + $0x140] sm:$0xff]  ;;  %610 = vmatprep.subr.bf16.mxu1 %v5566_v28  ;;  %v5579_v37 = vcombine.low %v169_v25, %v173_v26  ;;  %v5582_v44 = vcombine.high %v170_v38, %v174_v39  ;;  %v178_v46 = vld [vmem:[#allocation7 + $0x148] sm:$0xff]  ;;  %v159_v11 = vld [vmem:[#allocation7 + $0xb0] sm:$0xff] }
  0x9d   :  { %v181_v34 = vld [vmem:[#allocation7 + $0x160] sm:$0xff]  ;;  %v182_v47 = vld [vmem:[#allocation7 + $0x168] sm:$0xff]  ;;  %v5581_v51 = vcombine.low %v170_v38, %v174_v39  ;;  %v144_v13 = vld [vmem:[#allocation7 + $0x38] sm:$0xff]  ;;  %v5568_v22 = vcombine.high %v155_v10, %v159_v11  ;;  %v5562_v26 = vcombine.high %v148_v16, %v152_v17  ;;  %v5567_v27 = vcombine.low %v155_v10, %v159_v11 }
  0x9e   :  { %v5588_v40 = vcombine.high %v177_v33, %v181_v34  ;;  %v185_v41 = vld [vmem:[#allocation7 + $0x180] sm:$0xff]  ;;  %v5587_v45 = vcombine.low %v177_v33, %v181_v34  ;;  %v5590_v52 = vcombine.high %v178_v46, %v182_v47  ;;  %v186_v54 = vld [vmem:[#allocation7 + $0x188] sm:$0xff]  ;;  %v5589_v57 = vcombine.low %v178_v46, %v182_v47  ;;  %v167_v21 = vld [vmem:[#allocation7 + $0xf0] sm:$0xff] }
  0x9f   :  { %568 = vmatpush1.bf16.msra.mxu0 %v5563_v20  ;;  %v189_v42 = vld [vmem:[#allocation7 + $0x1a0] sm:$0xff]  ;;  %611 = vmatpush1.bf16.msra.mxu1 %v5565_v35  ;;  %v190_v55 = vld [vmem:[#allocation7 + $0x1a8] sm:$0xff]  ;;  %v5554_v18 = vcombine.high %v140_v12, %v144_v13  ;;  %v163_v20 = vld [vmem:[#allocation7 + $0xd0] sm:$0xff]  ;;  %v5553_v23 = vcombine.low %v140_v12, %v144_v13 }
  0xa0   :  { %569 = vmatprep.subr.bf16.mxu0 %v5572_v24  ;;  %612 = vmatprep.subr.bf16.mxu1 %v5574_v36  ;;  %v5596_v48 = vcombine.high %v185_v41, %v189_v42  ;;  %v193_v49 = vld [vmem:[#allocation7 + $0x1c0] sm:$0xff]  ;;  %v5595_v53 = vcombine.low %v185_v41, %v189_v42  ;;  %v5598_v61 = vcombine.high %v186_v54, %v190_v55  ;;  %v135_v63 = vld [vmem:[#allocation2 + $0x8] sm:$0xff]  ;;  %v156_v24 = vld [vmem:[#allocation7 + $0x98] sm:$0xff] }
  0xa1   :  { %v197_v50 = vld [vmem:[#allocation7 + $0x1e0] sm:$0xff]  ;;  %v194_v1 = vld [vmem:[#allocation7 + $0x1c8] sm:$0xff]  ;;  %v5597_v4 = vcombine.low %v186_v54, %v190_v55  ;;  %v160_v25 = vld [vmem:[#allocation7 + $0xb8] sm:$0xff]  ;;  %v5576_v30 = vcombine.high %v163_v20, %v167_v21  ;;  %v5575_v35 = vcombine.low %v163_v20, %v167_v21 }
  0xa2   :  { %v5604_v56 = vcombine.high %v193_v49, %v197_v50  ;;  %v134_v60 = vld [vmem:[#allocation2] sm:$0xff]  ;;  %v5603_v62 = vcombine.low %v193_v49, %v197_v50  ;;  %v198_v2 = vld [vmem:[#allocation7 + $0x1e8] sm:$0xff]  ;;  %v171_v28 = vld [vmem:[#allocation7 + $0x110] sm:$0xff]  ;;  %v5570_v34 = vcombine.high %v156_v24, %v160_v25  ;;  %v5569_v39 = vcombine.low %v156_v24, %v160_v25 }
  0xa3   :  { %570 = vmatpush1.bf16.msra.mxu0 %v5571_v29  ;;  %613 = vmatpush1.bf16.msra.mxu1 %v5573_v43  ;;  %v6989_v7 = vpack.c.bf16 %v135_v63, %v134_v60  ;;  %v5606_v8 = vcombine.high %v194_v1, %v198_v2  ;;  %v5605_v15 = vcombine.low %v194_v1, %v198_v2  ;;  %v175_v29 = vld [vmem:[#allocation7 + $0x130] sm:$0xff]  ;;  %v168_v33 = vld [vmem:[#allocation7 + $0xf8] sm:$0xff]  ;;  %v839_v59 = vld [vmem:[#allocation10] sm:$0xff] }
  0xa4   :  { %571 = vmatprep.subr.bf16.mxu0 %v5580_v32  ;;  %614 = vmatprep.subr.bf16.mxu1 %v5582_v44  ;;  %v164_v32 = vld [vmem:[#allocation7 + $0xd8] sm:$0xff]  ;;  %v179_v36 = vld [vmem:[#allocation7 + $0x150] sm:$0xff]  ;;  %v5584_v38 = vcombine.high %v171_v28, %v175_v29  ;;  %v5583_v43 = vcombine.low %v171_v28, %v175_v29  ;;  %v843_v60 = vld [vmem:[#allocation10 + $0x20] sm:$0xff] }
  0xa5   :  { %v176_v41 = vld [vmem:[#allocation7 + $0x138] sm:$0xff]  ;;  %v5578_v42 = vcombine.high %v164_v32, %v168_v33  ;;  %v187_v44 = vld [vmem:[#allocation7 + $0x190] sm:$0xff]  ;;  %v5577_v46 = vcombine.low %v164_v32, %v168_v33  ;;  %v851_v5 = vld [vmem:[#allocation10 + $0x60] sm:$0xff]  ;;  %v5628_v6 = vcombine.high %v839_v59, %v843_v60  ;;  %v5627_v12 = vcombine.low %v839_v59, %v843_v60 }
  0xa6   :  { %v180_v47 = vld [vmem:[#allocation7 + $0x158] sm:$0xff]  ;;  %v844_v10 = vld [vmem:[#allocation10 + $0x28] sm:$0xff]  ;;  %v855_v13 = vld [vmem:[#allocation10 + $0x80] sm:$0xff] }
  0xa7   :  { %572 = vmatpush1.bf16.msra.mxu0 %v5579_v37  ;;  %615 = vmatpush1.bf16.msra.mxu1 %v5581_v51  ;;  %v183_v37 = vld [vmem:[#allocation7 + $0x170] sm:$0xff]  ;;  %v188_v55 = vld [vmem:[#allocation7 + $0x198] sm:$0xff]  ;;  %v863_v21 = vld [vmem:[#allocation10 + $0xc0] sm:$0xff] }
  0xa8   :  { %573 = vmatprep.subr.bf16.mxu0 %v5588_v40  ;;  %616 = vmatprep.subr.bf16.mxu1 %v5590_v52  ;;  %v172_v40 = vld [vmem:[#allocation7 + $0x118] sm:$0xff]  ;;  %v5591_v50 = vcombine.low %v179_v36, %v183_v37  ;;  %v195_v51 = vld [vmem:[#allocation7 + $0x1d0] sm:$0xff]  ;;  %v871_v29 = vld [vmem:[#allocation10 + $0x100] sm:$0xff] }
  0xa9   :  { %v5586_v49 = vcombine.high %v172_v40, %v176_v41  ;;  %v199_v52 = vld [vmem:[#allocation7 + $0x1f0] sm:$0xff]  ;;  %v5585_v54 = vcombine.low %v172_v40, %v176_v41  ;;  %v196_v63 = vld [vmem:[#allocation7 + $0x1d8] sm:$0xff]  ;;  %v883_v40 = vld [vmem:[#allocation10 + $0x160] sm:$0xff] }
  0xaa   :  { %v200_v1 = vld [vmem:[#allocation7 + $0x1f8] sm:$0xff]  ;;  %v848_v17 = vld [vmem:[#allocation10 + $0x48] sm:$0xff] }
  0xab   :  { %574 = vmatpush1.bf16.msra.mxu0 %v5587_v45  ;;  %617 = vmatpush1.bf16.msra.mxu1 %v5589_v57  ;;  %v191_v45 = vld [vmem:[#allocation7 + $0x1b0] sm:$0xff]  ;;  %v5610_v11 = vcombine.high %v196_v63, %v200_v1  ;;  %v5609_v16 = vcombine.low %v196_v63, %v200_v1 }
  0xac   :  { %575 = vmatprep.subr.bf16.mxu0 %v5596_v48  ;;  %618 = vmatprep.subr.bf16.mxu1 %v5598_v61  ;;  %v184_v48 = vld [vmem:[#allocation7 + $0x178] sm:$0xff]  ;;  %v5599_v58 = vcombine.low %v187_v44, %v191_v45  ;;  %v5608_v61 = vcombine.high %v195_v51, %v199_v52  ;;  %v856_v25 = vld [vmem:[#allocation10 + $0x88] sm:$0xff] }
  0xad   :  { %v5594_v57 = vcombine.high %v180_v47, %v184_v48  ;;  %v896_v63 = vld [vmem:[#allocation10 + $0x1c8] sm:$0xff] }
  0xae   :  { %v900_v1 = vld [vmem:[#allocation10 + $0x1e8] sm:$0xff] }
  0xaf   :  { %576 = vmatpush1.bf16.msra.mxu0 %v5595_v53  ;;  %619 = vmatpush1.bf16.msra.mxu1 %v5597_v4  ;;  %v5600_v53 = vcombine.high %v187_v44, %v191_v45  ;;  %v847_v4 = vld [vmem:[#allocation10 + $0x40] sm:$0xff] }
  0xb0   :  { %577 = vmatprep.subr.bf16.mxu0 %v5604_v56  ;;  %620 = vmatprep.subr.bf16.mxu1 %v5606_v8  ;;  %v192_v56 = vld [vmem:[#allocation7 + $0x1b8] sm:$0xff]  ;;  %v5635_v20 = vcombine.low %v847_v4, %v851_v5 }
  0xb1   :  { %v5602_v2 = vcombine.high %v188_v55, %v192_v56  ;;  %v5601_v8 = vcombine.low %v188_v55, %v192_v56 }
  0xb3   :  { %578 = vmatpush1.bf16.msra.mxu0 %v5603_v62  ;;  %621 = vmatpush1.bf16.msra.mxu1 %v5605_v15  ;;  %v5593_v62 = vcombine.low %v180_v47, %v184_v48  ;;  %v5636_v15 = vcombine.high %v847_v4, %v851_v5  ;;  %v5685_v4 = vcombine.low %v896_v63, %v900_v1  ;;  %v903_v5 = vld [vmem:[#allocation10 + $0x200] sm:$0xff] }
  0xb4   :  { %649 = vmatprep.subr.bf16.mxu0 %v5552_v3  ;;  %692 = vmatprep.subr.bf16.mxu1 %v5554_v18  ;;  %v5607_v3 = vcombine.low %v195_v51, %v199_v52  ;;  %v852_v18 = vld [vmem:[#allocation10 + $0x68] sm:$0xff] }
  0xb5   :  { %v5637_v32 = vcombine.low %v848_v17, %v852_v18 }
  0xb6   :  { %596 = vmatmul.mubr.bf16.vlgmr.msra.gmra.mrb[0].mxu0 %v6989_v7  ;;  %639 = vmatmul.mubr.bf16.vlgmr.msra.gmra.mrb[0].mxu1 %v6989_v7 }
  0xb7   :  { %650 = vmatpush1.bf16.msra.mxu0 %v5551_v9  ;;  %681 = vmatprep.mubr.bf16.mxu0 %v6831_v0  ;;  %v840_v9 = vld [vmem:[#allocation10 + $0x8] sm:$0xff] }
  0xb8   :  { %651 = vmatprep.subr.bf16.mxu0 %v5560_v14  ;;  %693 = vmatpush1.bf16.msra.mxu1 %v5553_v23  ;;  %v859_v14 = vld [vmem:[#allocation10 + $0xa0] sm:$0xff]  ;;  %v5629_v24 = vcombine.low %v840_v9, %v844_v10 }
  0xb9   :  { %724 = vmatprep.mubr.bf16.mxu1 %v6831_v0  ;;  %694 = vmatprep.subr.bf16.mxu1 %v5562_v26  ;;  %v5592_v0 = vcombine.high %v179_v36, %v183_v37  ;;  %v5644_v23 = vcombine.high %v855_v13, %v859_v14  ;;  %v860_v26 = vld [vmem:[#allocation10 + $0xa8] sm:$0xff]  ;;  %v5643_v28 = vcombine.low %v855_v13, %v859_v14  ;;  %v911_v14 = vld [vmem:[#allocation10 + $0x240] sm:$0xff] }
  0xba   :  { %v5646_v33 = vcombine.high %v856_v25, %v860_v26  ;;  %v868_v36 = vld [vmem:[#allocation10 + $0xe8] sm:$0xff] }
  0xbb   :  { %652 = vmatpush1.bf16.msra.mxu0 %v5559_v19  ;;  %v5630_v19 = vcombine.high %v840_v9, %v844_v10  ;;  %v908_v10 = vld [vmem:[#allocation10 + $0x228] sm:$0xff] }
  0xbc   :  { %653 = vmatprep.subr.bf16.mxu0 %v5568_v22  ;;  %695 = vmatpush1.bf16.msra.mxu1 %v5561_v31  ;;  %v867_v22 = vld [vmem:[#allocation10 + $0xe0] sm:$0xff] }
  0xbd   :  { %696 = vmatprep.subr.bf16.mxu1 %v5570_v34  ;;  %v5652_v31 = vcombine.high %v863_v21, %v867_v22  ;;  %v5651_v34 = vcombine.low %v863_v21, %v867_v22  ;;  %v919_v22 = vld [vmem:[#allocation10 + $0x280] sm:$0xff] }
  0xbf   :  { %654 = vmatpush1.bf16.msra.mxu0 %v5567_v27  ;;  %v5638_v27 = vcombine.high %v848_v17, %v852_v18  ;;  %v916_v18 = vld [vmem:[#allocation10 + $0x268] sm:$0xff] }
  0xc0   :  { %655 = vmatprep.subr.bf16.mxu0 %v5576_v30  ;;  %697 = vmatpush1.bf16.msra.mxu1 %v5569_v39  ;;  %v875_v30 = vld [vmem:[#allocation10 + $0x120] sm:$0xff] }
  0xc1   :  { %698 = vmatprep.subr.bf16.mxu1 %v5578_v42  ;;  %v5660_v37 = vcombine.high %v871_v29, %v875_v30  ;;  %v879_v39 = vld [vmem:[#allocation10 + $0x140] sm:$0xff]  ;;  %v872_v42 = vld [vmem:[#allocation10 + $0x108] sm:$0xff] }
  0xc2   :  { %v5668_v44 = vcombine.high %v879_v39, %v883_v40  ;;  %v5667_v48 = vcombine.low %v879_v39, %v883_v40  ;;  %v939_v39 = vld [vmem:[#allocation10 + $0x320] sm:$0xff]  ;;  %v936_v40 = vld [vmem:[#allocation10 + $0x308] sm:$0xff] }
  0xc3   :  { %656 = vmatpush1.bf16.msra.mxu0 %v5575_v35  ;;  %v864_v35 = vld [vmem:[#allocation10 + $0xc8] sm:$0xff] }
  0xc4   :  { %657 = vmatprep.subr.bf16.mxu0 %v5584_v38  ;;  %699 = vmatpush1.bf16.msra.mxu1 %v5577_v46  ;;  %v5645_v38 = vcombine.low %v856_v25, %v860_v26  ;;  %v5654_v41 = vcombine.high %v864_v35, %v868_v36  ;;  %v5653_v45 = vcombine.low %v864_v35, %v868_v36  ;;  %v891_v46 = vld [vmem:[#allocation10 + $0x1a0] sm:$0xff]  ;;  %v924_v26 = vld [vmem:[#allocation10 + $0x2a8] sm:$0xff] }
  0xc5   :  { %700 = vmatprep.subr.bf16.mxu1 %v5586_v49  ;;  %v880_v49 = vld [vmem:[#allocation10 + $0x148] sm:$0xff] }
  0xc7   :  { %658 = vmatpush1.bf16.msra.mxu0 %v5583_v43  ;;  %v876_v43 = vld [vmem:[#allocation10 + $0x128] sm:$0xff] }
  0xc8   :  { %659 = vmatprep.subr.bf16.mxu0 %v5592_v0  ;;  %701 = vmatpush1.bf16.msra.mxu1 %v5585_v54  ;;  %v887_v0 = vld [vmem:[#allocation10 + $0x180] sm:$0xff]  ;;  %v5662_v47 = vcombine.high %v872_v42, %v876_v43  ;;  %v5661_v52 = vcombine.low %v872_v42, %v876_v43 }
  0xc9   :  { %702 = vmatprep.subr.bf16.mxu1 %v5594_v57  ;;  %v5676_v51 = vcombine.high %v887_v0, %v891_v46  ;;  %v899_v54 = vld [vmem:[#allocation10 + $0x1e0] sm:$0xff]  ;;  %v5675_v56 = vcombine.low %v887_v0, %v891_v46  ;;  %v888_v57 = vld [vmem:[#allocation10 + $0x188] sm:$0xff] }
  0xca   :  { %v947_v0 = vld [vmem:[#allocation10 + $0x360] sm:$0xff]  ;;  %v944_v46 = vld [vmem:[#allocation10 + $0x348] sm:$0xff] }
  0xcb   :  { %660 = vmatpush1.bf16.msra.mxu0 %v5591_v50  ;;  %v884_v50 = vld [vmem:[#allocation10 + $0x168] sm:$0xff] }
  0xcc   :  { %661 = vmatprep.subr.bf16.mxu0 %v5600_v53  ;;  %703 = vmatpush1.bf16.msra.mxu1 %v5593_v62  ;;  %v895_v53 = vld [vmem:[#allocation10 + $0x1c0] sm:$0xff]  ;;  %v5670_v55 = vcombine.high %v880_v49, %v884_v50  ;;  %v5669_v60 = vcombine.low %v880_v49, %v884_v50 }
  0xcd   :  { %704 = vmatprep.subr.bf16.mxu1 %v5602_v2  ;;  %v5684_v59 = vcombine.high %v895_v53, %v899_v54  ;;  %v5683_v62 = vcombine.low %v895_v53, %v899_v54  ;;  %v955_v53 = vld [vmem:[#allocation10 + $0x3a0] sm:$0xff]  ;;  %v952_v54 = vld [vmem:[#allocation10 + $0x388] sm:$0xff] }
  0xcf   :  { %662 = vmatpush1.bf16.msra.mxu0 %v5599_v58  ;;  %v892_v58 = vld [vmem:[#allocation10 + $0x1a8] sm:$0xff] }
  0xd0   :  { %663 = vmatprep.subr.bf16.mxu0 %v5608_v61  ;;  %705 = vmatpush1.bf16.msra.mxu1 %v5601_v8  ;;  %v5678_v61 = vcombine.high %v888_v57, %v892_v58  ;;  %v5677_v2 = vcombine.low %v888_v57, %v892_v58  ;;  %v904_v8 = vld [vmem:[#allocation10 + $0x208] sm:$0xff]  ;;  %v959_v57 = vld [vmem:[#allocation10 + $0x3c0] sm:$0xff] }
  0xd1   :  { %706 = vmatprep.subr.bf16.mxu1 %v5610_v11  ;;  %v5694_v13 = vcombine.high %v904_v8, %v908_v10  ;;  %v963_v58 = vld [vmem:[#allocation10 + $0x3e0] sm:$0xff] }
  0xd3   :  { %664 = vmatpush1.bf16.msra.mxu0 %v5607_v3  ;;  %v5686_v3 = vcombine.high %v896_v63, %v900_v1  ;;  %v5748_v1 = vcombine.high %v959_v57, %v963_v58 }
  0xd4   :  { %3953 = vmatprep.subr.bf16.mxu0 %v5628_v6  ;;  %707 = vmatpush1.bf16.msra.mxu1 %v5609_v16  ;;  %v907_v6 = vld [vmem:[#allocation10 + $0x220] sm:$0xff]  ;;  %v912_v16 = vld [vmem:[#allocation10 + $0x248] sm:$0xff] }
  0xd5   :  { %4125 = vmatprep.subr.bf16.mxu1 %v5630_v19  ;;  %v5692_v9 = vcombine.high %v903_v5, %v907_v6  ;;  %v5691_v11 = vcombine.low %v903_v5, %v907_v6  ;;  %v5702_v21 = vcombine.high %v912_v16, %v916_v18  ;;  %v6997_v5 = vld [vmem:[#allocation10 + $0x400] sm:$0xff] }
  0xd6   :  { %682 = vmatmul.mubr.bf16.vlgmr.msra.gmra.mrb[4].mxu0 %v6989_v7  ;;  %v6999_v6 = vld [vmem:[#allocation10 + $0x420] sm:$0xff] }
  0xd7   :  { %3954 = vmatpush1.bf16.msra.mxu0 %v5627_v12  ;;  %725 = vmatmul.mubr.bf16.vlgmr.msra.gmra.mrb[4].mxu1 %v6989_v7  ;;  %v5659_v7 = vcombine.low %v871_v29, %v875_v30  ;;  %v5693_v12 = vcombine.low %v904_v8, %v908_v10  ;;  %v927_v30 = vld [vmem:[#allocation10 + $0x2c0] sm:$0xff]  ;;  %v7001_v8 = vld [vmem:[#allocation10 + $0x408] sm:$0xff] }
  0xd8   :  { %3955 = vmatprep.subr.bf16.mxu0 %v5636_v15  ;;  %4126 = vmatpush1.bf16.msra.mxu1 %v5629_v24  ;;  %v915_v15 = vld [vmem:[#allocation10 + $0x260] sm:$0xff]  ;;  %v920_v24 = vld [vmem:[#allocation10 + $0x288] sm:$0xff] }
  0xd9   :  { %4127 = vmatprep.subr.bf16.mxu1 %v5638_v27  ;;  %v5700_v17 = vcombine.high %v911_v14, %v915_v15  ;;  %v5699_v19 = vcombine.low %v911_v14, %v915_v15  ;;  %v5710_v29 = vcombine.high %v920_v24, %v924_v26  ;;  %v7005_v10 = vld [vmem:[#allocation10 + $0x428] sm:$0xff]  ;;  %v203_v14 = vlaneseq }
  0xdb   :  { %3956 = vmatpush1.bf16.msra.mxu0 %v5635_v20  ;;  %v5701_v20 = vcombine.low %v912_v16, %v916_v18  ;;  %v7013_v15 = vshrl.u32 %v203_v14, 7  ;;  %v979_v14 = vld [vmem:[#allocation10 + $0x460] sm:$0xff] }
  0xdc   :  { %3957 = vmatprep.subr.bf16.mxu0 %v5644_v23  ;;  %4128 = vmatpush1.bf16.msra.mxu1 %v5637_v32  ;;  %v923_v23 = vld [vmem:[#allocation10 + $0x2a0] sm:$0xff]  ;;  %v928_v32 = vld [vmem:[#allocation10 + $0x2c8] sm:$0xff] }
  0xdd   :  { %4129 = vmatprep.subr.bf16.mxu1 %v5646_v33  ;;  %v5708_v25 = vcombine.high %v919_v22, %v923_v23  ;;  %v5707_v27 = vcombine.low %v919_v22, %v923_v23  ;;  %v205_v16 = vsub.s32 0, %v7013_v15  ;;  %v209_v18 = vsub.s32 1, %v7013_v15 }
  0xde   :  { %v217_v23 = vsub.s32 3, %v7013_v15 }
  0xdf   :  { %3958 = vmatpush1.bf16.msra.mxu0 %v5643_v28  ;;  %v5709_v28 = vcombine.low %v920_v24, %v924_v26 }
  0xe0   :  { %3959 = vmatprep.subr.bf16.mxu0 %v5652_v31  ;;  %4130 = vmatpush1.bf16.msra.mxu1 %v5645_v38  ;;  %v931_v31 = vld [vmem:[#allocation10 + $0x2e0] sm:$0xff] }
  0xe1   :  { %4131 = vmatprep.subr.bf16.mxu1 %v5654_v41  ;;  %v5716_v33 = vcombine.high %v927_v30, %v931_v31  ;;  %v5715_v35 = vcombine.low %v927_v30, %v931_v31  ;;  %v935_v38 = vld [vmem:[#allocation10 + $0x300] sm:$0xff] }
  0xe2   :  { %v5724_v41 = vcombine.high %v935_v38, %v939_v39  ;;  %v5723_v42 = vcombine.low %v935_v38, %v939_v39 }
  0xe3   :  { %3960 = vmatpush1.bf16.msra.mxu0 %v5651_v34  ;;  %v932_v34 = vld [vmem:[#allocation10 + $0x2e8] sm:$0xff] }
  0xe4   :  { %3961 = vmatprep.subr.bf16.mxu0 %v5660_v37  ;;  %4132 = vmatpush1.bf16.msra.mxu1 %v5653_v45  ;;  %v5717_v36 = vcombine.low %v928_v32, %v932_v34  ;;  %v5718_v37 = vcombine.high %v928_v32, %v932_v34  ;;  %v943_v45 = vld [vmem:[#allocation10 + $0x340] sm:$0xff] }
  0xe5   :  { %4133 = vmatprep.subr.bf16.mxu1 %v5662_v47  ;;  %v5732_v47 = vcombine.high %v943_v45, %v947_v0  ;;  %v5731_v49 = vcombine.low %v943_v45, %v947_v0 }
  0xe7   :  { %3962 = vmatpush1.bf16.msra.mxu0 %v5659_v7  ;;  %v940_v7 = vld [vmem:[#allocation10 + $0x328] sm:$0xff] }
  0xe8   :  { %3963 = vmatprep.subr.bf16.mxu0 %v5668_v44  ;;  %4134 = vmatpush1.bf16.msra.mxu1 %v5661_v52  ;;  %v5725_v43 = vcombine.low %v936_v40, %v940_v7  ;;  %v5726_v44 = vcombine.high %v936_v40, %v940_v7  ;;  %v951_v52 = vld [vmem:[#allocation10 + $0x380] sm:$0xff] }
  0xe9   :  { %4135 = vmatprep.subr.bf16.mxu1 %v5670_v55  ;;  %v5740_v55 = vcombine.high %v951_v52, %v955_v53 }
  0xeb   :  { %3964 = vmatpush1.bf16.msra.mxu0 %v5667_v48  ;;  %v948_v48 = vld [vmem:[#allocation10 + $0x368] sm:$0xff] }
  0xec   :  { %3965 = vmatprep.subr.bf16.mxu0 %v5676_v51  ;;  %4136 = vmatpush1.bf16.msra.mxu1 %v5669_v60  ;;  %v5733_v50 = vcombine.low %v944_v46, %v948_v48  ;;  %v5734_v51 = vcombine.high %v944_v46, %v948_v48 }
  0xed   :  { %4137 = vmatprep.subr.bf16.mxu1 %v5678_v61  ;;  %v960_v61 = vld [vmem:[#allocation10 + $0x3c8] sm:$0xff] }
  0xef   :  { %3966 = vmatpush1.bf16.msra.mxu0 %v5675_v56  ;;  %v956_v56 = vld [vmem:[#allocation10 + $0x3a8] sm:$0xff] }
  0xf0   :  { %3967 = vmatprep.subr.bf16.mxu0 %v5684_v59  ;;  %4138 = vmatpush1.bf16.msra.mxu1 %v5677_v2  ;;  %v5739_v59 = vcombine.low %v951_v52, %v955_v53  ;;  %v5742_v60 = vcombine.high %v952_v54, %v956_v56  ;;  %v5741_v63 = vcombine.low %v952_v54, %v956_v56 }
  0xf1   :  { %4139 = vmatprep.subr.bf16.mxu1 %v5686_v3  ;;  %v5747_v3 = vcombine.low %v959_v57, %v963_v58 }
  0xf3   :  { %3968 = vmatpush1.bf16.msra.mxu0 %v5683_v62  ;;  %v964_v62 = vld [vmem:[#allocation10 + $0x3e8] sm:$0xff] }
  0xf4   :  { %4140 = vmatpush1.bf16.msra.mxu1 %v5685_v4  ;;  %3969 = vmatprep.subr.bf16.mxu0 %v5692_v9  ;;  %v5750_v2 = vcombine.high %v960_v61, %v964_v62  ;;  %v5749_v4 = vcombine.low %v960_v61, %v964_v62  ;;  %v5756_v9 = vcombine.high %v6997_v5, %v6999_v6 }
  0xf5   :  { %4141 = vmatprep.subr.bf16.mxu1 %v5694_v13  ;;  %v5758_v13 = vcombine.high %v7001_v8, %v7005_v10 }
  0xf7   :  { %3970 = vmatpush1.bf16.msra.mxu0 %v5691_v11  ;;  %v5755_v11 = vcombine.low %v6997_v5, %v6999_v6  ;;  %v992_v5 = vld [vmem:[#allocation10 + $0x4c8] sm:$0xff] }
  0xf8   :  { %4142 = vmatpush1.bf16.msra.mxu1 %v5693_v12  ;;  %3971 = vmatprep.subr.bf16.mxu0 %v5700_v17  ;;  %v5757_v12 = vcombine.low %v7001_v8, %v7005_v10  ;;  %v7016_v17 = vld [vmem:[#allocation8] sm:$0xff]  ;;  %v996_v6 = vld [vmem:[#allocation10 + $0x4e8] sm:$0xff] }
  0xf9   :  { %4143 = vmatprep.subr.bf16.mxu1 %v5702_v21  ;;  %v213_v21 = vsub.s32 2, %v7013_v15  ;;  %v218_v34 = vrot.slane %v7016_v17, %v217_v23 }
  0xfb   :  { %3972 = vmatpush1.bf16.msra.mxu0 %v5699_v19  ;;  %v206_v19 = vrot.slane %v7016_v17, %v205_v16  ;;  %v214_v31 = vrot.slane %v7016_v17, %v213_v21 }
  0xfc   :  { %4144 = vmatpush1.bf16.msra.mxu1 %v5701_v20  ;;  %3973 = vmatprep.subr.bf16.mxu0 %v5708_v25  ;;  %v210_v20 = vrot.slane %v7016_v17, %v209_v18 }
  0xfd   :  { %4145 = vmatprep.subr.bf16.mxu1 %v5710_v29 }
  0xff   :  { %3974 = vmatpush1.bf16.msra.mxu0 %v5707_v27 }
 0x100   :  { %4146 = vmatpush1.bf16.msra.mxu1 %v5709_v28  ;;  %3975 = vmatprep.subr.bf16.mxu0 %v5716_v33 }
 0x101   :  { %4147 = vmatprep.subr.bf16.mxu1 %v5718_v37 }
 0x103   :  { %3976 = vmatpush1.bf16.msra.mxu0 %v5715_v35 }
 0x104   :  { %4148 = vmatpush1.bf16.msra.mxu1 %v5717_v36  ;;  %3977 = vmatprep.subr.bf16.mxu0 %v5724_v41 }
 0x105   :  { %4149 = vmatprep.subr.bf16.mxu1 %v5726_v44 }
 0x107   :  { %3978 = vmatpush1.bf16.msra.mxu0 %v5723_v42 }
 0x108   :  { %4150 = vmatpush1.bf16.msra.mxu1 %v5725_v43  ;;  %3979 = vmatprep.subr.bf16.mxu0 %v5732_v47 }
 0x109   :  { %4151 = vmatprep.subr.bf16.mxu1 %v5734_v51 }
 0x10b   :  { %3980 = vmatpush1.bf16.msra.mxu0 %v5731_v49 }
 0x10c   :  { %4152 = vmatpush1.bf16.msra.mxu1 %v5733_v50  ;;  %3981 = vmatprep.subr.bf16.mxu0 %v5740_v55 }
 0x10d   :  { %4153 = vmatprep.subr.bf16.mxu1 %v5742_v60 }
 0x10f   :  { %3982 = vmatpush1.bf16.msra.mxu0 %v5739_v59 }
 0x110   :  { %4154 = vmatpush1.bf16.msra.mxu1 %v5741_v63  ;;  %3983 = vmatprep.subr.bf16.mxu0 %v5748_v1  ;;  %v221_v63 = vsub.s32 4, %v7013_v15  ;;  %v225_v1 = vsub.s32 5, %v7013_v15 }
 0x111   :  { %4155 = vmatprep.subr.bf16.mxu1 %v5750_v2 }
 0x113   :  { %3984 = vmatpush1.bf16.msra.mxu0 %v5747_v3 }
 0x114   :  { %4156 = vmatpush1.bf16.msra.mxu1 %v5749_v4  ;;  %3996 = vmatprep.subr.bf16.mxu0 %v5756_v9  ;;  %v975_v4 = vld [vmem:[#allocation10 + $0x440] sm:$0xff]  ;;  %v222_v9 = vrot.slane %v7016_v17, %v221_v63 }
 0x115   :  { %4168 = vmatprep.subr.bf16.mxu1 %v5758_v13 }
 0x189   :  { %v597_v22 = vpop.f32.mrb[0].mxu0  ;;  %v640_v37 = vpop.f32.mrb[0].mxu1 }
 0x18a   :  { %v598_v24 = vadd.f32 %v597_v22, %v206_v19  ;;  %v599_v25 = vpop.f32.mrb[1].mxu0  ;;  %v641_v38 = vadd.f32 %v640_v37, %v214_v31  ;;  %v642_v39 = vpop.f32.mrb[1].mxu1  ;;  %v226_v22 = vrot.slane %v7016_v17, %v225_v1 }
 0x18b   :  { %v600_v26 = vadd.f32 %v599_v25, %v210_v20  ;;  %v601_v27 = vpop.f32.mrb[2].mxu0  ;;  %v643_v40 = vadd.f32 %v642_v39, %v218_v34  ;;  %v644_v41 = vpop.f32.mrb[2].mxu1 }
 0x18c   :  { %v5611_v28 = vmul.f32 -1.442695, %v598_v24  ;;  %v602_v29 = vadd.f32 %v601_v27, %v206_v19  ;;  %v603_v30 = vpop.f32.mrb[3].mxu0  ;;  %v5613_v7 = vmul.f32 -1.442695, %v641_v38  ;;  %v645_v42 = vadd.f32 %v644_v41, %v214_v31  ;;  %v646_v43 = vpop.f32.mrb[3].mxu1 }
 0x18d   :  { %v5612_v32 = vmul.f32 -1.442695, %v600_v26  ;;  %v604_v33 = vadd.f32 %v603_v30, %v210_v20  ;;  %v5614_v44 = vmul.f32 -1.442695, %v643_v40  ;;  %v647_v45 = vadd.f32 %v646_v43, %v218_v34  ;;  %v976_v19 = vld [vmem:[#allocation10 + $0x448] sm:$0xff]  ;;  %v983_v30 = vld [vmem:[#allocation10 + $0x480] sm:$0xff] }
 0x18e   :  { %6471 = vpow2.f32 %v5611_v28  ;;  %v5619_v35 = vmul.f32 -1.442695, %v602_v29  ;;  %v5621_v0 = vmul.f32 -1.442695, %v645_v42  ;;  %v980_v20 = vld [vmem:[#allocation10 + $0x468] sm:$0xff]  ;;  %v5764_v28 = vcombine.high %v975_v4, %v979_v14  ;;  %v987_v31 = vld [vmem:[#allocation10 + $0x4a0] sm:$0xff] }
 0x18f   :  { %6473 = vpow2.f32 %v5612_v32  ;;  %v5620_v36 = vmul.f32 -1.442695, %v604_v33  ;;  %v5622_v46 = vmul.f32 -1.442695, %v647_v45  ;;  %v5766_v29 = vcombine.high %v976_v19, %v980_v20 }
 0x190   :  { %6475 = vpow2.f32 %v5619_v35  ;;  %v984_v35 = vld [vmem:[#allocation10 + $0x488] sm:$0xff]  ;;  %v5763_v40 = vcombine.low %v975_v4, %v979_v14  ;;  %v5772_v45 = vcombine.high %v983_v30, %v987_v31  ;;  %v5771_v10 = vcombine.low %v983_v30, %v987_v31 }
 0x191   :  { %6477 = vpow2.f32 %v5620_v36  ;;  %v988_v36 = vld [vmem:[#allocation10 + $0x4a8] sm:$0xff] }
 0x192   :  { %6479 = vpow2.f32 %v5613_v7  ;;  %v1008_v4 = vld [vmem:[#allocation10 + $0x548] sm:$0xff] }
 0x193   :  { %6481 = vpow2.f32 %v5614_v44  ;;  %v5765_v44 = vcombine.low %v976_v19, %v980_v20 }
 0x194   :  { %6483 = vpow2.f32 %v5621_v0 }
 0x195   :  { %6485 = vpow2.f32 %v5622_v46 }
 0x198   :  { %v6472_v47 = vpop.eup %6471 }
 0x199   :  { %v6474_v48 = vpop.eup %6473  ;;  %v783_v49 = vadd.f32 1.0, %v6472_v47 }
 0x19a   :  { %v6476_v50 = vpop.eup %6475  ;;  %v784_v51 = vadd.f32 1.0, %v6474_v48  ;;  %v5774_v48 = vcombine.high %v984_v35, %v988_v36 }
 0x19b   :  { %v6478_v52 = vpop.eup %6477  ;;  %6487 = vrcp.f32 %v783_v49  ;;  %v791_v53 = vadd.f32 1.0, %v6476_v50  ;;  %v991_v49 = vld [vmem:[#allocation10 + $0x4c0] sm:$0xff] }
 0x19c   :  { %6489 = vrcp.f32 %v784_v51  ;;  %v792_v54 = vadd.f32 1.0, %v6478_v52  ;;  %v6480_v55 = vpop.eup %6479  ;;  %v995_v52 = vld [vmem:[#allocation10 + $0x4e0] sm:$0xff] }
 0x19d   :  { %6491 = vrcp.f32 %v791_v53  ;;  %v6482_v56 = vpop.eup %6481  ;;  %v785_v57 = vadd.f32 1.0, %v6480_v55  ;;  %v5780_v53 = vcombine.high %v991_v49, %v995_v52  ;;  %v999_v55 = vld [vmem:[#allocation10 + $0x500] sm:$0xff] }
 0x19e   :  { %6493 = vrcp.f32 %v792_v54  ;;  %v6484_v58 = vpop.eup %6483  ;;  %v786_v59 = vadd.f32 1.0, %v6482_v56  ;;  %v5782_v54 = vcombine.high %v992_v5, %v996_v6  ;;  %v1003_v56 = vld [vmem:[#allocation10 + $0x520] sm:$0xff] }
 0x19f   :  { %v6486_v60 = vpop.eup %6485  ;;  %6495 = vrcp.f32 %v785_v57  ;;  %v793_v61 = vadd.f32 1.0, %v6484_v58  ;;  %v1000_v57 = vld [vmem:[#allocation10 + $0x508] sm:$0xff]  ;;  %v5787_v19 = vcombine.low %v999_v55, %v1003_v56 }
 0x1a0   :  { %6497 = vrcp.f32 %v786_v59  ;;  %v794_v62 = vadd.f32 1.0, %v6486_v60  ;;  %v1004_v58 = vld [vmem:[#allocation10 + $0x528] sm:$0xff]  ;;  %v5779_v59 = vcombine.low %v991_v49, %v995_v52  ;;  %v5781_v60 = vcombine.low %v992_v5, %v996_v6  ;;  %v1031_v5 = vld [vmem:[#allocation10 + $0x600] sm:$0xff] }
 0x1a1   :  { %6499 = vrcp.f32 %v793_v61  ;;  %v5788_v61 = vcombine.high %v999_v55, %v1003_v56  ;;  %v5789_v20 = vcombine.low %v1000_v57, %v1004_v58  ;;  %v1035_v55 = vld [vmem:[#allocation10 + $0x620] sm:$0xff]  ;;  %v1032_v56 = vld [vmem:[#allocation10 + $0x608] sm:$0xff] }
 0x1a2   :  { %6501 = vrcp.f32 %v794_v62  ;;  %v5790_v62 = vcombine.high %v1000_v57, %v1004_v58  ;;  %v1036_v57 = vld [vmem:[#allocation10 + $0x628] sm:$0xff] }
 0x1a5   :  { %v6488_v2 = vpop.eup %6487 }
 0x1a6   :  { %v6490_v3 = vpop.eup %6489 }
 0x1a7   :  { %v6492_v13 = vpop.eup %6491 }
 0x1a8   :  { %v6494_v24 = vpop.eup %6493  ;;  %v7041_v25 = vpack.c.bf16 %v6492_v13, %v6488_v2  ;;  %v1007_v2 = vld [vmem:[#allocation10 + $0x540] sm:$0xff] }
 0x1a9   :  { %v7043_v26 = vpack.c.bf16 %v6494_v24, %v6490_v3  ;;  %v683_v27 = vpop.f32.mrb[4].mxu0  ;;  %v6496_v34 = vpop.eup %6495  ;;  %v1011_v3 = vld [vmem:[#allocation10 + $0x560] sm:$0xff] }
 0x1aa   :  { %v684_v32 = vadd.f32 %v683_v27, %v222_v9  ;;  %v685_v33 = vpop.f32.mrb[5].mxu0  ;;  %v6498_v39 = vpop.eup %6497  ;;  %v5796_v27 = vcombine.high %v1007_v2, %v1011_v3 }
 0x1ab   :  { %3985 = vmatprep.mubr.bf16.mxu0 %v7043_v26  ;;  %4157 = vmatprep.mubr.bf16.mxu1 %v7043_v26  ;;  %v686_v37 = vadd.f32 %v685_v33, %v226_v22  ;;  %v687_v38 = vpop.f32.mrb[6].mxu0  ;;  %v6500_v43 = vpop.eup %6499  ;;  %v1016_v33 = vld [vmem:[#allocation10 + $0x588] sm:$0xff] }
 0x1ac   :  { %3986 = vmatmul.mubr.bf16.vlgmr.msra.gmra.mrb[8].mxu0 %v7041_v25  ;;  %4158 = vmatmul.mubr.bf16.vlgmr.msra.gmra.mrb[8].mxu1 %v7041_v25  ;;  %v5615_v41 = vmul.f32 -1.442695, %v684_v32  ;;  %v688_v7 = vadd.f32 %v687_v38, %v222_v9  ;;  %v689_v42 = vpop.f32.mrb[7].mxu0  ;;  %v6502_v47 = vpop.eup %6501  ;;  %v7055_v50 = vpack.c.bf16 %v6500_v43, %v6496_v34  ;;  %v1012_v9 = vld [vmem:[#allocation10 + $0x568] sm:$0xff]  ;;  %v1019_v32 = vld [vmem:[#allocation10 + $0x5a0] sm:$0xff] }
 0x1ad   :  { %3997 = vmatpush1.bf16.msra.mxu0 %v5755_v11  ;;  %4169 = vmatpush1.bf16.msra.mxu1 %v5757_v12  ;;  %v5616_v0 = vmul.f32 -1.442695, %v686_v37  ;;  %v690_v46 = vadd.f32 %v689_v42, %v226_v22  ;;  %v7057_v11 = vpack.c.bf16 %v6502_v47, %v6498_v39  ;;  %v5773_v12 = vcombine.low %v984_v35, %v988_v36  ;;  %v1020_v34 = vld [vmem:[#allocation10 + $0x5a8] sm:$0xff]  ;;  %v1023_v43 = vld [vmem:[#allocation10 + $0x5c0] sm:$0xff] }
 0x1ae   :  { %3998 = vmatprep.subr.bf16.mxu0 %v5764_v28  ;;  %4170 = vmatprep.subr.bf16.mxu1 %v5766_v29  ;;  %6503 = vpow2.f32 %v5615_v41  ;;  %v5623_v51 = vmul.f32 -1.442695, %v688_v7  ;;  %v5798_v28 = vcombine.high %v1008_v4, %v1012_v9  ;;  %v1015_v29 = vld [vmem:[#allocation10 + $0x580] sm:$0xff]  ;;  %v5795_v36 = vcombine.low %v1007_v2, %v1011_v3 }
 0x1af   :  { %6505 = vpow2.f32 %v5616_v0  ;;  %v5624_v8 = vmul.f32 -1.442695, %v690_v46  ;;  %4028 = vmatprep.mubr.bf16.mxu0 %v7057_v11  ;;  %4200 = vmatprep.mubr.bf16.mxu1 %v7057_v11  ;;  %v5797_v38 = vcombine.low %v1008_v4, %v1012_v9  ;;  %v229_v39 = vsub.s32 6, %v7013_v15  ;;  %v1024_v0 = vld [vmem:[#allocation10 + $0x5c8] sm:$0xff] }
 0x1b0   :  { %6507 = vpow2.f32 %v5623_v51  ;;  %v233_v41 = vsub.s32 7, %v7013_v15  ;;  %v5804_v7 = vcombine.high %v1015_v29, %v1019_v32  ;;  %v5806_v42 = vcombine.high %v1016_v33, %v1020_v34  ;;  %v1028_v46 = vld [vmem:[#allocation10 + $0x5e8] sm:$0xff] }
 0x1b1   :  { %3999 = vmatpush1.bf16.msra.mxu0 %v5763_v40  ;;  %4171 = vmatpush1.bf16.msra.mxu1 %v5765_v44  ;;  %6509 = vpow2.f32 %v5624_v8  ;;  %v726_v40 = vpop.f32.mrb[4].mxu1  ;;  %v230_v47 = vrot.slane %v7016_v17, %v229_v39  ;;  %v5803_v51 = vcombine.low %v1015_v29, %v1019_v32  ;;  %v5805_v52 = vcombine.low %v1016_v33, %v1020_v34  ;;  %v1047_v34 = vld [vmem:[#allocation10 + $0x680] sm:$0xff] }
 0x1b2   :  { %4000 = vmatprep.subr.bf16.mxu0 %v5772_v45  ;;  %4172 = vmatprep.subr.bf16.mxu1 %v5774_v48  ;;  %v728_v44 = vpop.f32.mrb[5].mxu1  ;;  %v1027_v45 = vld [vmem:[#allocation10 + $0x5e0] sm:$0xff]  ;;  %v234_v48 = vrot.slane %v7016_v17, %v233_v41  ;;  %v5813_v3 = vcombine.low %v1024_v0, %v1028_v46  ;;  %v5820_v9 = vcombine.high %v1031_v5, %v1035_v55 }
 0x1b3   :  { %v730_v49 = vpop.f32.mrb[6].mxu1  ;;  %v727_v6 = vadd.f32 %v726_v40, %v230_v47  ;;  %v5811_v2 = vcombine.low %v1023_v43, %v1027_v45  ;;  %v5819_v29 = vcombine.low %v1031_v5, %v1035_v55  ;;  %v1064_v55 = vld [vmem:[#allocation10 + $0x708] sm:$0xff] }
 0x1b4   :  { %v729_v8 = vadd.f32 %v728_v44, %v234_v48 }
 0x1b5   :  { %4001 = vmatpush1.bf16.msra.mxu0 %v5771_v10  ;;  %4173 = vmatpush1.bf16.msra.mxu1 %v5773_v12  ;;  %v731_v10 = vadd.f32 %v730_v49, %v230_v47  ;;  %v732_v12 = vpop.f32.mrb[7].mxu1 }
 0x1b6   :  { %4002 = vmatprep.subr.bf16.mxu0 %v5780_v53  ;;  %4174 = vmatprep.subr.bf16.mxu1 %v5782_v54  ;;  %v5812_v53 = vcombine.high %v1023_v43, %v1027_v45  ;;  %v5814_v54 = vcombine.high %v1024_v0, %v1028_v46  ;;  %v733_v58 = vadd.f32 %v732_v12, %v234_v48  ;;  %v5618_v17 = vmul.f32 -1.442695, %v729_v8  ;;  %v1055_v43 = vld [vmem:[#allocation10 + $0x6c0] sm:$0xff]  ;;  %v1056_v0 = vld [vmem:[#allocation10 + $0x6c8] sm:$0xff] }
 0x1b7   :  { %v1059_v45 = vld [vmem:[#allocation10 + $0x6e0] sm:$0xff]  ;;  %v1060_v46 = vld [vmem:[#allocation10 + $0x6e8] sm:$0xff] }
 0x1b8   :  { %v6504_v13 = vpop.eup %6503  ;;  %v5844_v8 = vcombine.high %v1055_v43, %v1059_v45  ;;  %v1063_v12 = vld [vmem:[#allocation10 + $0x700] sm:$0xff] }
 0x1b9   :  { %v6506_v14 = vpop.eup %6505  ;;  %4003 = vmatpush1.bf16.msra.mxu0 %v5779_v59  ;;  %4175 = vmatpush1.bf16.msra.mxu1 %v5781_v60  ;;  %v787_v22 = vadd.f32 1.0, %v6504_v13  ;;  %v5617_v59 = vmul.f32 -1.442695, %v727_v6  ;;  %v5625_v60 = vmul.f32 -1.442695, %v731_v10  ;;  %v5822_v13 = vcombine.high %v1032_v56, %v1036_v57 }
 0x1ba   :  { %v6508_v24 = vpop.eup %6507  ;;  %4004 = vmatprep.subr.bf16.mxu0 %v5788_v61  ;;  %4176 = vmatprep.subr.bf16.mxu1 %v5790_v62  ;;  %v788_v30 = vadd.f32 1.0, %v6506_v14  ;;  %v5626_v61 = vmul.f32 -1.442695, %v733_v58  ;;  %v1039_v14 = vld [vmem:[#allocation10 + $0x640] sm:$0xff]  ;;  %v5846_v10 = vcombine.high %v1056_v0, %v1060_v46  ;;  %v5843_v58 = vcombine.low %v1055_v43, %v1059_v45 }
 0x1bb   :  { %v6510_v31 = vpop.eup %6509  ;;  %6511 = vrcp.f32 %v787_v22  ;;  %v795_v35 = vadd.f32 1.0, %v6508_v24  ;;  %v1040_v22 = vld [vmem:[#allocation10 + $0x648] sm:$0xff] }
 0x1bc   :  { %6513 = vrcp.f32 %v788_v30  ;;  %v796_v37 = vadd.f32 1.0, %v6510_v31  ;;  %v1044_v24 = vld [vmem:[#allocation10 + $0x668] sm:$0xff]  ;;  %v5821_v30 = vcombine.low %v1032_v56, %v1036_v57 }
 0x1bd   :  { %4005 = vmatpush1.bf16.msra.mxu0 %v5787_v19  ;;  %4177 = vmatpush1.bf16.msra.mxu1 %v5789_v20  ;;  %6515 = vrcp.f32 %v795_v35  ;;  %v1043_v20 = vld [vmem:[#allocation10 + $0x660] sm:$0xff]  ;;  %v5830_v33 = vcombine.high %v1040_v22, %v1044_v24  ;;  %v5829_v40 = vcombine.low %v1040_v22, %v1044_v24  ;;  %v1068_v56 = vld [vmem:[#allocation10 + $0x728] sm:$0xff] }
 0x1be   :  { %4006 = vmatprep.subr.bf16.mxu0 %v5796_v27  ;;  %4178 = vmatprep.subr.bf16.mxu1 %v5798_v28  ;;  %6517 = vrcp.f32 %v796_v37  ;;  %v5828_v32 = vcombine.high %v1039_v14, %v1043_v20  ;;  %v1051_v35 = vld [vmem:[#allocation10 + $0x6a0] sm:$0xff]  ;;  %v1052_v37 = vld [vmem:[#allocation10 + $0x6a8] sm:$0xff] }
 0x1bf   :  { %6519 = vpow2.f32 %v5617_v59  ;;  %v5845_v59 = vcombine.low %v1056_v0, %v1060_v46  ;;  %v1080_v22 = vld [vmem:[#allocation10 + $0x788] sm:$0xff] }
 0x1c0   :  { %6521 = vpow2.f32 %v5618_v17  ;;  %v1084_v24 = vld [vmem:[#allocation10 + $0x7a8] sm:$0xff] }
 0x1c1   :  { %4007 = vmatpush1.bf16.msra.mxu0 %v5795_v36  ;;  %4179 = vmatpush1.bf16.msra.mxu1 %v5797_v38  ;;  %6523 = vpow2.f32 %v5625_v60  ;;  %v1048_v36 = vld [vmem:[#allocation10 + $0x688] sm:$0xff]  ;;  %v5827_v38 = vcombine.low %v1039_v14, %v1043_v20  ;;  %v5854_v60 = vcombine.high %v1064_v55, %v1068_v56  ;;  %v1083_v20 = vld [vmem:[#allocation10 + $0x7a0] sm:$0xff]  ;;  %v5869_v45 = vcombine.low %v1080_v22, %v1084_v24 }
 0x1c2   :  { %4008 = vmatprep.subr.bf16.mxu0 %v5804_v7  ;;  %4180 = vmatprep.subr.bf16.mxu1 %v5806_v42  ;;  %6525 = vpow2.f32 %v5626_v61  ;;  %v5836_v7 = vcombine.high %v1047_v34, %v1051_v35  ;;  %v5838_v42 = vcombine.high %v1048_v36, %v1052_v37  ;;  %v1071_v61 = vld [vmem:[#allocation10 + $0x740] sm:$0xff] }
 0x1c5   :  { %v6512_v62 = vpop.eup %6511  ;;  %4009 = vmatpush1.bf16.msra.mxu0 %v5803_v51  ;;  %4181 = vmatpush1.bf16.msra.mxu1 %v5805_v52  ;;  %v5835_v51 = vcombine.low %v1047_v34, %v1051_v35  ;;  %v5837_v52 = vcombine.low %v1048_v36, %v1052_v37  ;;  %v5870_v35 = vcombine.high %v1080_v22, %v1084_v24  ;;  %v1087_v36 = vld [vmem:[#allocation10 + $0x7c0] sm:$0xff] }
 0x1c6   :  { %v6514_v4 = vpop.eup %6513  ;;  %4010 = vmatprep.subr.bf16.mxu0 %v5812_v53  ;;  %4182 = vmatprep.subr.bf16.mxu1 %v5814_v54  ;;  %v1067_v54 = vld [vmem:[#allocation10 + $0x720] sm:$0xff] }
 0x1c7   :  { %v6516_v19 = vpop.eup %6515  ;;  %v5852_v17 = vcombine.high %v1063_v12, %v1067_v54 }
 0x1c8   :  { %v6518_v27 = vpop.eup %6517  ;;  %v7069_v28 = vpack.c.bf16 %v6516_v19, %v6512_v62  ;;  %v1075_v62 = vld [vmem:[#allocation10 + $0x760] sm:$0xff] }
 0x1c9   :  { %4011 = vmatpush1.bf16.msra.mxu0 %v5811_v2  ;;  %4183 = vmatpush1.bf16.msra.mxu1 %v5813_v3  ;;  %v7071_v31 = vpack.c.bf16 %v6518_v27, %v6514_v4  ;;  %v6520_v44 = vpop.eup %6519  ;;  %v1072_v2 = vld [vmem:[#allocation10 + $0x748] sm:$0xff]  ;;  %v5851_v4 = vcombine.low %v1063_v12, %v1067_v54  ;;  %v1079_v19 = vld [vmem:[#allocation10 + $0x780] sm:$0xff] }
 0x1ca   :  { %4012 = vmatprep.subr.bf16.mxu0 %v5820_v9  ;;  %4184 = vmatprep.subr.bf16.mxu1 %v5822_v13  ;;  %v6522_v47 = vpop.eup %6521  ;;  %v789_v48 = vadd.f32 1.0, %v6520_v44  ;;  %v1076_v3 = vld [vmem:[#allocation10 + $0x768] sm:$0xff]  ;;  %v5853_v9 = vcombine.low %v1064_v55, %v1068_v56  ;;  %v5860_v13 = vcombine.high %v1071_v61, %v1075_v62  ;;  %v5868_v34 = vcombine.high %v1079_v19, %v1083_v20  ;;  %v1107_v12 = vld [vmem:[#allocation10 + $0x860] sm:$0xff] }
 0x1cb   :  { %v6524_v49 = vpop.eup %6523  ;;  %v790_v5 = vadd.f32 1.0, %v6522_v47  ;;  %v5862_v14 = vcombine.high %v1072_v2, %v1076_v3  ;;  %v5867_v44 = vcombine.low %v1079_v19, %v1083_v20  ;;  %v1095_v47 = vld [vmem:[#allocation10 + $0x800] sm:$0xff]  ;;  %v1108_v54 = vld [vmem:[#allocation10 + $0x868] sm:$0xff] }
 0x1cc   :  { %v6526_v6 = vpop.eup %6525  ;;  %6527 = vrcp.f32 %v789_v48  ;;  %v797_v53 = vadd.f32 1.0, %v6524_v49  ;;  %v1099_v48 = vld [vmem:[#allocation10 + $0x820] sm:$0xff]  ;;  %v1096_v49 = vld [vmem:[#allocation10 + $0x808] sm:$0xff] }
 0x1cd   :  { %4013 = vmatpush1.bf16.msra.mxu0 %v5819_v29  ;;  %4185 = vmatpush1.bf16.msra.mxu1 %v5821_v30  ;;  %6529 = vrcp.f32 %v790_v5  ;;  %v798_v57 = vadd.f32 1.0, %v6526_v6  ;;  %v5859_v30 = vcombine.low %v1071_v61, %v1075_v62  ;;  %v5884_v6 = vcombine.high %v1095_v47, %v1099_v48  ;;  %v1116_v61 = vld [vmem:[#allocation10 + $0x8a8] sm:$0xff] }
 0x1ce   :  { %4014 = vmatprep.subr.bf16.mxu0 %v5828_v32  ;;  %4186 = vmatprep.subr.bf16.mxu1 %v5830_v33  ;;  %6531 = vrcp.f32 %v797_v53  ;;  %v5861_v32 = vcombine.low %v1072_v2, %v1076_v3  ;;  %v1104_v53 = vld [vmem:[#allocation10 + $0x848] sm:$0xff]  ;;  %v5883_v55 = vcombine.low %v1095_v47, %v1099_v48  ;;  %v1143_v48 = vld [vmem:[#allocation10 + $0x980] sm:$0xff] }
 0x1cf   :  { %6533 = vrcp.f32 %v798_v57  ;;  %v5893_v2 = vcombine.low %v1104_v53, %v1108_v54  ;;  %v1124_v19 = vld [vmem:[#allocation10 + $0x8e8] sm:$0xff] }
 0x1d1   :  { %4015 = vmatpush1.bf16.msra.mxu0 %v5827_v38  ;;  %4187 = vmatpush1.bf16.msra.mxu1 %v5829_v40  ;;  %v1091_v38 = vld [vmem:[#allocation10 + $0x7e0] sm:$0xff]  ;;  %v1088_v40 = vld [vmem:[#allocation10 + $0x7c8] sm:$0xff] }
 0x1d2   :  { %4016 = vmatprep.subr.bf16.mxu0 %v5836_v7  ;;  %4188 = vmatprep.subr.bf16.mxu1 %v5838_v42  ;;  %v1092_v7 = vld [vmem:[#allocation10 + $0x7e8] sm:$0xff]  ;;  %v5876_v0 = vcombine.high %v1087_v36, %v1091_v38 }
 0x1d3   :  { %v5878_v46 = vcombine.high %v1088_v40, %v1092_v7  ;;  %v5877_v5 = vcombine.low %v1088_v40, %v1092_v7  ;;  %v1139_v40 = vld [vmem:[#allocation10 + $0x960] sm:$0xff]  ;;  %v1136_v7 = vld [vmem:[#allocation10 + $0x948] sm:$0xff] }
 0x1d5   :  { %4017 = vmatpush1.bf16.msra.mxu0 %v5835_v51  ;;  %4189 = vmatpush1.bf16.msra.mxu1 %v5837_v52  ;;  %v1100_v51 = vld [vmem:[#allocation10 + $0x828] sm:$0xff]  ;;  %v5875_v52 = vcombine.low %v1087_v36, %v1091_v38  ;;  %v1135_v38 = vld [vmem:[#allocation10 + $0x940] sm:$0xff] }
 0x1d6   :  { %4018 = vmatprep.subr.bf16.mxu0 %v5844_v8  ;;  %4190 = vmatprep.subr.bf16.mxu1 %v5846_v10  ;;  %v6528_v27 = vpop.eup %6527  ;;  %v5886_v8 = vcombine.high %v1096_v49, %v1100_v51  ;;  %v1103_v10 = vld [vmem:[#allocation10 + $0x840] sm:$0xff]  ;;  %v5885_v56 = vcombine.low %v1096_v49, %v1100_v51  ;;  %v1144_v51 = vld [vmem:[#allocation10 + $0x988] sm:$0xff] }
 0x1d7   :  { %v6530_v29 = vpop.eup %6529  ;;  %v5892_v57 = vcombine.high %v1103_v10, %v1107_v12  ;;  %v5891_v62 = vcombine.low %v1103_v10, %v1107_v12  ;;  %v1147_v49 = vld [vmem:[#allocation10 + $0x9a0] sm:$0xff] }
 0x1d8   :  { %v6532_v33 = vpop.eup %6531  ;;  %v1151_v12 = vld [vmem:[#allocation10 + $0x9c0] sm:$0xff] }
 0x1d9   :  { %4019 = vmatpush1.bf16.msra.mxu0 %v5843_v58  ;;  %4191 = vmatpush1.bf16.msra.mxu1 %v5845_v59  ;;  %v6534_v37 = vpop.eup %6533  ;;  %v7073_v42 = vpack.c.bf16 %v6532_v33, %v6528_v27  ;;  %v5894_v58 = vcombine.high %v1104_v53, %v1108_v54  ;;  %v1111_v59 = vld [vmem:[#allocation10 + $0x880] sm:$0xff]  ;;  %v1132_v33 = vld [vmem:[#allocation10 + $0x928] sm:$0xff] }
 0x1da   :  { %4020 = vmatprep.subr.bf16.mxu0 %v5852_v17  ;;  %4192 = vmatprep.subr.bf16.mxu1 %v5854_v60  ;;  %v7075_v43 = vpack.c.bf16 %v6534_v37, %v6530_v29  ;;  %v1115_v17 = vld [vmem:[#allocation10 + $0x8a0] sm:$0xff]  ;;  %v1112_v60 = vld [vmem:[#allocation10 + $0x888] sm:$0xff] }
 0x1db   :  { %v5900_v3 = vcombine.high %v1111_v59, %v1115_v17  ;;  %v5899_v20 = vcombine.low %v1111_v59, %v1115_v17  ;;  %v5901_v22 = vcombine.low %v1112_v60, %v1116_v61  ;;  %v1127_v29 = vld [vmem:[#allocation10 + $0x900] sm:$0xff]  ;;  %v1152_v54 = vld [vmem:[#allocation10 + $0x9c8] sm:$0xff] }
 0x1dc   :  { %v1155_v53 = vld [vmem:[#allocation10 + $0x9e0] sm:$0xff] }
 0x1dd   :  { %4021 = vmatpush1.bf16.msra.mxu0 %v5851_v4  ;;  %4193 = vmatpush1.bf16.msra.mxu1 %v5853_v9  ;;  %v5902_v4 = vcombine.high %v1112_v60, %v1116_v61  ;;  %v1119_v9 = vld [vmem:[#allocation10 + $0x8c0] sm:$0xff]  ;;  %v1160_v61 = vld [vmem:[#allocation10 + $0xa08] sm:$0xff] }
 0x1de   :  { %4022 = vmatprep.subr.bf16.mxu0 %v5860_v13  ;;  %4194 = vmatprep.subr.bf16.mxu1 %v5862_v14  ;;  %v1123_v13 = vld [vmem:[#allocation10 + $0x8e0] sm:$0xff]  ;;  %v1120_v14 = vld [vmem:[#allocation10 + $0x8c8] sm:$0xff] }
 0x1df   :  { %v5908_v24 = vcombine.high %v1119_v9, %v1123_v13  ;;  %v5910_v27 = vcombine.high %v1120_v14, %v1124_v19  ;;  %v1159_v17 = vld [vmem:[#allocation10 + $0xa00] sm:$0xff] }
 0x1e0   :  { %v1163_v60 = vld [vmem:[#allocation10 + $0xa20] sm:$0xff] }
 0x1e1   :  { %4023 = vmatpush1.bf16.msra.mxu0 %v5859_v30  ;;  %4195 = vmatpush1.bf16.msra.mxu1 %v5861_v32  ;;  %v1131_v30 = vld [vmem:[#allocation10 + $0x920] sm:$0xff]  ;;  %v1128_v32 = vld [vmem:[#allocation10 + $0x908] sm:$0xff] }
 0x1e2   :  { %4024 = vmatprep.subr.bf16.mxu0 %v5868_v34  ;;  %4196 = vmatprep.subr.bf16.mxu1 %v5870_v35  ;;  %v5907_v34 = vcombine.low %v1119_v9, %v1123_v13  ;;  %v5909_v35 = vcombine.low %v1120_v14, %v1124_v19  ;;  %v5916_v36 = vcombine.high %v1127_v29, %v1131_v30  ;;  %v1167_v13 = vld [vmem:[#allocation10 + $0xa40] sm:$0xff]  ;;  %v1168_v19 = vld [vmem:[#allocation10 + $0xa48] sm:$0xff] }
 0x1e3   :  { %v5918_v37 = vcombine.high %v1128_v32, %v1132_v33  ;;  %v1171_v14 = vld [vmem:[#allocation10 + $0xa60] sm:$0xff] }
 0x1e5   :  { %4025 = vmatpush1.bf16.msra.mxu0 %v5867_v44  ;;  %4197 = vmatpush1.bf16.msra.mxu1 %v5869_v45  ;;  %v1140_v44 = vld [vmem:[#allocation10 + $0x968] sm:$0xff]  ;;  %v5915_v45 = vcombine.low %v1127_v29, %v1131_v30  ;;  %v1175_v30 = vld [vmem:[#allocation10 + $0xa80] sm:$0xff] }
 0x1e6   :  { %4026 = vmatprep.subr.bf16.mxu0 %v5876_v0  ;;  %4198 = vmatprep.subr.bf16.mxu1 %v5878_v46  ;;  %v5917_v0 = vcombine.low %v1128_v32, %v1132_v33  ;;  %v5924_v46 = vcombine.high %v1135_v38, %v1139_v40  ;;  %v5926_v47 = vcombine.high %v1136_v7, %v1140_v44  ;;  %v1179_v32 = vld [vmem:[#allocation10 + $0xaa0] sm:$0xff]  ;;  %v1176_v33 = vld [vmem:[#allocation10 + $0xa88] sm:$0xff] }
 0x1e9   :  { %4027 = vmatpush1.bf16.msra.mxu0 %v5875_v52  ;;  %4199 = vmatpush1.bf16.msra.mxu1 %v5877_v5  ;;  %v1148_v52 = vld [vmem:[#allocation10 + $0x9a8] sm:$0xff]  ;;  %v5923_v5 = vcombine.low %v1135_v38, %v1139_v40  ;;  %v1183_v40 = vld [vmem:[#allocation10 + $0xac0] sm:$0xff] }
 0x1ea   :  { %4039 = vmatprep.subr.bf16.mxu0 %v5884_v6  ;;  %4211 = vmatprep.subr.bf16.mxu1 %v5886_v8  ;;  %v5925_v6 = vcombine.low %v1136_v7, %v1140_v44  ;;  %v5932_v8 = vcombine.high %v1143_v48, %v1147_v49  ;;  %v5934_v10 = vcombine.high %v1144_v51, %v1148_v52  ;;  %v1187_v7 = vld [vmem:[#allocation10 + $0xae0] sm:$0xff]  ;;  %v1184_v44 = vld [vmem:[#allocation10 + $0xac8] sm:$0xff] }
 0x1ec   :  { %4029 = vmatmul.mubr.bf16.vlgmr.msra.gmra.mrb[8].mxu0 %v7055_v50  ;;  %4201 = vmatmul.mubr.bf16.vlgmr.msra.gmra.mrb[8].mxu1 %v7055_v50 }
 0x1ed   :  { %4040 = vmatpush1.bf16.msra.mxu0 %v5883_v55  ;;  %4212 = vmatpush1.bf16.msra.mxu1 %v5885_v56  ;;  %v1156_v55 = vld [vmem:[#allocation10 + $0x9e8] sm:$0xff]  ;;  %v5931_v56 = vcombine.low %v1143_v48, %v1147_v49  ;;  %v1191_v49 = vld [vmem:[#allocation10 + $0xb00] sm:$0xff] }
 0x1ee   :  { %4041 = vmatprep.subr.bf16.mxu0 %v5892_v57  ;;  %4213 = vmatprep.subr.bf16.mxu1 %v5894_v58  ;;  %v5933_v57 = vcombine.low %v1144_v51, %v1148_v52  ;;  %v5940_v58 = vcombine.high %v1151_v12, %v1155_v53  ;;  %v5942_v59 = vcombine.high %v1152_v54, %v1156_v55  ;;  %v1195_v51 = vld [vmem:[#allocation10 + $0xb20] sm:$0xff]  ;;  %v1192_v52 = vld [vmem:[#allocation10 + $0xb08] sm:$0xff] }
 0x1ef   :  { %4071 = vmatprep.mubr.bf16.mxu0 %v7071_v31  ;;  %4243 = vmatprep.mubr.bf16.mxu1 %v7071_v31 }
 0x1f1   :  { %4042 = vmatpush1.bf16.msra.mxu0 %v5891_v62  ;;  %4214 = vmatpush1.bf16.msra.mxu1 %v5893_v2  ;;  %v1164_v62 = vld [vmem:[#allocation10 + $0xa28] sm:$0xff]  ;;  %v5939_v2 = vcombine.low %v1151_v12, %v1155_v53  ;;  %v1199_v53 = vld [vmem:[#allocation10 + $0xb40] sm:$0xff] }
 0x1f2   :  { %4043 = vmatprep.subr.bf16.mxu0 %v5900_v3  ;;  %4215 = vmatprep.subr.bf16.mxu1 %v5902_v4  ;;  %v5941_v3 = vcombine.low %v1152_v54, %v1156_v55  ;;  %v5948_v4 = vcombine.high %v1159_v17, %v1163_v60  ;;  %v5950_v9 = vcombine.high %v1160_v61, %v1164_v62  ;;  %v1203_v54 = vld [vmem:[#allocation10 + $0xb60] sm:$0xff]  ;;  %v1200_v55 = vld [vmem:[#allocation10 + $0xb48] sm:$0xff] }
 0x1f5   :  { %4044 = vmatpush1.bf16.msra.mxu0 %v5899_v20  ;;  %4216 = vmatpush1.bf16.msra.mxu1 %v5901_v22  ;;  %v1172_v20 = vld [vmem:[#allocation10 + $0xa68] sm:$0xff]  ;;  %v5947_v22 = vcombine.low %v1159_v17, %v1163_v60  ;;  %v1207_v60 = vld [vmem:[#allocation10 + $0xb80] sm:$0xff] }
 0x1f6   :  { %4045 = vmatprep.subr.bf16.mxu0 %v5908_v24  ;;  %4217 = vmatprep.subr.bf16.mxu1 %v5910_v27  ;;  %v5949_v24 = vcombine.low %v1160_v61, %v1164_v62  ;;  %v5956_v27 = vcombine.high %v1167_v13, %v1171_v14  ;;  %v5958_v29 = vcombine.high %v1168_v19, %v1172_v20  ;;  %v1211_v61 = vld [vmem:[#allocation10 + $0xba0] sm:$0xff]  ;;  %v1208_v62 = vld [vmem:[#allocation10 + $0xb88] sm:$0xff] }
 0x1f9   :  { %4046 = vmatpush1.bf16.msra.mxu0 %v5907_v34  ;;  %4218 = vmatpush1.bf16.msra.mxu1 %v5909_v35  ;;  %v1180_v34 = vld [vmem:[#allocation10 + $0xaa8] sm:$0xff]  ;;  %v5955_v35 = vcombine.low %v1167_v13, %v1171_v14  ;;  %v1215_v14 = vld [vmem:[#allocation10 + $0xbc0] sm:$0xff] }
 0x1fa   :  { %4047 = vmatprep.subr.bf16.mxu0 %v5916_v36  ;;  %4219 = vmatprep.subr.bf16.mxu1 %v5918_v37  ;;  %v5957_v36 = vcombine.low %v1168_v19, %v1172_v20  ;;  %v5964_v37 = vcombine.high %v1175_v30, %v1179_v32  ;;  %v5966_v38 = vcombine.high %v1176_v33, %v1180_v34  ;;  %v1219_v19 = vld [vmem:[#allocation10 + $0xbe0] sm:$0xff]  ;;  %v1216_v20 = vld [vmem:[#allocation10 + $0xbc8] sm:$0xff] }
 0x1fd   :  { %4048 = vmatpush1.bf16.msra.mxu0 %v5915_v45  ;;  %4220 = vmatpush1.bf16.msra.mxu1 %v5917_v0  ;;  %v1188_v45 = vld [vmem:[#allocation10 + $0xae8] sm:$0xff]  ;;  %v5963_v0 = vcombine.low %v1175_v30, %v1179_v32  ;;  %v1223_v32 = vld [vmem:[#allocation10 + $0xc00] sm:$0xff] }
 0x1fe   :  { %4049 = vmatprep.subr.bf16.mxu0 %v5924_v46  ;;  %4221 = vmatprep.subr.bf16.mxu1 %v5926_v47  ;;  %v5965_v46 = vcombine.low %v1176_v33, %v1180_v34  ;;  %v5972_v47 = vcombine.high %v1183_v40, %v1187_v7  ;;  %v5974_v48 = vcombine.high %v1184_v44, %v1188_v45  ;;  %v1227_v33 = vld [vmem:[#allocation10 + $0xc20] sm:$0xff]  ;;  %v1224_v34 = vld [vmem:[#allocation10 + $0xc08] sm:$0xff] }
 0x201   :  { %4050 = vmatpush1.bf16.msra.mxu0 %v5923_v5  ;;  %4222 = vmatpush1.bf16.msra.mxu1 %v5925_v6  ;;  %v1196_v5 = vld [vmem:[#allocation10 + $0xb28] sm:$0xff]  ;;  %v5971_v6 = vcombine.low %v1183_v40, %v1187_v7  ;;  %v1231_v7 = vld [vmem:[#allocation10 + $0xc40] sm:$0xff] }
 0x202   :  { %4051 = vmatprep.subr.bf16.mxu0 %v5932_v8  ;;  %4223 = vmatprep.subr.bf16.mxu1 %v5934_v10  ;;  %v5973_v8 = vcombine.low %v1184_v44, %v1188_v45  ;;  %v5980_v10 = vcombine.high %v1191_v49, %v1195_v51  ;;  %v5982_v12 = vcombine.high %v1192_v52, %v1196_v5  ;;  %v1235_v44 = vld [vmem:[#allocation10 + $0xc60] sm:$0xff]  ;;  %v1232_v45 = vld [vmem:[#allocation10 + $0xc48] sm:$0xff] }
 0x205   :  { %4052 = vmatpush1.bf16.msra.mxu0 %v5931_v56  ;;  %4224 = vmatpush1.bf16.msra.mxu1 %v5933_v57  ;;  %v1204_v56 = vld [vmem:[#allocation10 + $0xb68] sm:$0xff]  ;;  %v5979_v57 = vcombine.low %v1191_v49, %v1195_v51  ;;  %v1239_v51 = vld [vmem:[#allocation10 + $0xc80] sm:$0xff] }
 0x206   :  { %4053 = vmatprep.subr.bf16.mxu0 %v5940_v58  ;;  %4225 = vmatprep.subr.bf16.mxu1 %v5942_v59  ;;  %v5981_v58 = vcombine.low %v1192_v52, %v1196_v5  ;;  %v5988_v59 = vcombine.high %v1199_v53, %v1203_v54  ;;  %v5990_v17 = vcombine.high %v1200_v55, %v1204_v56  ;;  %v1243_v52 = vld [vmem:[#allocation10 + $0xca0] sm:$0xff]  ;;  %v1240_v5 = vld [vmem:[#allocation10 + $0xc88] sm:$0xff] }
 0x209   :  { %4054 = vmatpush1.bf16.msra.mxu0 %v5939_v2  ;;  %4226 = vmatpush1.bf16.msra.mxu1 %v5941_v3  ;;  %v1212_v2 = vld [vmem:[#allocation10 + $0xba8] sm:$0xff]  ;;  %v5987_v3 = vcombine.low %v1199_v53, %v1203_v54  ;;  %v1247_v54 = vld [vmem:[#allocation10 + $0xcc0] sm:$0xff] }
 0x20a   :  { %4055 = vmatprep.subr.bf16.mxu0 %v5948_v4  ;;  %4227 = vmatprep.subr.bf16.mxu1 %v5950_v9  ;;  %v5989_v4 = vcombine.low %v1200_v55, %v1204_v56  ;;  %v5996_v9 = vcombine.high %v1207_v60, %v1211_v61  ;;  %v5998_v13 = vcombine.high %v1208_v62, %v1212_v2  ;;  %v1251_v55 = vld [vmem:[#allocation10 + $0xce0] sm:$0xff]  ;;  %v1248_v56 = vld [vmem:[#allocation10 + $0xcc8] sm:$0xff] }
 0x20d   :  { %4056 = vmatpush1.bf16.msra.mxu0 %v5947_v22  ;;  %4228 = vmatpush1.bf16.msra.mxu1 %v5949_v24  ;;  %v1220_v22 = vld [vmem:[#allocation10 + $0xbe8] sm:$0xff]  ;;  %v5995_v24 = vcombine.low %v1207_v60, %v1211_v61  ;;  %v1255_v61 = vld [vmem:[#allocation10 + $0xd00] sm:$0xff] }
 0x20e   :  { %4057 = vmatprep.subr.bf16.mxu0 %v5956_v27  ;;  %4229 = vmatprep.subr.bf16.mxu1 %v5958_v29  ;;  %v5997_v27 = vcombine.low %v1208_v62, %v1212_v2  ;;  %v6004_v29 = vcombine.high %v1215_v14, %v1219_v19  ;;  %v6006_v30 = vcombine.high %v1216_v20, %v1220_v22  ;;  %v1259_v62 = vld [vmem:[#allocation10 + $0xd20] sm:$0xff]  ;;  %v1256_v2 = vld [vmem:[#allocation10 + $0xd08] sm:$0xff] }
 0x211   :  { %4058 = vmatpush1.bf16.msra.mxu0 %v5955_v35  ;;  %4230 = vmatpush1.bf16.msra.mxu1 %v5957_v36  ;;  %v1228_v35 = vld [vmem:[#allocation10 + $0xc28] sm:$0xff]  ;;  %v6003_v36 = vcombine.low %v1215_v14, %v1219_v19  ;;  %v1263_v19 = vld [vmem:[#allocation10 + $0xd40] sm:$0xff] }
 0x212   :  { %4059 = vmatprep.subr.bf16.mxu0 %v5964_v37  ;;  %4231 = vmatprep.subr.bf16.mxu1 %v5966_v38  ;;  %v6005_v37 = vcombine.low %v1216_v20, %v1220_v22  ;;  %v6012_v38 = vcombine.high %v1223_v32, %v1227_v33  ;;  %v6014_v40 = vcombine.high %v1224_v34, %v1228_v35  ;;  %v1267_v20 = vld [vmem:[#allocation10 + $0xd60] sm:$0xff]  ;;  %v1264_v22 = vld [vmem:[#allocation10 + $0xd48] sm:$0xff] }
 0x215   :  { %4060 = vmatpush1.bf16.msra.mxu0 %v5963_v0  ;;  %4232 = vmatpush1.bf16.msra.mxu1 %v5965_v46  ;;  %v1236_v0 = vld [vmem:[#allocation10 + $0xc68] sm:$0xff]  ;;  %v6011_v46 = vcombine.low %v1223_v32, %v1227_v33  ;;  %v1271_v33 = vld [vmem:[#allocation10 + $0xd80] sm:$0xff] }
 0x216   :  { %4061 = vmatprep.subr.bf16.mxu0 %v5972_v47  ;;  %4233 = vmatprep.subr.bf16.mxu1 %v5974_v48  ;;  %v6013_v47 = vcombine.low %v1224_v34, %v1228_v35  ;;  %v6020_v48 = vcombine.high %v1231_v7, %v1235_v44  ;;  %v6022_v49 = vcombine.high %v1232_v45, %v1236_v0  ;;  %v1275_v34 = vld [vmem:[#allocation10 + $0xda0] sm:$0xff]  ;;  %v1272_v35 = vld [vmem:[#allocation10 + $0xd88] sm:$0xff] }
 0x219   :  { %4062 = vmatpush1.bf16.msra.mxu0 %v5971_v6  ;;  %4234 = vmatpush1.bf16.msra.mxu1 %v5973_v8  ;;  %v1244_v6 = vld [vmem:[#allocation10 + $0xca8] sm:$0xff]  ;;  %v6019_v8 = vcombine.low %v1231_v7, %v1235_v44  ;;  %v1279_v44 = vld [vmem:[#allocation10 + $0xdc0] sm:$0xff] }
 0x21a   :  { %4063 = vmatprep.subr.bf16.mxu0 %v5980_v10  ;;  %4235 = vmatprep.subr.bf16.mxu1 %v5982_v12  ;;  %v6021_v10 = vcombine.low %v1232_v45, %v1236_v0  ;;  %v6028_v12 = vcombine.high %v1239_v51, %v1243_v52  ;;  %v6030_v53 = vcombine.high %v1240_v5, %v1244_v6  ;;  %v1283_v45 = vld [vmem:[#allocation10 + $0xde0] sm:$0xff]  ;;  %v1280_v0 = vld [vmem:[#allocation10 + $0xdc8] sm:$0xff] }
 0x21d   :  { %4064 = vmatpush1.bf16.msra.mxu0 %v5979_v57  ;;  %4236 = vmatpush1.bf16.msra.mxu1 %v5981_v58  ;;  %v1252_v57 = vld [vmem:[#allocation10 + $0xce8] sm:$0xff]  ;;  %v6027_v58 = vcombine.low %v1239_v51, %v1243_v52  ;;  %v1287_v52 = vld [vmem:[#allocation10 + $0xe00] sm:$0xff] }
 0x21e   :  { %4065 = vmatprep.subr.bf16.mxu0 %v5988_v59  ;;  %4237 = vmatprep.subr.bf16.mxu1 %v5990_v17  ;;  %v6029_v59 = vcombine.low %v1240_v5, %v1244_v6  ;;  %v6036_v17 = vcombine.high %v1247_v54, %v1251_v55  ;;  %v6038_v60 = vcombine.high %v1248_v56, %v1252_v57  ;;  %v1291_v5 = vld [vmem:[#allocation10 + $0xe20] sm:$0xff]  ;;  %v1288_v6 = vld [vmem:[#allocation10 + $0xe08] sm:$0xff] }
 0x221   :  { %4066 = vmatpush1.bf16.msra.mxu0 %v5987_v3  ;;  %4238 = vmatpush1.bf16.msra.mxu1 %v5989_v4  ;;  %v1260_v3 = vld [vmem:[#allocation10 + $0xd28] sm:$0xff]  ;;  %v6035_v4 = vcombine.low %v1247_v54, %v1251_v55  ;;  %v1295_v55 = vld [vmem:[#allocation10 + $0xe40] sm:$0xff] }
 0x222   :  { %4067 = vmatprep.subr.bf16.mxu0 %v5996_v9  ;;  %4239 = vmatprep.subr.bf16.mxu1 %v5998_v13  ;;  %v6037_v9 = vcombine.low %v1248_v56, %v1252_v57  ;;  %v6044_v13 = vcombine.high %v1255_v61, %v1259_v62  ;;  %v6046_v14 = vcombine.high %v1256_v2, %v1260_v3  ;;  %v1299_v56 = vld [vmem:[#allocation10 + $0xe60] sm:$0xff]  ;;  %v1296_v57 = vld [vmem:[#allocation10 + $0xe48] sm:$0xff] }
 0x225   :  { %4068 = vmatpush1.bf16.msra.mxu0 %v5995_v24  ;;  %4240 = vmatpush1.bf16.msra.mxu1 %v5997_v27  ;;  %v1268_v24 = vld [vmem:[#allocation10 + $0xd68] sm:$0xff]  ;;  %v6043_v27 = vcombine.low %v1255_v61, %v1259_v62  ;;  %v1303_v62 = vld [vmem:[#allocation10 + $0xe80] sm:$0xff] }
 0x226   :  { %4069 = vmatprep.subr.bf16.mxu0 %v6004_v29  ;;  %4241 = vmatprep.subr.bf16.mxu1 %v6006_v30  ;;  %v6045_v29 = vcombine.low %v1256_v2, %v1260_v3  ;;  %v6052_v30 = vcombine.high %v1263_v19, %v1267_v20  ;;  %v6054_v32 = vcombine.high %v1264_v22, %v1268_v24  ;;  %v1307_v2 = vld [vmem:[#allocation10 + $0xea0] sm:$0xff]  ;;  %v1304_v3 = vld [vmem:[#allocation10 + $0xe88] sm:$0xff] }
 0x229   :  { %4070 = vmatpush1.bf16.msra.mxu0 %v6003_v36  ;;  %4242 = vmatpush1.bf16.msra.mxu1 %v6005_v37  ;;  %v1276_v36 = vld [vmem:[#allocation10 + $0xda8] sm:$0xff]  ;;  %v6051_v37 = vcombine.low %v1263_v19, %v1267_v20  ;;  %v1311_v20 = vld [vmem:[#allocation10 + $0xec0] sm:$0xff] }
 0x22a   :  { %4082 = vmatprep.subr.bf16.mxu0 %v6012_v38  ;;  %4254 = vmatprep.subr.bf16.mxu1 %v6014_v40  ;;  %v6053_v38 = vcombine.low %v1264_v22, %v1268_v24  ;;  %v6060_v40 = vcombine.high %v1271_v33, %v1275_v34  ;;  %v6062_v7 = vcombine.high %v1272_v35, %v1276_v36  ;;  %v1315_v22 = vld [vmem:[#allocation10 + $0xee0] sm:$0xff]  ;;  %v1312_v24 = vld [vmem:[#allocation10 + $0xec8] sm:$0xff] }
 0x22c   :  { %4072 = vmatmul.mubr.bf16.vlgmr.msra.gmra.mrb[8].mxu0 %v7069_v28  ;;  %4244 = vmatmul.mubr.bf16.vlgmr.msra.gmra.mrb[8].mxu1 %v7069_v28 }
 0x22d   :  { %4083 = vmatpush1.bf16.msra.mxu0 %v6011_v46  ;;  %4255 = vmatpush1.bf16.msra.mxu1 %v6013_v47  ;;  %v1284_v46 = vld [vmem:[#allocation10 + $0xde8] sm:$0xff]  ;;  %v6059_v47 = vcombine.low %v1271_v33, %v1275_v34  ;;  %v1319_v34 = vld [vmem:[#allocation10 + $0xf00] sm:$0xff] }
 0x22e   :  { %4084 = vmatprep.subr.bf16.mxu0 %v6020_v48  ;;  %4256 = vmatprep.subr.bf16.mxu1 %v6022_v49  ;;  %v6061_v48 = vcombine.low %v1272_v35, %v1276_v36  ;;  %v6068_v49 = vcombine.high %v1279_v44, %v1283_v45  ;;  %v6070_v51 = vcombine.high %v1280_v0, %v1284_v46  ;;  %v1323_v35 = vld [vmem:[#allocation10 + $0xf20] sm:$0xff]  ;;  %v1320_v36 = vld [vmem:[#allocation10 + $0xf08] sm:$0xff] }
 0x22f   :  { %4114 = vmatprep.mubr.bf16.mxu0 %v7075_v43  ;;  %4286 = vmatprep.mubr.bf16.mxu1 %v7075_v43 }
 0x231   :  { %4085 = vmatpush1.bf16.msra.mxu0 %v6019_v8  ;;  %4257 = vmatpush1.bf16.msra.mxu1 %v6021_v10  ;;  %v1292_v8 = vld [vmem:[#allocation10 + $0xe28] sm:$0xff]  ;;  %v6067_v10 = vcombine.low %v1279_v44, %v1283_v45  ;;  %v1327_v45 = vld [vmem:[#allocation10 + $0xf40] sm:$0xff] }
 0x232   :  { %4086 = vmatprep.subr.bf16.mxu0 %v6028_v12  ;;  %4258 = vmatprep.subr.bf16.mxu1 %v6030_v53  ;;  %v6069_v12 = vcombine.low %v1280_v0, %v1284_v46  ;;  %v6076_v53 = vcombine.high %v1287_v52, %v1291_v5  ;;  %v6078_v54 = vcombine.high %v1288_v6, %v1292_v8  ;;  %v1331_v0 = vld [vmem:[#allocation10 + $0xf60] sm:$0xff]  ;;  %v1328_v46 = vld [vmem:[#allocation10 + $0xf48] sm:$0xff] }
 0x235   :  { %4087 = vmatpush1.bf16.msra.mxu0 %v6027_v58  ;;  %4259 = vmatpush1.bf16.msra.mxu1 %v6029_v59  ;;  %v1300_v58 = vld [vmem:[#allocation10 + $0xe68] sm:$0xff]  ;;  %v6075_v59 = vcombine.low %v1287_v52, %v1291_v5  ;;  %v1335_v5 = vld [vmem:[#allocation10 + $0xf80] sm:$0xff] }
 0x236   :  { %4088 = vmatprep.subr.bf16.mxu0 %v6036_v17  ;;  %4260 = vmatprep.subr.bf16.mxu1 %v6038_v60  ;;  %v6077_v17 = vcombine.low %v1288_v6, %v1292_v8  ;;  %v6084_v60 = vcombine.high %v1295_v55, %v1299_v56  ;;  %v6086_v61 = vcombine.high %v1296_v57, %v1300_v58  ;;  %v1339_v6 = vld [vmem:[#allocation10 + $0xfa0] sm:$0xff]  ;;  %v1336_v8 = vld [vmem:[#allocation10 + $0xf88] sm:$0xff] }
 0x239   :  { %4089 = vmatpush1.bf16.msra.mxu0 %v6035_v4  ;;  %4261 = vmatpush1.bf16.msra.mxu1 %v6037_v9  ;;  %v1308_v4 = vld [vmem:[#allocation10 + $0xea8] sm:$0xff]  ;;  %v6083_v9 = vcombine.low %v1295_v55, %v1299_v56  ;;  %v1343_v56 = vld [vmem:[#allocation10 + $0xfc0] sm:$0xff] }
 0x23a   :  { %4090 = vmatprep.subr.bf16.mxu0 %v6044_v13  ;;  %4262 = vmatprep.subr.bf16.mxu1 %v6046_v14  ;;  %v6085_v13 = vcombine.low %v1296_v57, %v1300_v58  ;;  %v6092_v14 = vcombine.high %v1303_v62, %v1307_v2  ;;  %v6094_v19 = vcombine.high %v1304_v3, %v1308_v4  ;;  %v1347_v57 = vld [vmem:[#allocation10 + $0xfe0] sm:$0xff]  ;;  %v1344_v58 = vld [vmem:[#allocation10 + $0xfc8] sm:$0xff] }
 0x23d   :  { %4091 = vmatpush1.bf16.msra.mxu0 %v6043_v27  ;;  %4263 = vmatpush1.bf16.msra.mxu1 %v6045_v29  ;;  %v1316_v27 = vld [vmem:[#allocation10 + $0xee8] sm:$0xff]  ;;  %v6091_v29 = vcombine.low %v1303_v62, %v1307_v2  ;;  %v841_v2 = vld [vmem:[#allocation10 + $0x10] sm:$0xff] }
 0x23e   :  { %4092 = vmatprep.subr.bf16.mxu0 %v6052_v30  ;;  %4264 = vmatprep.subr.bf16.mxu1 %v6054_v32  ;;  %v6093_v30 = vcombine.low %v1304_v3, %v1308_v4  ;;  %v6100_v32 = vcombine.high %v1311_v20, %v1315_v22  ;;  %v6102_v33 = vcombine.high %v1312_v24, %v1316_v27  ;;  %v845_v3 = vld [vmem:[#allocation10 + $0x30] sm:$0xff]  ;;  %v842_v4 = vld [vmem:[#allocation10 + $0x18] sm:$0xff] }
 0x241   :  { %4093 = vmatpush1.bf16.msra.mxu0 %v6051_v37  ;;  %4265 = vmatpush1.bf16.msra.mxu1 %v6053_v38  ;;  %v1324_v37 = vld [vmem:[#allocation10 + $0xf28] sm:$0xff]  ;;  %v6099_v38 = vcombine.low %v1311_v20, %v1315_v22  ;;  %v849_v22 = vld [vmem:[#allocation10 + $0x50] sm:$0xff] }
 0x242   :  { %4094 = vmatprep.subr.bf16.mxu0 %v6060_v40  ;;  %4266 = vmatprep.subr.bf16.mxu1 %v6062_v7  ;;  %v6101_v40 = vcombine.low %v1312_v24, %v1316_v27  ;;  %v6108_v7 = vcombine.high %v1319_v34, %v1323_v35  ;;  %v6110_v44 = vcombine.high %v1320_v36, %v1324_v37  ;;  %v853_v24 = vld [vmem:[#allocation10 + $0x70] sm:$0xff]  ;;  %v850_v27 = vld [vmem:[#allocation10 + $0x58] sm:$0xff] }
 0x245   :  { %4095 = vmatpush1.bf16.msra.mxu0 %v6059_v47  ;;  %4267 = vmatpush1.bf16.msra.mxu1 %v6061_v48  ;;  %v1332_v47 = vld [vmem:[#allocation10 + $0xf68] sm:$0xff]  ;;  %v6107_v48 = vcombine.low %v1319_v34, %v1323_v35  ;;  %v857_v35 = vld [vmem:[#allocation10 + $0x90] sm:$0xff] }
 0x246   :  { %4096 = vmatprep.subr.bf16.mxu0 %v6068_v49  ;;  %4268 = vmatprep.subr.bf16.mxu1 %v6070_v51  ;;  %v6109_v49 = vcombine.low %v1320_v36, %v1324_v37  ;;  %v6116_v51 = vcombine.high %v1327_v45, %v1331_v0  ;;  %v6118_v52 = vcombine.high %v1328_v46, %v1332_v47  ;;  %v861_v36 = vld [vmem:[#allocation10 + $0xb0] sm:$0xff]  ;;  %v858_v37 = vld [vmem:[#allocation10 + $0x98] sm:$0xff] }
 0x249   :  { %4097 = vmatpush1.bf16.msra.mxu0 %v6067_v10  ;;  %4269 = vmatpush1.bf16.msra.mxu1 %v6069_v12  ;;  %v1340_v10 = vld [vmem:[#allocation10 + $0xfa8] sm:$0xff]  ;;  %v6115_v12 = vcombine.low %v1327_v45, %v1331_v0  ;;  %v865_v0 = vld [vmem:[#allocation10 + $0xd0] sm:$0xff] }
 0x24a   :  { %4098 = vmatprep.subr.bf16.mxu0 %v6076_v53  ;;  %4270 = vmatprep.subr.bf16.mxu1 %v6078_v54  ;;  %v6117_v53 = vcombine.low %v1328_v46, %v1332_v47  ;;  %v6124_v54 = vcombine.high %v1335_v5, %v1339_v6  ;;  %v6126_v55 = vcombine.high %v1336_v8, %v1340_v10  ;;  %v869_v46 = vld [vmem:[#allocation10 + $0xf0] sm:$0xff]  ;;  %v866_v47 = vld [vmem:[#allocation10 + $0xd8] sm:$0xff] }
 0x24d   :  { %4099 = vmatpush1.bf16.msra.mxu0 %v6075_v59  ;;  %4271 = vmatpush1.bf16.msra.mxu1 %v6077_v17  ;;  %v1348_v59 = vld [vmem:[#allocation10 + $0xfe8] sm:$0xff]  ;;  %v6123_v17 = vcombine.low %v1335_v5, %v1339_v6  ;;  %v873_v6 = vld [vmem:[#allocation10 + $0x110] sm:$0xff] }
 0x24e   :  { %4100 = vmatprep.subr.bf16.mxu0 %v6084_v60  ;;  %4272 = vmatprep.subr.bf16.mxu1 %v6086_v61  ;;  %v6125_v60 = vcombine.low %v1336_v8, %v1340_v10  ;;  %v6132_v61 = vcombine.high %v1343_v56, %v1347_v57  ;;  %v6134_v62 = vcombine.high %v1344_v58, %v1348_v59  ;;  %v877_v8 = vld [vmem:[#allocation10 + $0x130] sm:$0xff]  ;;  %v878_v10 = vld [vmem:[#allocation10 + $0x138] sm:$0xff] }
 0x251   :  { %4101 = vmatpush1.bf16.msra.mxu0 %v6083_v9  ;;  %4273 = vmatpush1.bf16.msra.mxu1 %v6085_v13  ;;  %v846_v9 = vld [vmem:[#allocation10 + $0x38] sm:$0xff]  ;;  %v6131_v13 = vcombine.low %v1343_v56, %v1347_v57  ;;  %v881_v56 = vld [vmem:[#allocation10 + $0x150] sm:$0xff] }
 0x252   :  { %4102 = vmatprep.subr.bf16.mxu0 %v6092_v14  ;;  %4274 = vmatprep.subr.bf16.mxu1 %v6094_v19  ;;  %v6133_v14 = vcombine.low %v1344_v58, %v1348_v59  ;;  %v5632_v19 = vcombine.high %v841_v2, %v845_v3  ;;  %v5634_v20 = vcombine.high %v842_v4, %v846_v9  ;;  %v885_v57 = vld [vmem:[#allocation10 + $0x170] sm:$0xff]  ;;  %v882_v58 = vld [vmem:[#allocation10 + $0x158] sm:$0xff] }
 0x253   :  { %v886_v59 = vld [vmem:[#allocation10 + $0x178] sm:$0xff] }
 0x255   :  { %4103 = vmatpush1.bf16.msra.mxu0 %v6091_v29  ;;  %4275 = vmatpush1.bf16.msra.mxu1 %v6093_v30  ;;  %v854_v29 = vld [vmem:[#allocation10 + $0x78] sm:$0xff]  ;;  %v5631_v30 = vcombine.low %v841_v2, %v845_v3  ;;  %v889_v2 = vld [vmem:[#allocation10 + $0x190] sm:$0xff] }
 0x256   :  { %4104 = vmatprep.subr.bf16.mxu0 %v6100_v32  ;;  %4276 = vmatprep.subr.bf16.mxu1 %v6102_v33  ;;  %v5633_v32 = vcombine.low %v842_v4, %v846_v9  ;;  %v5640_v33 = vcombine.high %v849_v22, %v853_v24  ;;  %v5642_v34 = vcombine.high %v850_v27, %v854_v29  ;;  %v893_v3 = vld [vmem:[#allocation10 + $0x1b0] sm:$0xff]  ;;  %v890_v4 = vld [vmem:[#allocation10 + $0x198] sm:$0xff] }
 0x257   :  { %v894_v9 = vld [vmem:[#allocation10 + $0x1b8] sm:$0xff] }
 0x259   :  { %4105 = vmatpush1.bf16.msra.mxu0 %v6099_v38  ;;  %4277 = vmatpush1.bf16.msra.mxu1 %v6101_v40  ;;  %v862_v38 = vld [vmem:[#allocation10 + $0xb8] sm:$0xff]  ;;  %v5639_v40 = vcombine.low %v849_v22, %v853_v24  ;;  %v897_v22 = vld [vmem:[#allocation10 + $0x1d0] sm:$0xff] }
 0x25a   :  { %4106 = vmatprep.subr.bf16.mxu0 %v6108_v7  ;;  %4278 = vmatprep.subr.bf16.mxu1 %v6110_v44  ;;  %v5641_v7 = vcombine.low %v850_v27, %v854_v29  ;;  %v5648_v44 = vcombine.high %v857_v35, %v861_v36  ;;  %v5650_v45 = vcombine.high %v858_v37, %v862_v38  ;;  %v901_v24 = vld [vmem:[#allocation10 + $0x1f0] sm:$0xff]  ;;  %v898_v27 = vld [vmem:[#allocation10 + $0x1d8] sm:$0xff] }
 0x25b   :  { %v902_v29 = vld [vmem:[#allocation10 + $0x1f8] sm:$0xff] }
 0x25d   :  { %4107 = vmatpush1.bf16.msra.mxu0 %v6107_v48  ;;  %4279 = vmatpush1.bf16.msra.mxu1 %v6109_v49  ;;  %v870_v48 = vld [vmem:[#allocation10 + $0xf8] sm:$0xff]  ;;  %v5647_v49 = vcombine.low %v857_v35, %v861_v36  ;;  %v905_v35 = vld [vmem:[#allocation10 + $0x210] sm:$0xff] }
 0x25e   :  { %4108 = vmatprep.subr.bf16.mxu0 %v6116_v51  ;;  %4280 = vmatprep.subr.bf16.mxu1 %v6118_v52  ;;  %v5649_v51 = vcombine.low %v858_v37, %v862_v38  ;;  %v5656_v52 = vcombine.high %v865_v0, %v869_v46  ;;  %v5658_v5 = vcombine.high %v866_v47, %v870_v48  ;;  %v909_v36 = vld [vmem:[#allocation10 + $0x230] sm:$0xff]  ;;  %v906_v37 = vld [vmem:[#allocation10 + $0x218] sm:$0xff] }
 0x25f   :  { %v910_v38 = vld [vmem:[#allocation10 + $0x238] sm:$0xff] }
 0x261   :  { %4109 = vmatpush1.bf16.msra.mxu0 %v6115_v12  ;;  %4281 = vmatpush1.bf16.msra.mxu1 %v6117_v53  ;;  %v5655_v12 = vcombine.low %v865_v0, %v869_v46  ;;  %v5657_v53 = vcombine.low %v866_v47, %v870_v48  ;;  %v913_v0 = vld [vmem:[#allocation10 + $0x250] sm:$0xff]  ;;  %v914_v47 = vld [vmem:[#allocation10 + $0x258] sm:$0xff] }
 0x262   :  { %4110 = vmatprep.subr.bf16.mxu0 %v6124_v54  ;;  %4282 = vmatprep.subr.bf16.mxu1 %v6126_v55  ;;  %v5664_v54 = vcombine.high %v873_v6, %v877_v8  ;;  %v917_v46 = vld [vmem:[#allocation10 + $0x270] sm:$0xff]  ;;  %v918_v48 = vld [vmem:[#allocation10 + $0x278] sm:$0xff] }
 0x265   :  { %4111 = vmatpush1.bf16.msra.mxu0 %v6123_v17  ;;  %4283 = vmatpush1.bf16.msra.mxu1 %v6125_v60  ;;  %v5663_v17 = vcombine.low %v873_v6, %v877_v8  ;;  %v921_v6 = vld [vmem:[#allocation10 + $0x290] sm:$0xff] }
 0x266   :  { %4112 = vmatprep.subr.bf16.mxu0 %v6132_v61  ;;  %4284 = vmatprep.subr.bf16.mxu1 %v6134_v62  ;;  %v5672_v61 = vcombine.high %v881_v56, %v885_v57  ;;  %v5674_v62 = vcombine.high %v882_v58, %v886_v59  ;;  %v925_v8 = vld [vmem:[#allocation10 + $0x2b0] sm:$0xff] }
 0x269   :  { %4113 = vmatpush1.bf16.msra.mxu0 %v6131_v13  ;;  %4285 = vmatpush1.bf16.msra.mxu1 %v6133_v14  ;;  %v5671_v13 = vcombine.low %v881_v56, %v885_v57  ;;  %v5673_v14 = vcombine.low %v882_v58, %v886_v59  ;;  %v929_v56 = vld [vmem:[#allocation10 + $0x2d0] sm:$0xff]  ;;  %v930_v58 = vld [vmem:[#allocation10 + $0x2d8] sm:$0xff] }
 0x26a   :  { %4297 = vmatprep.subr.bf16.mxu0 %v5632_v19  ;;  %4469 = vmatprep.subr.bf16.mxu1 %v5634_v20  ;;  %v5680_v19 = vcombine.high %v889_v2, %v893_v3  ;;  %v5682_v20 = vcombine.high %v890_v4, %v894_v9  ;;  %v933_v57 = vld [vmem:[#allocation10 + $0x2f0] sm:$0xff]  ;;  %v934_v59 = vld [vmem:[#allocation10 + $0x2f8] sm:$0xff] }
 0x26c   :  { %4115 = vmatmul.mubr.bf16.vlgmr.msra.gmra.mrb[8].mxu0 %v7073_v42  ;;  %4287 = vmatmul.mubr.bf16.vlgmr.msra.gmra.mrb[8].mxu1 %v7073_v42 }
 0x26d   :  { %4298 = vmatpush1.bf16.msra.mxu0 %v5631_v30  ;;  %4329 = vmatprep.mubr.bf16.mxu0 %v7043_v26  ;;  %v5679_v30 = vcombine.low %v889_v2, %v893_v3  ;;  %v937_v2 = vld [vmem:[#allocation10 + $0x310] sm:$0xff] }
 0x26e   :  { %4470 = vmatpush1.bf16.msra.mxu1 %v5633_v32  ;;  %4501 = vmatprep.mubr.bf16.mxu1 %v7043_v26  ;;  %v874_v26 = vld [vmem:[#allocation10 + $0x118] sm:$0xff]  ;;  %v5681_v32 = vcombine.low %v890_v4, %v894_v9  ;;  %v941_v3 = vld [vmem:[#allocation10 + $0x330] sm:$0xff] }
 0x26f   :  { %4299 = vmatprep.subr.bf16.mxu0 %v5640_v33  ;;  %4471 = vmatprep.subr.bf16.mxu1 %v5642_v34  ;;  %v5666_v55 = vcombine.high %v874_v26, %v878_v10  ;;  %v5665_v60 = vcombine.low %v874_v26, %v878_v10  ;;  %v5688_v33 = vcombine.high %v897_v22, %v901_v24  ;;  %v922_v26 = vld [vmem:[#allocation10 + $0x298] sm:$0xff] }
 0x270   :  { %v5690_v34 = vcombine.high %v898_v27, %v902_v29  ;;  %v926_v10 = vld [vmem:[#allocation10 + $0x2b8] sm:$0xff] }
 0x271   :  { %4300 = vmatpush1.bf16.msra.mxu0 %v5639_v40  ;;  %v5687_v40 = vcombine.low %v897_v22, %v901_v24  ;;  %v938_v4 = vld [vmem:[#allocation10 + $0x318] sm:$0xff]  ;;  %v945_v22 = vld [vmem:[#allocation10 + $0x350] sm:$0xff] }
 0x272   :  { %4472 = vmatpush1.bf16.msra.mxu1 %v5641_v7  ;;  %4301 = vmatprep.subr.bf16.mxu0 %v5648_v44  ;;  %v5689_v7 = vcombine.low %v898_v27, %v902_v29  ;;  %v5696_v44 = vcombine.high %v905_v35, %v909_v36  ;;  %v942_v9 = vld [vmem:[#allocation10 + $0x338] sm:$0xff]  ;;  %v949_v24 = vld [vmem:[#allocation10 + $0x370] sm:$0xff] }
 0x273   :  { %4473 = vmatprep.subr.bf16.mxu1 %v5650_v45  ;;  %v5698_v45 = vcombine.high %v906_v37, %v910_v38  ;;  %v946_v27 = vld [vmem:[#allocation10 + $0x358] sm:$0xff] }
 0x274   :  { %v950_v29 = vld [vmem:[#allocation10 + $0x378] sm:$0xff] }
 0x275   :  { %4302 = vmatpush1.bf16.msra.mxu0 %v5647_v49  ;;  %v5695_v49 = vcombine.low %v905_v35, %v909_v36  ;;  %v953_v35 = vld [vmem:[#allocation10 + $0x390] sm:$0xff] }
 0x276   :  { %4474 = vmatpush1.bf16.msra.mxu1 %v5649_v51  ;;  %4303 = vmatprep.subr.bf16.mxu0 %v5656_v52  ;;  %v5697_v51 = vcombine.low %v906_v37, %v910_v38  ;;  %v5704_v52 = vcombine.high %v913_v0, %v917_v46  ;;  %v957_v36 = vld [vmem:[#allocation10 + $0x3b0] sm:$0xff]  ;;  %v954_v37 = vld [vmem:[#allocation10 + $0x398] sm:$0xff] }
 0x277   :  { %4475 = vmatprep.subr.bf16.mxu1 %v5658_v5  ;;  %v5706_v5 = vcombine.high %v914_v47, %v918_v48  ;;  %v958_v38 = vld [vmem:[#allocation10 + $0x3b8] sm:$0xff] }
 0x279   :  { %4304 = vmatpush1.bf16.msra.mxu0 %v5655_v12  ;;  %v5703_v12 = vcombine.low %v913_v0, %v917_v46  ;;  %v961_v0 = vld [vmem:[#allocation10 + $0x3d0] sm:$0xff] }
 0x27a   :  { %4476 = vmatpush1.bf16.msra.mxu1 %v5657_v53  ;;  %4305 = vmatprep.subr.bf16.mxu0 %v5664_v54  ;;  %v5705_v53 = vcombine.low %v914_v47, %v918_v48  ;;  %v5712_v54 = vcombine.high %v921_v6, %v925_v8  ;;  %v965_v46 = vld [vmem:[#allocation10 + $0x3f0] sm:$0xff]  ;;  %v962_v47 = vld [vmem:[#allocation10 + $0x3d8] sm:$0xff] }
 0x27b   :  { %4477 = vmatprep.subr.bf16.mxu1 %v5666_v55  ;;  %v5714_v55 = vcombine.high %v922_v26, %v926_v10  ;;  %v966_v48 = vld [vmem:[#allocation10 + $0x3f8] sm:$0xff] }
 0x27d   :  { %4306 = vmatpush1.bf16.msra.mxu0 %v5663_v17  ;;  %v5711_v17 = vcombine.low %v921_v6, %v925_v8  ;;  %v969_v6 = vld [vmem:[#allocation10 + $0x410] sm:$0xff] }
 0x27e   :  { %4478 = vmatpush1.bf16.msra.mxu1 %v5665_v60  ;;  %4307 = vmatprep.subr.bf16.mxu0 %v5672_v61  ;;  %v5713_v60 = vcombine.low %v922_v26, %v926_v10  ;;  %v5720_v61 = vcombine.high %v929_v56, %v933_v57  ;;  %v973_v8 = vld [vmem:[#allocation10 + $0x430] sm:$0xff]  ;;  %v970_v26 = vld [vmem:[#allocation10 + $0x418] sm:$0xff] }
 0x27f   :  { %4479 = vmatprep.subr.bf16.mxu1 %v5674_v62  ;;  %v5722_v62 = vcombine.high %v930_v58, %v934_v59  ;;  %v974_v10 = vld [vmem:[#allocation10 + $0x438] sm:$0xff] }
 0x281   :  { %4308 = vmatpush1.bf16.msra.mxu0 %v5671_v13  ;;  %v5719_v13 = vcombine.low %v929_v56, %v933_v57  ;;  %v977_v56 = vld [vmem:[#allocation10 + $0x450] sm:$0xff] }
 0x282   :  { %4480 = vmatpush1.bf16.msra.mxu1 %v5673_v14  ;;  %4309 = vmatprep.subr.bf16.mxu0 %v5680_v19  ;;  %v5721_v14 = vcombine.low %v930_v58, %v934_v59  ;;  %v5728_v19 = vcombine.high %v937_v2, %v941_v3  ;;  %v981_v57 = vld [vmem:[#allocation10 + $0x470] sm:$0xff]  ;;  %v5759_v58 = vcombine.low %v969_v6, %v973_v8  ;;  %v978_v59 = vld [vmem:[#allocation10 + $0x458] sm:$0xff] }
 0x283   :  { %4481 = vmatprep.subr.bf16.mxu1 %v5682_v20  ;;  %v5730_v20 = vcombine.high %v938_v4, %v942_v9 }
 0x285   :  { %4310 = vmatpush1.bf16.msra.mxu0 %v5679_v30  ;;  %v5727_v30 = vcombine.low %v937_v2, %v941_v3  ;;  %v989_v2 = vld [vmem:[#allocation10 + $0x4b0] sm:$0xff] }
 0x286   :  { %4482 = vmatpush1.bf16.msra.mxu1 %v5681_v32  ;;  %4311 = vmatprep.subr.bf16.mxu0 %v5688_v33  ;;  %v5729_v32 = vcombine.low %v938_v4, %v942_v9  ;;  %v5736_v33 = vcombine.high %v945_v22, %v949_v24  ;;  %v986_v4 = vld [vmem:[#allocation10 + $0x498] sm:$0xff] }
 0x287   :  { %4483 = vmatprep.subr.bf16.mxu1 %v5690_v34  ;;  %v5738_v34 = vcombine.high %v946_v27, %v950_v29  ;;  %v990_v9 = vld [vmem:[#allocation10 + $0x4b8] sm:$0xff] }
 0x289   :  { %4312 = vmatpush1.bf16.msra.mxu0 %v5687_v40  ;;  %v5735_v40 = vcombine.low %v945_v22, %v949_v24  ;;  %v993_v22 = vld [vmem:[#allocation10 + $0x4d0] sm:$0xff] }
 0x28a   :  { %4484 = vmatpush1.bf16.msra.mxu1 %v5689_v7  ;;  %4313 = vmatprep.subr.bf16.mxu0 %v5696_v44  ;;  %v5737_v7 = vcombine.low %v946_v27, %v950_v29  ;;  %v5744_v44 = vcombine.high %v953_v35, %v957_v36  ;;  %v997_v24 = vld [vmem:[#allocation10 + $0x4f0] sm:$0xff]  ;;  %v994_v27 = vld [vmem:[#allocation10 + $0x4d8] sm:$0xff] }
 0x28b   :  { %4485 = vmatprep.subr.bf16.mxu1 %v5698_v45  ;;  %v5746_v45 = vcombine.high %v954_v37, %v958_v38  ;;  %v998_v29 = vld [vmem:[#allocation10 + $0x4f8] sm:$0xff] }
 0x28d   :  { %4314 = vmatpush1.bf16.msra.mxu0 %v5695_v49  ;;  %v5743_v49 = vcombine.low %v953_v35, %v957_v36  ;;  %v1005_v35 = vld [vmem:[#allocation10 + $0x530] sm:$0xff]  ;;  %v1002_v36 = vld [vmem:[#allocation10 + $0x518] sm:$0xff] }
 0x28e   :  { %4486 = vmatpush1.bf16.msra.mxu1 %v5697_v51  ;;  %4315 = vmatprep.subr.bf16.mxu0 %v5704_v52  ;;  %v5745_v51 = vcombine.low %v954_v37, %v958_v38  ;;  %v5752_v52 = vcombine.high %v961_v0, %v965_v46  ;;  %v1006_v37 = vld [vmem:[#allocation10 + $0x538] sm:$0xff]  ;;  %v5785_v38 = vcombine.low %v994_v27, %v998_v29 }
 0x28f   :  { %4487 = vmatprep.subr.bf16.mxu1 %v5706_v5  ;;  %v5754_v5 = vcombine.high %v962_v47, %v966_v48 }
 0x291   :  { %4316 = vmatpush1.bf16.msra.mxu0 %v5703_v12  ;;  %v5751_v12 = vcombine.low %v961_v0, %v965_v46  ;;  %v1010_v0 = vld [vmem:[#allocation10 + $0x558] sm:$0xff] }
 0x292   :  { %4488 = vmatpush1.bf16.msra.mxu1 %v5705_v53  ;;  %4317 = vmatprep.subr.bf16.mxu0 %v5712_v54  ;;  %v5753_v53 = vcombine.low %v962_v47, %v966_v48  ;;  %v5760_v54 = vcombine.high %v969_v6, %v973_v8  ;;  %v1014_v46 = vld [vmem:[#allocation10 + $0x578] sm:$0xff]  ;;  %v5793_v48 = vcombine.low %v1002_v36, %v1006_v37 }
 0x293   :  { %4489 = vmatprep.subr.bf16.mxu1 %v5714_v55  ;;  %v5762_v55 = vcombine.high %v970_v26, %v974_v10  ;;  %v1018_v6 = vld [vmem:[#allocation10 + $0x598] sm:$0xff] }
 0x294   :  { %v1022_v8 = vld [vmem:[#allocation10 + $0x5b8] sm:$0xff] }
 0x295   :  { %4318 = vmatpush1.bf16.msra.mxu0 %v5711_v17  ;;  %v982_v17 = vld [vmem:[#allocation10 + $0x478] sm:$0xff] }
 0x296   :  { %4490 = vmatpush1.bf16.msra.mxu1 %v5713_v60  ;;  %4319 = vmatprep.subr.bf16.mxu0 %v5720_v61  ;;  %v5761_v60 = vcombine.low %v970_v26, %v974_v10  ;;  %v5768_v61 = vcombine.high %v977_v56, %v981_v57  ;;  %v5770_v3 = vcombine.high %v978_v59, %v982_v17 }
 0x297   :  { %4491 = vmatprep.subr.bf16.mxu1 %v5722_v62  ;;  %v985_v62 = vld [vmem:[#allocation10 + $0x490] sm:$0xff]  ;;  %v5801_v10 = vcombine.low %v1010_v0, %v1014_v46 }
 0x299   :  { %4320 = vmatpush1.bf16.msra.mxu0 %v5719_v13  ;;  %v5767_v13 = vcombine.low %v977_v56, %v981_v57  ;;  %v1026_v56 = vld [vmem:[#allocation10 + $0x5d8] sm:$0xff] }
 0x29a   :  { %4492 = vmatpush1.bf16.msra.mxu1 %v5721_v14  ;;  %4321 = vmatprep.subr.bf16.mxu0 %v5728_v19  ;;  %v5769_v14 = vcombine.low %v978_v59, %v982_v17  ;;  %v5776_v19 = vcombine.high %v985_v62, %v989_v2  ;;  %v1030_v57 = vld [vmem:[#allocation10 + $0x5f8] sm:$0xff]  ;;  %v5809_v59 = vcombine.low %v1018_v6, %v1022_v8 }
 0x29b   :  { %4493 = vmatprep.subr.bf16.mxu1 %v5730_v20  ;;  %v5778_v20 = vcombine.high %v986_v4, %v990_v9 }
 0x29d   :  { %4322 = vmatpush1.bf16.msra.mxu0 %v5727_v30  ;;  %v5775_v30 = vcombine.low %v985_v62, %v989_v2  ;;  %v1037_v62 = vld [vmem:[#allocation10 + $0x630] sm:$0xff]  ;;  %v1034_v2 = vld [vmem:[#allocation10 + $0x618] sm:$0xff] }
 0x29e   :  { %4494 = vmatpush1.bf16.msra.mxu1 %v5729_v32  ;;  %4323 = vmatprep.subr.bf16.mxu0 %v5736_v33  ;;  %v5784_v32 = vcombine.high %v993_v22, %v997_v24  ;;  %v5786_v33 = vcombine.high %v994_v27, %v998_v29 }
 0x29f   :  { %4495 = vmatprep.subr.bf16.mxu1 %v5738_v34  ;;  %v1001_v34 = vld [vmem:[#allocation10 + $0x510] sm:$0xff] }
 0x2a0   :  { %v5791_v47 = vcombine.low %v1001_v34, %v1005_v35 }
 0x2a1   :  { %4324 = vmatpush1.bf16.msra.mxu0 %v5735_v40  ;;  %v5792_v40 = vcombine.high %v1001_v34, %v1005_v35  ;;  %v1050_v34 = vld [vmem:[#allocation10 + $0x698] sm:$0xff] }
 0x2a2   :  { %4496 = vmatpush1.bf16.msra.mxu1 %v5737_v7  ;;  %4325 = vmatprep.subr.bf16.mxu0 %v5744_v44  ;;  %v5794_v7 = vcombine.high %v1002_v36, %v1006_v37  ;;  %v1009_v44 = vld [vmem:[#allocation10 + $0x550] sm:$0xff]  ;;  %v1054_v35 = vld [vmem:[#allocation10 + $0x6b8] sm:$0xff] }
 0x2a3   :  { %4497 = vmatprep.subr.bf16.mxu1 %v5746_v45  ;;  %v1013_v45 = vld [vmem:[#allocation10 + $0x570] sm:$0xff] }
 0x2a4   :  { %v5799_v26 = vcombine.low %v1009_v44, %v1013_v45 }
 0x2a5   :  { %4326 = vmatpush1.bf16.msra.mxu0 %v5743_v49  ;;  %v5800_v49 = vcombine.high %v1009_v44, %v1013_v45  ;;  %v1058_v44 = vld [vmem:[#allocation10 + $0x6d8] sm:$0xff] }
 0x2a6   :  { %4498 = vmatpush1.bf16.msra.mxu1 %v5745_v51  ;;  %4327 = vmatprep.subr.bf16.mxu0 %v5752_v52  ;;  %v5802_v51 = vcombine.high %v1010_v0, %v1014_v46  ;;  %v1017_v52 = vld [vmem:[#allocation10 + $0x590] sm:$0xff]  ;;  %v1062_v45 = vld [vmem:[#allocation10 + $0x6f8] sm:$0xff]  ;;  %v5841_v46 = vcombine.low %v1050_v34, %v1054_v35 }
 0x2a7   :  { %4499 = vmatprep.subr.bf16.mxu1 %v5754_v5  ;;  %v1021_v5 = vld [vmem:[#allocation10 + $0x5b0] sm:$0xff] }
 0x2a9   :  { %4328 = vmatpush1.bf16.msra.mxu0 %v5751_v12  ;;  %v5808_v12 = vcombine.high %v1017_v52, %v1021_v5 }
 0x2aa   :  { %4500 = vmatpush1.bf16.msra.mxu1 %v5753_v53  ;;  %4340 = vmatprep.subr.bf16.mxu0 %v5760_v54  ;;  %v5810_v53 = vcombine.high %v1018_v6, %v1022_v8  ;;  %v1025_v54 = vld [vmem:[#allocation10 + $0x5d0] sm:$0xff]  ;;  %v5849_v8 = vcombine.low %v1058_v44, %v1062_v45 }
 0x2ab   :  { %4512 = vmatprep.subr.bf16.mxu1 %v5762_v55  ;;  %v1029_v55 = vld [vmem:[#allocation10 + $0x5f0] sm:$0xff] }
 0x2ac   :  { %4330 = vmatmul.mubr.bf16.vlgmr.msra.gmra.mrb[12].mxu0 %v7041_v25  ;;  %v5816_v17 = vcombine.high %v1025_v54, %v1029_v55 }
 0x2ad   :  { %4502 = vmatmul.mubr.bf16.vlgmr.msra.gmra.mrb[12].mxu1 %v7041_v25  ;;  %4341 = vmatpush1.bf16.msra.mxu0 %v5759_v58  ;;  %v5777_v25 = vcombine.low %v986_v4, %v990_v9  ;;  %v5807_v58 = vcombine.low %v1017_v52, %v1021_v5  ;;  %v5815_v4 = vcombine.low %v1025_v54, %v1029_v55  ;;  %v1066_v52 = vld [vmem:[#allocation10 + $0x718] sm:$0xff] }
 0x2ae   :  { %4372 = vmatprep.mubr.bf16.mxu0 %v7057_v11  ;;  %4513 = vmatpush1.bf16.msra.mxu1 %v5761_v60  ;;  %v5818_v60 = vcombine.high %v1026_v56, %v1030_v57  ;;  %v5817_v9 = vcombine.low %v1026_v56, %v1030_v57  ;;  %v1070_v5 = vld [vmem:[#allocation10 + $0x738] sm:$0xff] }
 0x2af   :  { %4544 = vmatprep.mubr.bf16.mxu1 %v7057_v11  ;;  %4342 = vmatprep.subr.bf16.mxu0 %v5768_v61  ;;  %v5783_v11 = vcombine.low %v993_v22, %v997_v24  ;;  %v1033_v61 = vld [vmem:[#allocation10 + $0x610] sm:$0xff]  ;;  %v1042_v22 = vld [vmem:[#allocation10 + $0x658] sm:$0xff]  ;;  %v5857_v57 = vcombine.low %v1066_v52, %v1070_v5 }
 0x2b0   :  { %4514 = vmatprep.subr.bf16.mxu1 %v5770_v3  ;;  %v1038_v3 = vld [vmem:[#allocation10 + $0x638] sm:$0xff]  ;;  %v5823_v27 = vcombine.low %v1033_v61, %v1037_v62 }
 0x2b1   :  { %4343 = vmatpush1.bf16.msra.mxu0 %v5767_v13  ;;  %v5824_v13 = vcombine.high %v1033_v61, %v1037_v62  ;;  %v1046_v24 = vld [vmem:[#allocation10 + $0x678] sm:$0xff]  ;;  %v5825_v29 = vcombine.low %v1034_v2, %v1038_v3 }
 0x2b2   :  { %4515 = vmatpush1.bf16.msra.mxu1 %v5769_v14  ;;  %4344 = vmatprep.subr.bf16.mxu0 %v5776_v19  ;;  %v5826_v14 = vcombine.high %v1034_v2, %v1038_v3  ;;  %v1041_v19 = vld [vmem:[#allocation10 + $0x650] sm:$0xff]  ;;  %v5833_v37 = vcombine.low %v1042_v22, %v1046_v24  ;;  %v1074_v54 = vld [vmem:[#allocation10 + $0x758] sm:$0xff] }
 0x2b3   :  { %4516 = vmatprep.subr.bf16.mxu1 %v5778_v20  ;;  %v1045_v20 = vld [vmem:[#allocation10 + $0x670] sm:$0xff]  ;;  %v1078_v55 = vld [vmem:[#allocation10 + $0x778] sm:$0xff] }
 0x2b4   :  { %v5831_v36 = vcombine.low %v1041_v19, %v1045_v20  ;;  %v1082_v61 = vld [vmem:[#allocation10 + $0x798] sm:$0xff]  ;;  %v5865_v3 = vcombine.low %v1074_v54, %v1078_v55 }
 0x2b5   :  { %4345 = vmatpush1.bf16.msra.mxu0 %v5775_v30  ;;  %v5832_v30 = vcombine.high %v1041_v19, %v1045_v20  ;;  %v1086_v62 = vld [vmem:[#allocation10 + $0x7b8] sm:$0xff] }
 0x2b6   :  { %4517 = vmatpush1.bf16.msra.mxu1 %v5777_v25  ;;  %4346 = vmatprep.subr.bf16.mxu0 %v5784_v32  ;;  %v5834_v25 = vcombine.high %v1042_v22, %v1046_v24  ;;  %v1049_v32 = vld [vmem:[#allocation10 + $0x690] sm:$0xff]  ;;  %v1090_v19 = vld [vmem:[#allocation10 + $0x7d8] sm:$0xff]  ;;  %v5873_v24 = vcombine.low %v1082_v61, %v1086_v62 }
 0x2b7   :  { %4518 = vmatprep.subr.bf16.mxu1 %v5786_v33  ;;  %v1053_v33 = vld [vmem:[#allocation10 + $0x6b0] sm:$0xff]  ;;  %v1094_v20 = vld [vmem:[#allocation10 + $0x7f8] sm:$0xff] }
 0x2b8   :  { %v5839_v0 = vcombine.low %v1049_v32, %v1053_v33 }
 0x2b9   :  { %4347 = vmatpush1.bf16.msra.mxu0 %v5783_v11  ;;  %v5840_v11 = vcombine.high %v1049_v32, %v1053_v33  ;;  %v1098_v32 = vld [vmem:[#allocation10 + $0x818] sm:$0xff] }
 0x2ba   :  { %4519 = vmatpush1.bf16.msra.mxu1 %v5785_v38  ;;  %4348 = vmatprep.subr.bf16.mxu0 %v5792_v40  ;;  %v5842_v38 = vcombine.high %v1050_v34, %v1054_v35  ;;  %v1057_v40 = vld [vmem:[#allocation10 + $0x6d0] sm:$0xff]  ;;  %v1102_v33 = vld [vmem:[#allocation10 + $0x838] sm:$0xff]  ;;  %v5881_v35 = vcombine.low %v1090_v19, %v1094_v20 }
 0x2bb   :  { %4520 = vmatprep.subr.bf16.mxu1 %v5794_v7  ;;  %v1061_v7 = vld [vmem:[#allocation10 + $0x6f0] sm:$0xff] }
 0x2bc   :  { %v5847_v6 = vcombine.low %v1057_v40, %v1061_v7 }
 0x2bd   :  { %4349 = vmatpush1.bf16.msra.mxu0 %v5791_v47  ;;  %v5848_v47 = vcombine.high %v1057_v40, %v1061_v7  ;;  %v1106_v7 = vld [vmem:[#allocation10 + $0x858] sm:$0xff] }
 0x2be   :  { %4521 = vmatpush1.bf16.msra.mxu1 %v5793_v48  ;;  %4350 = vmatprep.subr.bf16.mxu0 %v5800_v49  ;;  %v5850_v48 = vcombine.high %v1058_v44, %v1062_v45  ;;  %v1065_v49 = vld [vmem:[#allocation10 + $0x710] sm:$0xff]  ;;  %v1110_v44 = vld [vmem:[#allocation10 + $0x878] sm:$0xff]  ;;  %v5889_v45 = vcombine.low %v1098_v32, %v1102_v33 }
 0x2bf   :  { %4522 = vmatprep.subr.bf16.mxu1 %v5802_v51  ;;  %v1069_v51 = vld [vmem:[#allocation10 + $0x730] sm:$0xff] }
 0x2c0   :  { %v5855_v56 = vcombine.low %v1065_v49, %v1069_v51 }
 0x2c1   :  { %4351 = vmatpush1.bf16.msra.mxu0 %v5799_v26  ;;  %v5856_v26 = vcombine.high %v1065_v49, %v1069_v51  ;;  %v1114_v49 = vld [vmem:[#allocation10 + $0x898] sm:$0xff] }
 0x2c2   :  { %4523 = vmatpush1.bf16.msra.mxu1 %v5801_v10  ;;  %4352 = vmatprep.subr.bf16.mxu0 %v5808_v12  ;;  %v5858_v10 = vcombine.high %v1066_v52, %v1070_v5  ;;  %v1073_v12 = vld [vmem:[#allocation10 + $0x750] sm:$0xff]  ;;  %v1118_v51 = vld [vmem:[#allocation10 + $0x8b8] sm:$0xff]  ;;  %v5897_v5 = vcombine.low %v1106_v7, %v1110_v44 }
 0x2c3   :  { %4524 = vmatprep.subr.bf16.mxu1 %v5810_v53  ;;  %v1077_v53 = vld [vmem:[#allocation10 + $0x770] sm:$0xff] }
 0x2c4   :  { %v5863_v2 = vcombine.low %v1073_v12, %v1077_v53 }
 0x2c5   :  { %4353 = vmatpush1.bf16.msra.mxu0 %v5807_v58  ;;  %v5864_v58 = vcombine.high %v1073_v12, %v1077_v53  ;;  %v1122_v12 = vld [vmem:[#allocation10 + $0x8d8] sm:$0xff] }
 0x2c6   :  { %4525 = vmatpush1.bf16.msra.mxu1 %v5809_v59  ;;  %4354 = vmatprep.subr.bf16.mxu0 %v5816_v17  ;;  %v5866_v59 = vcombine.high %v1074_v54, %v1078_v55  ;;  %v1081_v17 = vld [vmem:[#allocation10 + $0x790] sm:$0xff]  ;;  %v1126_v53 = vld [vmem:[#allocation10 + $0x8f8] sm:$0xff] }
 0x2c7   :  { %4526 = vmatprep.subr.bf16.mxu1 %v5818_v60  ;;  %v1085_v60 = vld [vmem:[#allocation10 + $0x7b0] sm:$0xff] }
 0x2c8   :  { %v5871_v22 = vcombine.low %v1081_v17, %v1085_v60 }
 0x2c9   :  { %4355 = vmatpush1.bf16.msra.mxu0 %v5815_v4  ;;  %v5872_v4 = vcombine.high %v1081_v17, %v1085_v60  ;;  %v1134_v17 = vld [vmem:[#allocation10 + $0x938] sm:$0xff]  ;;  %v5913_v60 = vcombine.low %v1122_v12, %v1126_v53 }
 0x2ca   :  { %4527 = vmatpush1.bf16.msra.mxu1 %v5817_v9  ;;  %4356 = vmatprep.subr.bf16.mxu0 %v5824_v13  ;;  %v5874_v9 = vcombine.high %v1082_v61, %v1086_v62  ;;  %v1089_v13 = vld [vmem:[#allocation10 + $0x7d0] sm:$0xff] }
 0x2cb   :  { %4528 = vmatprep.subr.bf16.mxu1 %v5826_v14  ;;  %v1093_v14 = vld [vmem:[#allocation10 + $0x7f0] sm:$0xff] }
 0x2cc   :  { %v5879_v34 = vcombine.low %v1089_v13, %v1093_v14 }
 0x2cd   :  { %4357 = vmatpush1.bf16.msra.mxu0 %v5823_v27  ;;  %v5880_v27 = vcombine.high %v1089_v13, %v1093_v14 }
 0x2ce   :  { %4529 = vmatpush1.bf16.msra.mxu1 %v5825_v29  ;;  %4358 = vmatprep.subr.bf16.mxu0 %v5832_v30  ;;  %v5882_v29 = vcombine.high %v1090_v19, %v1094_v20  ;;  %v1097_v30 = vld [vmem:[#allocation10 + $0x810] sm:$0xff] }
 0x2cf   :  { %4530 = vmatprep.subr.bf16.mxu1 %v5834_v25  ;;  %v1101_v25 = vld [vmem:[#allocation10 + $0x830] sm:$0xff] }
 0x2d0   :  { %v5887_v40 = vcombine.low %v1097_v30, %v1101_v25 }
 0x2d1   :  { %4359 = vmatpush1.bf16.msra.mxu0 %v5831_v36  ;;  %v5888_v36 = vcombine.high %v1097_v30, %v1101_v25 }
 0x2d2   :  { %4531 = vmatpush1.bf16.msra.mxu1 %v5833_v37  ;;  %4360 = vmatprep.subr.bf16.mxu0 %v5840_v11  ;;  %v5890_v37 = vcombine.high %v1098_v32, %v1102_v33  ;;  %v1105_v11 = vld [vmem:[#allocation10 + $0x850] sm:$0xff] }
 0x2d3   :  { %4532 = vmatprep.subr.bf16.mxu1 %v5842_v38  ;;  %v1109_v38 = vld [vmem:[#allocation10 + $0x870] sm:$0xff] }
 0x2d4   :  { %v5895_v52 = vcombine.low %v1105_v11, %v1109_v38 }
 0x2d5   :  { %4361 = vmatpush1.bf16.msra.mxu0 %v5839_v0  ;;  %v5896_v0 = vcombine.high %v1105_v11, %v1109_v38 }
 0x2d6   :  { %4533 = vmatpush1.bf16.msra.mxu1 %v5841_v46  ;;  %4362 = vmatprep.subr.bf16.mxu0 %v5848_v47  ;;  %v1113_v46 = vld [vmem:[#allocation10 + $0x890] sm:$0xff] }
 0x2d7   :  { %4534 = vmatprep.subr.bf16.mxu1 %v5850_v48  ;;  %v1117_v47 = vld [vmem:[#allocation10 + $0x8b0] sm:$0xff]  ;;  %v5898_v48 = vcombine.high %v1106_v7, %v1110_v44 }
 0x2d8   :  { %v5903_v54 = vcombine.low %v1113_v46, %v1117_v47  ;;  %v1161_v44 = vld [vmem:[#allocation10 + $0xa10] sm:$0xff] }
 0x2d9   :  { %4363 = vmatpush1.bf16.msra.mxu0 %v5847_v6  ;;  %v5904_v6 = vcombine.high %v1113_v46, %v1117_v47  ;;  %v1166_v46 = vld [vmem:[#allocation10 + $0xa38] sm:$0xff] }
 0x2da   :  { %4535 = vmatpush1.bf16.msra.mxu1 %v5849_v8  ;;  %4364 = vmatprep.subr.bf16.mxu0 %v5856_v26  ;;  %v5906_v8 = vcombine.high %v1114_v49, %v1118_v51  ;;  %v1121_v26 = vld [vmem:[#allocation10 + $0x8d0] sm:$0xff] }
 0x2db   :  { %4536 = vmatprep.subr.bf16.mxu1 %v5858_v10  ;;  %v1125_v10 = vld [vmem:[#allocation10 + $0x8f0] sm:$0xff] }
 0x2dc   :  { %v5912_v55 = vcombine.high %v1121_v26, %v1125_v10 }
 0x2dd   :  { %4365 = vmatpush1.bf16.msra.mxu0 %v5855_v56  ;;  %v5914_v56 = vcombine.high %v1122_v12, %v1126_v53 }
 0x2de   :  { %4537 = vmatpush1.bf16.msra.mxu1 %v5857_v57  ;;  %4366 = vmatprep.subr.bf16.mxu0 %v5864_v58  ;;  %v1129_v57 = vld [vmem:[#allocation10 + $0x910] sm:$0xff] }
 0x2df   :  { %4538 = vmatprep.subr.bf16.mxu1 %v5866_v59  ;;  %v1133_v58 = vld [vmem:[#allocation10 + $0x930] sm:$0xff]  ;;  %v1130_v59 = vld [vmem:[#allocation10 + $0x918] sm:$0xff] }
 0x2e0   :  { %v5920_v61 = vcombine.high %v1129_v57, %v1133_v58  ;;  %v5922_v62 = vcombine.high %v1130_v59, %v1134_v17  ;;  %v5919_v13 = vcombine.low %v1129_v57, %v1133_v58  ;;  %v5921_v14 = vcombine.low %v1130_v59, %v1134_v17 }
 0x2e1   :  { %4367 = vmatpush1.bf16.msra.mxu0 %v5863_v2  ;;  %v1137_v2 = vld [vmem:[#allocation10 + $0x950] sm:$0xff] }
 0x2e2   :  { %4539 = vmatpush1.bf16.msra.mxu1 %v5865_v3  ;;  %4368 = vmatprep.subr.bf16.mxu0 %v5872_v4  ;;  %v1141_v3 = vld [vmem:[#allocation10 + $0x970] sm:$0xff]  ;;  %v1138_v4 = vld [vmem:[#allocation10 + $0x958] sm:$0xff] }
 0x2e3   :  { %4540 = vmatprep.subr.bf16.mxu1 %v5874_v9  ;;  %v1142_v9 = vld [vmem:[#allocation10 + $0x978] sm:$0xff]  ;;  %v5928_v19 = vcombine.high %v1137_v2, %v1141_v3  ;;  %v5927_v30 = vcombine.low %v1137_v2, %v1141_v3 }
 0x2e4   :  { %v5930_v20 = vcombine.high %v1138_v4, %v1142_v9  ;;  %v5929_v25 = vcombine.low %v1138_v4, %v1142_v9 }
 0x2e5   :  { %4369 = vmatpush1.bf16.msra.mxu0 %v5871_v22  ;;  %v1145_v22 = vld [vmem:[#allocation10 + $0x990] sm:$0xff] }
 0x2e6   :  { %4541 = vmatpush1.bf16.msra.mxu1 %v5873_v24  ;;  %4370 = vmatprep.subr.bf16.mxu0 %v5880_v27  ;;  %v1149_v24 = vld [vmem:[#allocation10 + $0x9b0] sm:$0xff]  ;;  %v1146_v27 = vld [vmem:[#allocation10 + $0x998] sm:$0xff] }
 0x2e7   :  { %4542 = vmatprep.subr.bf16.mxu1 %v5882_v29  ;;  %v1150_v29 = vld [vmem:[#allocation10 + $0x9b8] sm:$0xff]  ;;  %v5936_v32 = vcombine.high %v1145_v22, %v1149_v24  ;;  %v5935_v11 = vcombine.low %v1145_v22, %v1149_v24 }
 0x2e8   :  { %v5938_v33 = vcombine.high %v1146_v27, %v1150_v29  ;;  %v5937_v38 = vcombine.low %v1146_v27, %v1150_v29 }
 0x2e9   :  { %4371 = vmatpush1.bf16.msra.mxu0 %v5879_v34  ;;  %v1153_v34 = vld [vmem:[#allocation10 + $0x9d0] sm:$0xff] }
 0x2ea   :  { %4543 = vmatpush1.bf16.msra.mxu1 %v5881_v35  ;;  %4383 = vmatprep.subr.bf16.mxu0 %v5888_v36  ;;  %v1157_v35 = vld [vmem:[#allocation10 + $0x9f0] sm:$0xff]  ;;  %v1154_v36 = vld [vmem:[#allocation10 + $0x9d8] sm:$0xff] }
 0x2eb   :  { %4555 = vmatprep.subr.bf16.mxu1 %v5890_v37  ;;  %v1158_v37 = vld [vmem:[#allocation10 + $0x9f8] sm:$0xff]  ;;  %v5943_v47 = vcombine.low %v1153_v34, %v1157_v35 }
 0x2ec   :  { %4373 = vmatmul.mubr.bf16.vlgmr.msra.gmra.mrb[12].mxu0 %v7055_v50  ;;  %v5946_v7 = vcombine.high %v1154_v36, %v1158_v37 }
 0x2ed   :  { %4545 = vmatmul.mubr.bf16.vlgmr.msra.gmra.mrb[12].mxu1 %v7055_v50  ;;  %4384 = vmatpush1.bf16.msra.mxu0 %v5887_v40  ;;  %v5905_v50 = vcombine.low %v1114_v49, %v1118_v51  ;;  %v5944_v40 = vcombine.high %v1153_v34, %v1157_v35 }
 0x2ee   :  { %4415 = vmatprep.mubr.bf16.mxu0 %v7071_v31  ;;  %4556 = vmatpush1.bf16.msra.mxu1 %v5889_v45  ;;  %v1165_v45 = vld [vmem:[#allocation10 + $0xa30] sm:$0xff] }
 0x2ef   :  { %4587 = vmatprep.mubr.bf16.mxu1 %v7071_v31  ;;  %4385 = vmatprep.subr.bf16.mxu0 %v5896_v0  ;;  %v5911_v31 = vcombine.low %v1121_v26, %v1125_v10  ;;  %v1162_v0 = vld [vmem:[#allocation10 + $0xa18] sm:$0xff]  ;;  %v5952_v49 = vcombine.high %v1161_v44, %v1165_v45  ;;  %v5951_v26 = vcombine.low %v1161_v44, %v1165_v45 }
 0x2f0   :  { %4557 = vmatprep.subr.bf16.mxu1 %v5898_v48  ;;  %v5945_v48 = vcombine.low %v1154_v36, %v1158_v37  ;;  %v5954_v51 = vcombine.high %v1162_v0, %v1166_v46  ;;  %v5953_v10 = vcombine.low %v1162_v0, %v1166_v46 }
 0x2f1   :  { %4386 = vmatpush1.bf16.msra.mxu0 %v5895_v52  ;;  %v1169_v52 = vld [vmem:[#allocation10 + $0xa50] sm:$0xff] }
 0x2f2   :  { %4558 = vmatpush1.bf16.msra.mxu1 %v5897_v5  ;;  %4387 = vmatprep.subr.bf16.mxu0 %v5904_v6  ;;  %v1173_v5 = vld [vmem:[#allocation10 + $0xa70] sm:$0xff]  ;;  %v1170_v6 = vld [vmem:[#allocation10 + $0xa58] sm:$0xff] }
 0x2f3   :  { %4559 = vmatprep.subr.bf16.mxu1 %v5906_v8  ;;  %v1174_v8 = vld [vmem:[#allocation10 + $0xa78] sm:$0xff]  ;;  %v5960_v12 = vcombine.high %v1169_v52, %v1173_v5  ;;  %v5959_v57 = vcombine.low %v1169_v52, %v1173_v5 }
 0x2f4   :  { %v5962_v53 = vcombine.high %v1170_v6, %v1174_v8  ;;  %v5961_v58 = vcombine.low %v1170_v6, %v1174_v8 }
 0x2f5   :  { %4388 = vmatpush1.bf16.msra.mxu0 %v5903_v54  ;;  %v1177_v54 = vld [vmem:[#allocation10 + $0xa90] sm:$0xff] }
 0x2f6   :  { %4560 = vmatpush1.bf16.msra.mxu1 %v5905_v50  ;;  %4389 = vmatprep.subr.bf16.mxu0 %v5912_v55  ;;  %v1181_v50 = vld [vmem:[#allocation10 + $0xab0] sm:$0xff]  ;;  %v1178_v55 = vld [vmem:[#allocation10 + $0xa98] sm:$0xff] }
 0x2f7   :  { %4561 = vmatprep.subr.bf16.mxu1 %v5914_v56  ;;  %v1182_v56 = vld [vmem:[#allocation10 + $0xab8] sm:$0xff]  ;;  %v5968_v59 = vcombine.high %v1177_v54, %v1181_v50  ;;  %v5967_v2 = vcombine.low %v1177_v54, %v1181_v50 }
 0x2f8   :  { %v5970_v17 = vcombine.high %v1178_v55, %v1182_v56  ;;  %v5969_v3 = vcombine.low %v1178_v55, %v1182_v56 }
 0x2f9   :  { %4390 = vmatpush1.bf16.msra.mxu0 %v5911_v31  ;;  %v1185_v31 = vld [vmem:[#allocation10 + $0xad0] sm:$0xff] }
 0x2fa   :  { %4562 = vmatpush1.bf16.msra.mxu1 %v5913_v60  ;;  %4391 = vmatprep.subr.bf16.mxu0 %v5920_v61  ;;  %v1189_v60 = vld [vmem:[#allocation10 + $0xaf0] sm:$0xff]  ;;  %v1186_v61 = vld [vmem:[#allocation10 + $0xad8] sm:$0xff] }
 0x2fb   :  { %4563 = vmatprep.subr.bf16.mxu1 %v5922_v62  ;;  %v1190_v62 = vld [vmem:[#allocation10 + $0xaf8] sm:$0xff]  ;;  %v5976_v4 = vcombine.high %v1185_v31, %v1189_v60  ;;  %v5975_v22 = vcombine.low %v1185_v31, %v1189_v60 }
 0x2fc   :  { %v5978_v9 = vcombine.high %v1186_v61, %v1190_v62  ;;  %v5977_v24 = vcombine.low %v1186_v61, %v1190_v62  ;;  %v1238_v31 = vld [vmem:[#allocation10 + $0xc78] sm:$0xff]  ;;  %v1241_v62 = vld [vmem:[#allocation10 + $0xc90] sm:$0xff] }
 0x2fd   :  { %4392 = vmatpush1.bf16.msra.mxu0 %v5919_v13  ;;  %v1193_v13 = vld [vmem:[#allocation10 + $0xb10] sm:$0xff] }
 0x2fe   :  { %4564 = vmatpush1.bf16.msra.mxu1 %v5921_v14  ;;  %4393 = vmatprep.subr.bf16.mxu0 %v5928_v19  ;;  %v1197_v14 = vld [vmem:[#allocation10 + $0xb30] sm:$0xff]  ;;  %v1194_v19 = vld [vmem:[#allocation10 + $0xb18] sm:$0xff] }
 0x2ff   :  { %4565 = vmatprep.subr.bf16.mxu1 %v5930_v20  ;;  %v1198_v20 = vld [vmem:[#allocation10 + $0xb38] sm:$0xff]  ;;  %v5984_v27 = vcombine.high %v1193_v13, %v1197_v14  ;;  %v5983_v34 = vcombine.low %v1193_v13, %v1197_v14 }
 0x300   :  { %v5986_v29 = vcombine.high %v1194_v19, %v1198_v20  ;;  %v5985_v35 = vcombine.low %v1194_v19, %v1198_v20 }
 0x301   :  { %4394 = vmatpush1.bf16.msra.mxu0 %v5927_v30  ;;  %v1201_v30 = vld [vmem:[#allocation10 + $0xb50] sm:$0xff] }
 0x302   :  { %4566 = vmatpush1.bf16.msra.mxu1 %v5929_v25  ;;  %4395 = vmatprep.subr.bf16.mxu0 %v5936_v32  ;;  %v1205_v25 = vld [vmem:[#allocation10 + $0xb70] sm:$0xff]  ;;  %v1202_v32 = vld [vmem:[#allocation10 + $0xb58] sm:$0xff] }
 0x303   :  { %4567 = vmatprep.subr.bf16.mxu1 %v5938_v33  ;;  %v1206_v33 = vld [vmem:[#allocation10 + $0xb78] sm:$0xff]  ;;  %v5992_v36 = vcombine.high %v1201_v30, %v1205_v25  ;;  %v5991_v44 = vcombine.low %v1201_v30, %v1205_v25 }
 0x304   :  { %v5994_v37 = vcombine.high %v1202_v32, %v1206_v33  ;;  %v5993_v45 = vcombine.low %v1202_v32, %v1206_v33  ;;  %v1257_v33 = vld [vmem:[#allocation10 + $0xd10] sm:$0xff] }
 0x305   :  { %4396 = vmatpush1.bf16.msra.mxu0 %v5935_v11  ;;  %v1209_v11 = vld [vmem:[#allocation10 + $0xb90] sm:$0xff] }
 0x306   :  { %4568 = vmatpush1.bf16.msra.mxu1 %v5937_v38  ;;  %4397 = vmatprep.subr.bf16.mxu0 %v5944_v40  ;;  %v1213_v38 = vld [vmem:[#allocation10 + $0xbb0] sm:$0xff]  ;;  %v1210_v40 = vld [vmem:[#allocation10 + $0xb98] sm:$0xff] }
 0x307   :  { %4569 = vmatprep.subr.bf16.mxu1 %v5946_v7  ;;  %v1214_v7 = vld [vmem:[#allocation10 + $0xbb8] sm:$0xff]  ;;  %v6000_v0 = vcombine.high %v1209_v11, %v1213_v38  ;;  %v5999_v52 = vcombine.low %v1209_v11, %v1213_v38 }
 0x308   :  { %v6002_v46 = vcombine.high %v1210_v40, %v1214_v7  ;;  %v6001_v5 = vcombine.low %v1210_v40, %v1214_v7  ;;  %v1265_v40 = vld [vmem:[#allocation10 + $0xd50] sm:$0xff] }
 0x309   :  { %4398 = vmatpush1.bf16.msra.mxu0 %v5943_v47  ;;  %v1217_v47 = vld [vmem:[#allocation10 + $0xbd0] sm:$0xff] }
 0x30a   :  { %4570 = vmatpush1.bf16.msra.mxu1 %v5945_v48  ;;  %4399 = vmatprep.subr.bf16.mxu0 %v5952_v49  ;;  %v1221_v48 = vld [vmem:[#allocation10 + $0xbf0] sm:$0xff]  ;;  %v1218_v49 = vld [vmem:[#allocation10 + $0xbd8] sm:$0xff] }
 0x30b   :  { %4571 = vmatprep.subr.bf16.mxu1 %v5954_v51  ;;  %v1222_v51 = vld [vmem:[#allocation10 + $0xbf8] sm:$0xff]  ;;  %v6008_v6 = vcombine.high %v1217_v47, %v1221_v48  ;;  %v6007_v54 = vcombine.low %v1217_v47, %v1221_v48  ;;  %v1269_v7 = vld [vmem:[#allocation10 + $0xd70] sm:$0xff] }
 0x30c   :  { %v6010_v8 = vcombine.high %v1218_v49, %v1222_v51  ;;  %v6009_v50 = vcombine.low %v1218_v49, %v1222_v51  ;;  %v6056_v48 = vcombine.high %v1265_v40, %v1269_v7  ;;  %v1273_v51 = vld [vmem:[#allocation10 + $0xd90] sm:$0xff] }
 0x30d   :  { %4400 = vmatpush1.bf16.msra.mxu0 %v5951_v26  ;;  %v1225_v26 = vld [vmem:[#allocation10 + $0xc10] sm:$0xff] }
 0x30e   :  { %4572 = vmatpush1.bf16.msra.mxu1 %v5953_v10  ;;  %4401 = vmatprep.subr.bf16.mxu0 %v5960_v12  ;;  %v1229_v10 = vld [vmem:[#allocation10 + $0xc30] sm:$0xff]  ;;  %v1226_v12 = vld [vmem:[#allocation10 + $0xc18] sm:$0xff] }
 0x30f   :  { %4573 = vmatprep.subr.bf16.mxu1 %v5962_v53  ;;  %v1230_v53 = vld [vmem:[#allocation10 + $0xc38] sm:$0xff]  ;;  %v6016_v55 = vcombine.high %v1225_v26, %v1229_v10 }
 0x310   :  { %v6018_v56 = vcombine.high %v1226_v12, %v1230_v53  ;;  %v6017_v60 = vcombine.low %v1226_v12, %v1230_v53  ;;  %v6055_v53 = vcombine.low %v1265_v40, %v1269_v7 }
 0x311   :  { %4402 = vmatpush1.bf16.msra.mxu0 %v5959_v57  ;;  %v1233_v57 = vld [vmem:[#allocation10 + $0xc50] sm:$0xff] }
 0x312   :  { %4574 = vmatpush1.bf16.msra.mxu1 %v5961_v58  ;;  %4403 = vmatprep.subr.bf16.mxu0 %v5968_v59  ;;  %v1237_v58 = vld [vmem:[#allocation10 + $0xc70] sm:$0xff]  ;;  %v6015_v59 = vcombine.low %v1225_v26, %v1229_v10  ;;  %v1278_v26 = vld [vmem:[#allocation10 + $0xdb8] sm:$0xff] }
 0x313   :  { %4575 = vmatprep.subr.bf16.mxu1 %v5970_v17  ;;  %v1234_v17 = vld [vmem:[#allocation10 + $0xc58] sm:$0xff]  ;;  %v6024_v61 = vcombine.high %v1233_v57, %v1237_v58  ;;  %v6023_v13 = vcombine.low %v1233_v57, %v1237_v58 }
 0x314   :  { %v6025_v14 = vcombine.low %v1234_v17, %v1238_v31 }
 0x315   :  { %4404 = vmatpush1.bf16.msra.mxu0 %v5967_v2  ;;  %v1245_v2 = vld [vmem:[#allocation10 + $0xcb0] sm:$0xff] }
 0x316   :  { %4576 = vmatpush1.bf16.msra.mxu1 %v5969_v3  ;;  %4405 = vmatprep.subr.bf16.mxu0 %v5976_v4  ;;  %v6026_v3 = vcombine.high %v1234_v17, %v1238_v31  ;;  %v1242_v4 = vld [vmem:[#allocation10 + $0xc98] sm:$0xff]  ;;  %v6032_v19 = vcombine.high %v1241_v62, %v1245_v2  ;;  %v6031_v30 = vcombine.low %v1241_v62, %v1245_v2 }
 0x317   :  { %4577 = vmatprep.subr.bf16.mxu1 %v5978_v9  ;;  %v1246_v9 = vld [vmem:[#allocation10 + $0xcb8] sm:$0xff] }
 0x318   :  { %v6034_v20 = vcombine.high %v1242_v4, %v1246_v9 }
 0x319   :  { %4406 = vmatpush1.bf16.msra.mxu0 %v5975_v22  ;;  %v1249_v22 = vld [vmem:[#allocation10 + $0xcd0] sm:$0xff] }
 0x31a   :  { %4578 = vmatpush1.bf16.msra.mxu1 %v5977_v24  ;;  %4407 = vmatprep.subr.bf16.mxu0 %v5984_v27  ;;  %v1253_v24 = vld [vmem:[#allocation10 + $0xcf0] sm:$0xff]  ;;  %v1250_v27 = vld [vmem:[#allocation10 + $0xcd8] sm:$0xff] }
 0x31b   :  { %4579 = vmatprep.subr.bf16.mxu1 %v5986_v29  ;;  %v1254_v29 = vld [vmem:[#allocation10 + $0xcf8] sm:$0xff]  ;;  %v6040_v25 = vcombine.high %v1249_v22, %v1253_v24 }
 0x31c   :  { %v6042_v32 = vcombine.high %v1250_v27, %v1254_v29 }
 0x31d   :  { %4408 = vmatpush1.bf16.msra.mxu0 %v5983_v34  ;;  %v1261_v34 = vld [vmem:[#allocation10 + $0xd30] sm:$0xff] }
 0x31e   :  { %4580 = vmatpush1.bf16.msra.mxu1 %v5985_v35  ;;  %4409 = vmatprep.subr.bf16.mxu0 %v5992_v36  ;;  %v1258_v35 = vld [vmem:[#allocation10 + $0xd18] sm:$0xff]  ;;  %v6048_v11 = vcombine.high %v1257_v33, %v1261_v34 }
 0x31f   :  { %4581 = vmatprep.subr.bf16.mxu1 %v5994_v37  ;;  %v1262_v36 = vld [vmem:[#allocation10 + $0xd38] sm:$0xff]  ;;  %v6041_v37 = vcombine.low %v1250_v27, %v1254_v29 }
 0x320   :  { %v6050_v38 = vcombine.high %v1258_v35, %v1262_v36  ;;  %v6049_v47 = vcombine.low %v1258_v35, %v1262_v36  ;;  %v1290_v35 = vld [vmem:[#allocation10 + $0xe18] sm:$0xff] }
 0x321   :  { %4410 = vmatpush1.bf16.msra.mxu0 %v5991_v44  ;;  %v1266_v44 = vld [vmem:[#allocation10 + $0xd58] sm:$0xff] }
 0x322   :  { %4582 = vmatpush1.bf16.msra.mxu1 %v5993_v45  ;;  %4411 = vmatprep.subr.bf16.mxu0 %v6000_v0  ;;  %v1270_v45 = vld [vmem:[#allocation10 + $0xd78] sm:$0xff]  ;;  %v6047_v0 = vcombine.low %v1257_v33, %v1261_v34  ;;  %v1293_v33 = vld [vmem:[#allocation10 + $0xe30] sm:$0xff] }
 0x323   :  { %4583 = vmatprep.subr.bf16.mxu1 %v6002_v46  ;;  %v7101_v46 = vld [vmem:[#allocation11] sm:$0xff]  ;;  %v6058_v49 = vcombine.high %v1266_v44, %v1270_v45  ;;  %v1294_v36 = vld [vmem:[#allocation10 + $0xe38] sm:$0xff] }
 0x324   :  { %v1360_v10 = vrot.slane %v7101_v46, %v209_v18  ;;  %v1368_v12 = vrot.slane %v7101_v46, %v217_v23 }
 0x325   :  { %4412 = vmatpush1.bf16.msra.mxu0 %v5999_v52  ;;  %v1277_v52 = vld [vmem:[#allocation10 + $0xdb0] sm:$0xff] }
 0x326   :  { %4584 = vmatpush1.bf16.msra.mxu1 %v6001_v5  ;;  %4413 = vmatprep.subr.bf16.mxu0 %v6008_v6  ;;  %v1356_v5 = vrot.slane %v7101_v46, %v205_v16  ;;  %v1364_v6 = vrot.slane %v7101_v46, %v213_v21  ;;  %v6057_v16 = vcombine.low %v1266_v44, %v1270_v45  ;;  %v1282_v21 = vld [vmem:[#allocation10 + $0xdd8] sm:$0xff]  ;;  %v1297_v45 = vld [vmem:[#allocation10 + $0xe50] sm:$0xff] }
 0x327   :  { %4585 = vmatprep.subr.bf16.mxu1 %v6010_v8  ;;  %v1274_v8 = vld [vmem:[#allocation10 + $0xd98] sm:$0xff]  ;;  %v6082_v44 = vcombine.high %v1290_v35, %v1294_v36 }
 0x328   :  { %v6065_v23 = vcombine.low %v1274_v8, %v1278_v26 }
 0x329   :  { %4414 = vmatpush1.bf16.msra.mxu0 %v6007_v54  ;;  %v7115_v54 = vld [vmem:[#allocation10 + $0xdd0] sm:$0xff] }
 0x32a   :  { %4586 = vmatpush1.bf16.msra.mxu1 %v6009_v50  ;;  %4426 = vmatprep.subr.bf16.mxu0 %v6016_v55  ;;  %v6064_v50 = vcombine.high %v1273_v51, %v1277_v52  ;;  %v1285_v55 = vld [vmem:[#allocation10 + $0xdf0] sm:$0xff] }
 0x32b   :  { %4598 = vmatprep.subr.bf16.mxu1 %v6018_v56  ;;  %v1286_v56 = vld [vmem:[#allocation10 + $0xdf8] sm:$0xff] }
 0x32c   :  { %4416 = vmatmul.mubr.bf16.vlgmr.msra.gmra.mrb[12].mxu0 %v7069_v28 }
 0x32d   :  { %4588 = vmatmul.mubr.bf16.vlgmr.msra.gmra.mrb[12].mxu1 %v7069_v28  ;;  %4427 = vmatpush1.bf16.msra.mxu0 %v6015_v59  ;;  %v6033_v28 = vcombine.low %v1242_v4, %v1246_v9  ;;  %v6066_v59 = vcombine.high %v1274_v8, %v1278_v26  ;;  %v6072_v9 = vcombine.high %v7115_v54, %v1285_v55  ;;  %v1309_v8 = vld [vmem:[#allocation10 + $0xeb0] sm:$0xff]  ;;  %v1306_v26 = vld [vmem:[#allocation10 + $0xe98] sm:$0xff] }
 0x32e   :  { %4458 = vmatprep.mubr.bf16.mxu0 %v7075_v43  ;;  %4599 = vmatpush1.bf16.msra.mxu1 %v6017_v60 }
 0x32f   :  { %4630 = vmatprep.mubr.bf16.mxu1 %v7075_v43  ;;  %4428 = vmatprep.subr.bf16.mxu0 %v6024_v61  ;;  %v6039_v43 = vcombine.low %v1249_v22, %v1253_v24  ;;  %v6063_v61 = vcombine.low %v1273_v51, %v1277_v52  ;;  %v6081_v51 = vcombine.low %v1290_v35, %v1294_v36  ;;  %v1329_v35 = vld [vmem:[#allocation10 + $0xf50] sm:$0xff] }
 0x330   :  { %4600 = vmatprep.subr.bf16.mxu1 %v6026_v3  ;;  %v1333_v36 = vld [vmem:[#allocation10 + $0xf70] sm:$0xff] }
 0x331   :  { %4429 = vmatpush1.bf16.msra.mxu0 %v6023_v13  ;;  %v6074_v13 = vcombine.high %v1282_v21, %v1286_v56 }
 0x332   :  { %4601 = vmatpush1.bf16.msra.mxu1 %v6025_v14  ;;  %4430 = vmatprep.subr.bf16.mxu0 %v6032_v19 }
 0x333   :  { %4602 = vmatprep.subr.bf16.mxu1 %v6034_v20 }
 0x335   :  { %4431 = vmatpush1.bf16.msra.mxu0 %v6031_v30 }
 0x336   :  { %4603 = vmatpush1.bf16.msra.mxu1 %v6033_v28  ;;  %4432 = vmatprep.subr.bf16.mxu0 %v6040_v25 }
 0x337   :  { %4604 = vmatprep.subr.bf16.mxu1 %v6042_v32  ;;  %v1289_v32 = vld [vmem:[#allocation10 + $0xe10] sm:$0xff] }
 0x338   :  { %v6080_v40 = vcombine.high %v1289_v32, %v1293_v33 }
 0x339   :  { %4433 = vmatpush1.bf16.msra.mxu0 %v6039_v43 }
 0x33a   :  { %4605 = vmatpush1.bf16.msra.mxu1 %v6041_v37  ;;  %4434 = vmatprep.subr.bf16.mxu0 %v6048_v11  ;;  %v6071_v37 = vcombine.low %v7115_v54, %v1285_v55 }
 0x33b   :  { %4606 = vmatprep.subr.bf16.mxu1 %v6050_v38  ;;  %v6073_v38 = vcombine.low %v1282_v21, %v1286_v56  ;;  %v1313_v56 = vld [vmem:[#allocation10 + $0xed0] sm:$0xff] }
 0x33d   :  { %4435 = vmatpush1.bf16.msra.mxu0 %v6047_v0  ;;  %v1301_v0 = vld [vmem:[#allocation10 + $0xe70] sm:$0xff] }
 0x33e   :  { %4607 = vmatpush1.bf16.msra.mxu1 %v6049_v47  ;;  %4436 = vmatprep.subr.bf16.mxu0 %v6056_v48  ;;  %v1298_v47 = vld [vmem:[#allocation10 + $0xe58] sm:$0xff]  ;;  %v6088_v52 = vcombine.high %v1297_v45, %v1301_v0 }
 0x33f   :  { %v4116_v57 = vpop.f32.mrb[8].mxu0  ;;  %v4288_v58 = vpop.f32.mrb[8].mxu1  ;;  %4608 = vmatprep.subr.bf16.mxu1 %v6058_v49  ;;  %v1302_v48 = vld [vmem:[#allocation10 + $0xe78] sm:$0xff]  ;;  %v6079_v49 = vcombine.low %v1289_v32, %v1293_v33 }
 0x340   :  { %v6327_v17 = vadd.f32 %v4116_v57, %v1356_v5  ;;  %v6331_v18 = vadd.f32 %v4288_v58, %v1364_v6  ;;  %v4118_v31 = vpop.f32.mrb[9].mxu0  ;;  %v4290_v60 = vpop.f32.mrb[9].mxu1  ;;  %v6089_v54 = vcombine.low %v1298_v47, %v1302_v48  ;;  %v1317_v57 = vld [vmem:[#allocation10 + $0xef0] sm:$0xff] }
 0x341   :  { %v6328_v62 = vadd.f32 %v4118_v31, %v1360_v10  ;;  %v6332_v2 = vadd.f32 %v4290_v60, %v1368_v12  ;;  %v4120_v3 = vpop.f32.mrb[10].mxu0  ;;  %v4292_v4 = vpop.f32.mrb[10].mxu1  ;;  %4437 = vmatpush1.bf16.msra.mxu0 %v6055_v53 }
 0x342   :  { %v6139_v14 = vmul.f32 -1.442695, %v6327_v17  ;;  %v6141_v19 = vmul.f32 -1.442695, %v6331_v18  ;;  %v6329_v20 = vadd.f32 %v4120_v3, %v1356_v5  ;;  %v6333_v22 = vadd.f32 %v4292_v4, %v1364_v6  ;;  %4609 = vmatpush1.bf16.msra.mxu1 %v6057_v16  ;;  %v4122_v24 = vpop.f32.mrb[11].mxu0  ;;  %v4294_v27 = vpop.f32.mrb[11].mxu1  ;;  %4438 = vmatprep.subr.bf16.mxu0 %v6064_v50 }
 0x343   :  { %v6140_v29 = vmul.f32 -1.442695, %v6328_v62  ;;  %v6142_v30 = vmul.f32 -1.442695, %v6332_v2  ;;  %v6330_v28 = vadd.f32 %v4122_v24, %v1360_v10  ;;  %v6334_v25 = vadd.f32 %v4294_v27, %v1368_v12  ;;  %4610 = vmatprep.subr.bf16.mxu1 %v6066_v59  ;;  %v1305_v6 = vld [vmem:[#allocation10 + $0xe90] sm:$0xff]  ;;  %v1310_v10 = vld [vmem:[#allocation10 + $0xeb8] sm:$0xff] }
 0x344   :  { %6535 = vpow2.f32 %v6139_v14  ;;  %v6147_v34 = vmul.f32 -1.442695, %v6329_v20  ;;  %v6149_v43 = vmul.f32 -1.442695, %v6333_v22  ;;  %v6090_v5 = vcombine.high %v1298_v47, %v1302_v48  ;;  %v1314_v17 = vld [vmem:[#allocation10 + $0xed8] sm:$0xff]  ;;  %v1321_v14 = vld [vmem:[#allocation10 + $0xf10] sm:$0xff] }
 0x345   :  { %6537 = vpow2.f32 %v6141_v19  ;;  %4439 = vmatpush1.bf16.msra.mxu0 %v6063_v61  ;;  %v6148_v11 = vmul.f32 -1.442695, %v6330_v28  ;;  %v6150_v7 = vmul.f32 -1.442695, %v6334_v25  ;;  %v6087_v12 = vcombine.low %v1297_v45, %v1301_v0  ;;  %v1318_v18 = vld [vmem:[#allocation10 + $0xef8] sm:$0xff]  ;;  %v1325_v19 = vld [vmem:[#allocation10 + $0xf30] sm:$0xff] }
 0x346   :  { %6539 = vpow2.f32 %v6140_v29  ;;  %4611 = vmatpush1.bf16.msra.mxu1 %v6065_v23  ;;  %4440 = vmatprep.subr.bf16.mxu0 %v6072_v9  ;;  %v6096_v16 = vcombine.high %v1305_v6, %v1309_v8  ;;  %v6098_v21 = vcombine.high %v1306_v26, %v1310_v10  ;;  %v6095_v61 = vcombine.low %v1305_v6, %v1309_v8  ;;  %v1322_v24 = vld [vmem:[#allocation10 + $0xf18] sm:$0xff]  ;;  %v1337_v45 = vld [vmem:[#allocation10 + $0xf90] sm:$0xff] }
 0x347   :  { %6541 = vpow2.f32 %v6142_v30  ;;  %4612 = vmatprep.subr.bf16.mxu1 %v6074_v13  ;;  %v6097_v2 = vcombine.low %v1306_v26, %v1310_v10  ;;  %v6104_v3 = vcombine.high %v1313_v56, %v1317_v57  ;;  %v6106_v13 = vcombine.high %v1314_v17, %v1318_v18  ;;  %v1326_v27 = vld [vmem:[#allocation10 + $0xf38] sm:$0xff]  ;;  %v1341_v0 = vld [vmem:[#allocation10 + $0xfb0] sm:$0xff] }
 0x348   :  { %6543 = vpow2.f32 %v6147_v34  ;;  %v6103_v28 = vcombine.low %v1313_v56, %v1317_v57  ;;  %v6105_v32 = vcombine.low %v1314_v17, %v1318_v18  ;;  %v6112_v33 = vcombine.high %v1321_v14, %v1325_v19  ;;  %v1338_v48 = vld [vmem:[#allocation10 + $0xf98] sm:$0xff] }
 0x349   :  { %6545 = vpow2.f32 %v6149_v43  ;;  %4441 = vmatpush1.bf16.msra.mxu0 %v6071_v37  ;;  %v6114_v34 = vcombine.high %v1322_v24, %v1326_v27  ;;  %v1330_v43 = vld [vmem:[#allocation10 + $0xf58] sm:$0xff]  ;;  %v6128_v8 = vcombine.high %v1337_v45, %v1341_v0  ;;  %v6127_v56 = vcombine.low %v1337_v45, %v1341_v0  ;;  %v6435_v45 = vld [vmem:[#allocation13 + $0x78] sm:$0xff]  }
 0x34a   :  { %6547 = vpow2.f32 %v6148_v11  ;;  %4613 = vmatpush1.bf16.msra.mxu1 %v6073_v38  ;;  %4442 = vmatprep.subr.bf16.mxu0 %v6080_v40  ;;  %v1334_v37 = vld [vmem:[#allocation10 + $0xf78] sm:$0xff]  ;;  %v6111_v11 = vcombine.low %v1321_v14, %v1325_v19  ;;  %v6113_v38 = vcombine.low %v1322_v24, %v1326_v27  ;;  %v6120_v40 = vcombine.high %v1329_v35, %v1333_v36  ;;  %v6413_v14 = vld [vmem:[#allocation13 + $0x8] sm:$0xff]   ;;  %v6436_v0 = vld [vmem:[#allocation13 + $0xf8] sm:$0xff]  }
 0x34b   :  { %6549 = vpow2.f32 %v6150_v7  ;;  %4614 = vmatprep.subr.bf16.mxu1 %v6082_v44  ;;  %v6122_v44 = vcombine.high %v1330_v43, %v1334_v37  ;;  %v6121_v6 = vcombine.low %v1330_v43, %v1334_v37  ;;  %v6414_v19 = vld [vmem:[#allocation13 + $0x88] sm:$0xff]   ;;  %v6417_v24 = vld [vmem:[#allocation13 + $0x10] sm:$0xff]  }
 0x34c   :  { %v6418_v27 = vld [vmem:[#allocation13 + $0x90] sm:$0xff]   ;;  %v6429_v43 = vld [vmem:[#allocation13 + $0x28] sm:$0xff]  }
 0x34d   :  { %4443 = vmatpush1.bf16.msra.mxu0 %v6079_v49  ;;  %v1342_v49 = vld [vmem:[#allocation10 + $0xfb8] sm:$0xff]  ;;  %v6430_v37 = vld [vmem:[#allocation13 + $0xa8] sm:$0xff]  }
 0x34e   :  { %v6536_v53 = vpop.eup %6535  ;;  %4615 = vmatpush1.bf16.msra.mxu1 %v6081_v51  ;;  %4444 = vmatprep.subr.bf16.mxu0 %v6088_v52  ;;  %v6119_v52 = vcombine.low %v1329_v35, %v1333_v36  ;;  %v6130_v10 = vcombine.high %v1338_v48, %v1342_v49  ;;  %v6427_v35 = vld [vmem:[#allocation13 + $0x68] sm:$0xff]  }
 0x34f   :  { %v6538_v50 = vpop.eup %6537  ;;  %v4689_v55 = vadd.f32 1.0, %v6536_v53  ;;  %4616 = vmatprep.subr.bf16.mxu1 %v6090_v5  ;;  %v1349_v53 = vld [vmem:[#allocation10 + $0xff0] sm:$0xff] }
 0x350   :  { %v6540_v58 = vpop.eup %6539  ;;  %v4691_v59 = vadd.f32 1.0, %v6538_v50  ;;  %v1350_v50 = vld [vmem:[#allocation10 + $0xff8] sm:$0xff]  ;;  %v6428_v36 = vld [vmem:[#allocation13 + $0xe8] sm:$0xff]  }
 0x351   :  { %v6542_v31 = vpop.eup %6541  ;;  %6551 = vrcp.f32 %v4689_v55  ;;  %v4690_v60 = vadd.f32 1.0, %v6540_v58  ;;  %4445 = vmatpush1.bf16.msra.mxu0 %v6087_v12  ;;  %v1345_v12 = vld [vmem:[#allocation10 + $0xfd0] sm:$0xff] }
 0x352   :  { %v6544_v23 = vpop.eup %6543  ;;  %6553 = vrcp.f32 %v4691_v59  ;;  %v4692_v62 = vadd.f32 1.0, %v6542_v31  ;;  %4617 = vmatpush1.bf16.msra.mxu1 %v6089_v54  ;;  %4446 = vmatprep.subr.bf16.mxu0 %v6096_v16  ;;  %v1346_v16 = vld [vmem:[#allocation10 + $0xfd8] sm:$0xff]  ;;  %v6129_v59 = vcombine.low %v1338_v48, %v1342_v49  ;;  %v6136_v17 = vcombine.high %v1345_v12, %v1349_v53  ;;  %v6437_v48 = vld [vmem:[#allocation13 + $0x38] sm:$0xff]  }
 0x353   :  { %v6546_v4 = vpop.eup %6545  ;;  %6555 = vrcp.f32 %v4690_v60  ;;  %v4697_v9 = vadd.f32 1.0, %v6544_v23  ;;  %4618 = vmatprep.subr.bf16.mxu1 %v6098_v21  ;;  %v6138_v31 = vcombine.high %v1346_v16, %v1350_v50  ;;  %v6137_v23 = vcombine.low %v1346_v16, %v1350_v50  ;;  %v6438_v49 = vld [vmem:[#allocation13 + $0xb8] sm:$0xff]  }
 0x354   :  { %v6548_v20 = vpop.eup %6547  ;;  %6557 = vrcp.f32 %v4692_v62  ;;  %v4699_v22 = vadd.f32 1.0, %v6546_v4  ;;  %v6407_v62 = vld [vmem:[#allocation13 + $0x40] sm:$0xff]   ;;  %v6451_v16 = vld [vmem:[#allocation13 + $0x158] sm:$0xff]  }
 0x355   :  { %v6550_v29 = vpop.eup %6549  ;;  %6559 = vrcp.f32 %v4697_v9  ;;  %v4698_v30 = vadd.f32 1.0, %v6548_v20  ;;  %4447 = vmatpush1.bf16.msra.mxu0 %v6095_v61  ;;  %v6135_v61 = vcombine.low %v1345_v12, %v1349_v53  ;;  %v6410_v4 = vld [vmem:[#allocation13 + $0x80] sm:$0xff]   ;;  %v6411_v9 = vld [vmem:[#allocation13 + $0x48] sm:$0xff]   ;;  %v6415_v20 = vld [vmem:[#allocation13 + $0x50] sm:$0xff]  }
 0x356   :  { %6561 = vrcp.f32 %v4699_v22  ;;  %v4700_v25 = vadd.f32 1.0, %v6550_v29  ;;  %4619 = vmatpush1.bf16.msra.mxu1 %v6097_v2  ;;  %4448 = vmatprep.subr.bf16.mxu0 %v6104_v3  ;;  %v6408_v2 = vld [vmem:[#allocation13 + $0xc0] sm:$0xff]   ;;  %v6416_v22 = vld [vmem:[#allocation13 + $0xd0] sm:$0xff]   ;;  %v6419_v29 = vld [vmem:[#allocation13 + $0x58] sm:$0xff]  }
 0x357   :  { %6563 = vrcp.f32 %v4698_v30  ;;  %4620 = vmatprep.subr.bf16.mxu1 %v6106_v13  ;;  %v6409_v3 = vld [vmem:[#allocation13] sm:$0xff]   ;;  %v6412_v13 = vld [vmem:[#allocation13 + $0xc8] sm:$0xff]   ;;  %v6420_v30 = vld [vmem:[#allocation13 + $0xd8] sm:$0xff]  }
 0x358   :  { %6565 = vrcp.f32 %v4700_v25  ;;  %v6423_v25 = vld [vmem:[#allocation13 + $0x60] sm:$0xff]   ;;  %v6445_v12 = vld [vmem:[#allocation13 + $0x108] sm:$0xff]   ;;  %v6452_v50 = vld [vmem:[#allocation13 + $0x1d8] sm:$0xff]  }
 0x359   :  { %4449 = vmatpush1.bf16.msra.mxu0 %v6103_v28  ;;  %v6422_v28 = vld [vmem:[#allocation13 + $0x98] sm:$0xff]   ;;  %v6446_v53 = vld [vmem:[#allocation13 + $0x188] sm:$0xff]  }
 0x35a   :  { %4621 = vmatpush1.bf16.msra.mxu1 %v6105_v32  ;;  %4450 = vmatprep.subr.bf16.mxu0 %v6112_v33  ;;  %v6424_v32 = vld [vmem:[#allocation13 + $0xe0] sm:$0xff]  }
 0x35b   :  { %v7119_v7 = vpop.eup %6551  ;;  %4622 = vmatprep.subr.bf16.mxu1 %v6114_v34  ;;  %v6425_v33 = vld [vmem:[#allocation13 + $0x20] sm:$0xff]  }
 0x35c   :  { %v7121_v47 = vpop.eup %6553  ;;  %v6426_v34 = vld [vmem:[#allocation13 + $0xa0] sm:$0xff]  }
 0x35d   :  { %v6556_v51 = vpop.eup %6555  ;;  %4451 = vmatpush1.bf16.msra.mxu0 %v6111_v11  ;;  %v6431_v11 = vld [vmem:[#allocation13 + $0x70] sm:$0xff]  }
 0x35e   :  { %v6558_v5 = vpop.eup %6557  ;;  %4623 = vmatpush1.bf16.msra.mxu1 %v6113_v38  ;;  %4452 = vmatprep.subr.bf16.mxu0 %v6120_v40  ;;  %v6432_v38 = vld [vmem:[#allocation13 + $0xf0] sm:$0xff]  }
 0x35f   :  { %v7123_v26 = vpop.eup %6559  ;;  %4624 = vmatprep.subr.bf16.mxu1 %v6122_v44  ;;  %v6433_v40 = vld [vmem:[#allocation13 + $0x30] sm:$0xff]  }
 0x360   :  { %v7125_v54 = vpop.eup %6561  ;;  %v4737_v55 = vpack.c.bf16 %v7123_v26, %v7119_v7  ;;  %v6434_v44 = vld [vmem:[#allocation13 + $0xb0] sm:$0xff]  }
 0x361   :  { %v6564_v21 = vpop.eup %6563  ;;  %4453 = vmatpush1.bf16.msra.mxu0 %v6119_v52  ;;  %v4739_v57 = vpack.c.bf16 %v7125_v54, %v7121_v47  ;;  %v6440_v52 = vld [vmem:[#allocation13 + $0x1c0] sm:$0xff]   ;;  %v6447_v7 = vld [vmem:[#allocation13 + $0x150] sm:$0xff]  }
 0x362   :  { %v6566_v58 = vpop.eup %6565  ;;  %4625 = vmatpush1.bf16.msra.mxu1 %v6121_v6  ;;  %4454 = vmatprep.subr.bf16.mxu0 %v6128_v8  ;;  %v4738_v18 = vpack.c.bf16 %v6564_v21, %v6556_v51  ;;  %v6439_v51 = vld [vmem:[#allocation13 + $0x140] sm:$0xff]   ;;  %v6443_v8 = vld [vmem:[#allocation13 + $0x148] sm:$0xff]   ;;  %v6448_v26 = vld [vmem:[#allocation13 + $0x1d0] sm:$0xff]  }
 0x363   :  { %4626 = vmatprep.subr.bf16.mxu1 %v6130_v10  ;;  %v4740_v60 = vpack.c.bf16 %v6566_v58, %v6558_v5  ;;  %v6441_v5 = vld [vmem:[#allocation13 + $0x100] sm:$0xff]   ;;  %v6444_v10 = vld [vmem:[#allocation13 + $0x1c8] sm:$0xff]   ;;  %v6449_v47 = vld [vmem:[#allocation13 + $0x110] sm:$0xff]  }
 0x364   :  { %v6442_v6 = vld [vmem:[#allocation13 + $0x180] sm:$0xff]   ;;  %v6450_v54 = vld [vmem:[#allocation13 + $0x190] sm:$0xff]   ;;  %v6454_v21 = vld [vmem:[#allocation13 + $0x198] sm:$0xff]  }
 0x365   :  { %4455 = vmatpush1.bf16.msra.mxu0 %v6127_v56  ;;  %v6455_v56 = vld [vmem:[#allocation13 + $0x160] sm:$0xff]  }
 0x366   :  { %4627 = vmatpush1.bf16.msra.mxu1 %v6129_v59  ;;  %4456 = vmatprep.subr.bf16.mxu0 %v6136_v17  ;;  %v6457_v58 = vld [vmem:[#allocation13 + $0x120] sm:$0xff]   ;;  %v6459_v17 = vld [vmem:[#allocation13 + $0x168] sm:$0xff]  }
 0x367   :  { %4628 = vmatprep.subr.bf16.mxu1 %v6138_v31  ;;  %v6458_v59 = vld [vmem:[#allocation13 + $0x1a0] sm:$0xff]   ;;  %v6461_v31 = vld [vmem:[#allocation13 + $0x128] sm:$0xff]  }
 0x369   :  { %4457 = vmatpush1.bf16.msra.mxu0 %v6135_v61  ;;  %v6463_v61 = vld [vmem:[#allocation13 + $0x170] sm:$0xff]  }
 0x36a   :  { %4629 = vmatpush1.bf16.msra.mxu1 %v6137_v23  ;;  %6224 = vmatprep.subr.bf16.mxu0 %v6407_v62  ;;  %v6464_v23 = vld [vmem:[#allocation13 + $0x1f0] sm:$0xff]  }
 0x36b   :  { %6246 = vmatprep.subr.bf16.mxu1 %v6408_v2  ;;  %v6465_v62 = vld [vmem:[#allocation13 + $0x130] sm:$0xff]  }
 0x36c   :  { %4459 = vmatmul.mubr.bf16.vlgmr.msra.gmra.mrb[12].mxu0 %v7073_v42  ;;  %v6466_v2 = vld [vmem:[#allocation13 + $0x1b0] sm:$0xff]  }
 0x36d   :  { %4631 = vmatmul.mubr.bf16.vlgmr.msra.gmra.mrb[12].mxu1 %v7073_v42  ;;  %6225 = vmatpush3.bf16.msra.mxu0 %v6409_v3  ;;  %v6421_v42 = vld [vmem:[#allocation13 + $0x18] sm:$0xff]  }
 0x36e   :  { %5296 = vmatprep.mubr.bf16.mxu0 %v4738_v18  ;;  %6247 = vmatpush3.bf16.msra.mxu1 %v6410_v4  ;;  %v6460_v18 = vld [vmem:[#allocation13 + $0x1e8] sm:$0xff]   ;;  %v6467_v3 = vld [vmem:[#allocation13 + $0x178] sm:$0xff]  }
 0x36f   :  { %5337 = vmatprep.mubr.bf16.mxu1 %v4740_v60  ;;  %6226 = vmatprep.subr.bf16.mxu0 %v6411_v9  ;;  %v6462_v60 = vld [vmem:[#allocation13 + $0x1a8] sm:$0xff]   ;;  %v6468_v4 = vld [vmem:[#allocation13 + $0x1f8] sm:$0xff]  }
 0x370   :  { %6248 = vmatprep.subr.bf16.mxu1 %v6412_v13  ;;  %v6469_v9 = vld [vmem:[#allocation13 + $0x138] sm:$0xff]  }
 0x371   :  { %6227 = vmatpush3.bf16.msra.mxu0 %v6413_v14  ;;  %v6470_v13 = vld [vmem:[#allocation13 + $0x1b8] sm:$0xff]   ;;  %v1372_v14 = vrot.slane %v7101_v46, %v221_v63 }
 0x372   :  { %6249 = vmatpush3.bf16.msra.mxu1 %v6414_v19  ;;  %6228 = vmatprep.subr.bf16.mxu0 %v6415_v20  ;;  %v1380_v19 = vrot.slane %v7101_v46, %v229_v39  ;;  %v1376_v20 = vrot.slane %v7101_v46, %v225_v1 }
 0x373   :  { %6250 = vmatprep.subr.bf16.mxu1 %v6416_v22  ;;  %v1384_v22 = vrot.slane %v7101_v46, %v233_v41 }
 0x375   :  { %6229 = vmatpush3.bf16.msra.mxu0 %v6417_v24 }
 0x376   :  { %6251 = vmatpush3.bf16.msra.mxu1 %v6418_v27  ;;  %6230 = vmatprep.subr.bf16.mxu0 %v6419_v29 }
 0x377   :  { %6252 = vmatprep.subr.bf16.mxu1 %v6420_v30 }
 0x379   :  { %6231 = vmatpush3.bf16.msra.mxu0 %v6421_v42 }
 0x37a   :  { %6253 = vmatpush3.bf16.msra.mxu1 %v6422_v28  ;;  %6232 = vmatprep.subr.bf16.mxu0 %v6423_v25 }
 0x37b   :  { %6254 = vmatprep.subr.bf16.mxu1 %v6424_v32 }
 0x37d   :  { %6233 = vmatpush3.bf16.msra.mxu0 %v6425_v33 }
 0x37e   :  { %6255 = vmatpush3.bf16.msra.mxu1 %v6426_v34  ;;  %6234 = vmatprep.subr.bf16.mxu0 %v6427_v35 }
 0x37f   :  { %6256 = vmatprep.subr.bf16.mxu1 %v6428_v36 }
 0x381   :  { %6235 = vmatpush3.bf16.msra.mxu0 %v6429_v43 }
 0x382   :  { %6257 = vmatpush3.bf16.msra.mxu1 %v6430_v37  ;;  %6236 = vmatprep.subr.bf16.mxu0 %v6431_v11 }
 0x383   :  { %6258 = vmatprep.subr.bf16.mxu1 %v6432_v38 }
 0x385   :  { %6237 = vmatpush3.bf16.msra.mxu0 %v6433_v40 }
 0x386   :  { %6259 = vmatpush3.bf16.msra.mxu1 %v6434_v44  ;;  %6238 = vmatprep.subr.bf16.mxu0 %v6435_v45 }
 0x387   :  { %6260 = vmatprep.subr.bf16.mxu1 %v6436_v0 }
 0x389   :  { %6239 = vmatpush3.bf16.msra.mxu0 %v6437_v48 }
 0x38a   :  { %6261 = vmatpush3.bf16.msra.mxu1 %v6438_v49  ;;  %6268 = vmatprep.subr.bf16.mxu0 %v6439_v51 }
 0x38b   :  { %6290 = vmatprep.subr.bf16.mxu1 %v6440_v52 }
 0x38c   :  { %5297 = vmatmul.mubr.bf16.vlgmr.msra.gmra.mrb[16].mxu0 %v4737_v55  ;;  %v6453_v55 = vld [vmem:[#allocation13 + $0x118] sm:$0xff]  }
 0x38d   :  { %5338 = vmatmul.mubr.bf16.vlgmr.msra.gmra.mrb[16].mxu1 %v4739_v57  ;;  %6269 = vmatpush3.bf16.msra.mxu0 %v6441_v5  ;;  %v6456_v57 = vld [vmem:[#allocation13 + $0x1e0] sm:$0xff]  }
 0x38e   :  { %6291 = vmatpush3.bf16.msra.mxu1 %v6442_v6  ;;  %6270 = vmatprep.subr.bf16.mxu0 %v6443_v8 }
 0x38f   :  { %6292 = vmatprep.subr.bf16.mxu1 %v6444_v10 }
 0x391   :  { %6271 = vmatpush3.bf16.msra.mxu0 %v6445_v12 }
 0x392   :  { %6293 = vmatpush3.bf16.msra.mxu1 %v6446_v53  ;;  %6272 = vmatprep.subr.bf16.mxu0 %v6447_v7 }
 0x393   :  { %6294 = vmatprep.subr.bf16.mxu1 %v6448_v26 }
 0x395   :  { %6273 = vmatpush3.bf16.msra.mxu0 %v6449_v47 }
 0x396   :  { %6295 = vmatpush3.bf16.msra.mxu1 %v6450_v54  ;;  %6274 = vmatprep.subr.bf16.mxu0 %v6451_v16 }
 0x397   :  { %6296 = vmatprep.subr.bf16.mxu1 %v6452_v50 }
 0x399   :  { %6275 = vmatpush3.bf16.msra.mxu0 %v6453_v55 }
 0x39a   :  { %6297 = vmatpush3.bf16.msra.mxu1 %v6454_v21  ;;  %6276 = vmatprep.subr.bf16.mxu0 %v6455_v56 }
 0x39b   :  { %6298 = vmatprep.subr.bf16.mxu1 %v6456_v57 }
 0x39d   :  { %6277 = vmatpush3.bf16.msra.mxu0 %v6457_v58 }
 0x39e   :  { %6299 = vmatpush3.bf16.msra.mxu1 %v6458_v59  ;;  %6278 = vmatprep.subr.bf16.mxu0 %v6459_v17  ;;  %v6155_v17 = vld [vmem:[#allocation14] ss:$0 sm:$0xff] }
 0x39f   :  { %6300 = vmatprep.subr.bf16.mxu1 %v6460_v18 }
 0x3a1   :  { %6279 = vmatpush3.bf16.msra.mxu0 %v6461_v31 }
 0x3a2   :  { %6301 = vmatpush3.bf16.msra.mxu1 %v6462_v60  ;;  %6280 = vmatprep.subr.bf16.mxu0 %v6463_v61 }
 0x3a3   :  { %6302 = vmatprep.subr.bf16.mxu1 %v6464_v23 }
 0x3a5   :  { %6281 = vmatpush3.bf16.msra.mxu0 %v6465_v62 }
 0x3a6   :  { %6303 = vmatpush3.bf16.msra.mxu1 %v6466_v2  ;;  %6282 = vmatprep.subr.bf16.mxu0 %v6467_v3 }
 0x3a7   :  { %6304 = vmatprep.subr.bf16.mxu1 %v6468_v4 }
 0x3a9   :  { %6283 = vmatpush3.bf16.msra.mxu0 %v6469_v9 }
 0x3aa   :  { %6305 = vmatpush3.bf16.msra.mxu1 %v6470_v13 }
 0x43f   :  { %v4460_v24 = vpop.f32.mrb[12].mxu0 }
 0x440   :  { %v6335_v27 = vadd.f32 %v4460_v24, %v1372_v14  ;;  %v4632_v29 = vpop.f32.mrb[12].mxu1  ;;  %v4462_v30 = vpop.f32.mrb[13].mxu0 }
 0x441   :  { %v6339_v42 = vadd.f32 %v4632_v29, %v1380_v19  ;;  %v6336_v28 = vadd.f32 %v4462_v30, %v1376_v20  ;;  %v4634_v25 = vpop.f32.mrb[13].mxu1  ;;  %v4464_v63 = vpop.f32.mrb[14].mxu0 }
 0x442   :  { %v6143_v32 = vmul.f32 -1.442695, %v6335_v27  ;;  %v6340_v33 = vadd.f32 %v4634_v25, %v1384_v22  ;;  %v6337_v34 = vadd.f32 %v4464_v63, %v1372_v14  ;;  %v4636_v39 = vpop.f32.mrb[14].mxu1  ;;  %v4466_v35 = vpop.f32.mrb[15].mxu0 }
 0x443   :  { %v6145_v36 = vmul.f32 -1.442695, %v6339_v42  ;;  %v6144_v43 = vmul.f32 -1.442695, %v6336_v28  ;;  %v6341_v1 = vadd.f32 %v4636_v39, %v1380_v19  ;;  %v6338_v37 = vadd.f32 %v4466_v35, %v1376_v20  ;;  %v4638_v15 = vpop.f32.mrb[15].mxu1  ;;  %v5440_v28 = vld [vmem:[#allocation5] sm:$0xff] }
 0x444   :  { %6567 = vpow2.f32 %v6143_v32  ;;  %v6146_v41 = vmul.f32 -1.442695, %v6340_v33  ;;  %v6151_v46 = vmul.f32 -1.442695, %v6337_v34  ;;  %v6342_v11 = vadd.f32 %v4638_v15, %v1384_v22 }
 0x445   :  { %6569 = vpow2.f32 %v6145_v36  ;;  %v6153_v38 = vmul.f32 -1.442695, %v6341_v1  ;;  %v6152_v40 = vmul.f32 -1.442695, %v6338_v37 }
 0x446   :  { %6571 = vpow2.f32 %v6144_v43  ;;  %v6154_v44 = vmul.f32 -1.442695, %v6342_v11 }
 0x447   :  { %6573 = vpow2.f32 %v6146_v41 }
 0x448   :  { %6575 = vpow2.f32 %v6151_v46 }
 0x449   :  { %6577 = vpow2.f32 %v6153_v38 }
 0x44a   :  { %6579 = vpow2.f32 %v6152_v40 }
 0x44b   :  { %6581 = vpow2.f32 %v6154_v44 }
 0x44e   :  { %v6568_v45 = vpop.eup %6567 }
 0x44f   :  { %v6570_v0 = vpop.eup %6569  ;;  %v4693_v48 = vadd.f32 1.0, %v6568_v45 }
 0x450   :  { %v6572_v49 = vpop.eup %6571  ;;  %v4695_v51 = vadd.f32 1.0, %v6570_v0 }
 0x451   :  { %v6574_v52 = vpop.eup %6573  ;;  %6583 = vrcp.f32 %v4693_v48  ;;  %v4694_v5 = vadd.f32 1.0, %v6572_v49 }
 0x452   :  { %v6576_v6 = vpop.eup %6575  ;;  %6585 = vrcp.f32 %v4695_v51  ;;  %v4696_v8 = vadd.f32 1.0, %v6574_v52 }
 0x453   :  { %v6578_v10 = vpop.eup %6577  ;;  %6587 = vrcp.f32 %v4694_v5  ;;  %v4701_v12 = vadd.f32 1.0, %v6576_v6  ;;  %v5441_v6 = vld [vmem:[#allocation5 + $0x8] sm:$0xff] }
 0x454   :  { %v6580_v53 = vpop.eup %6579  ;;  %6589 = vrcp.f32 %v4696_v8  ;;  %v4703_v7 = vadd.f32 1.0, %v6578_v10 }
 0x455   :  { %v6582_v26 = vpop.eup %6581  ;;  %6591 = vrcp.f32 %v4701_v12  ;;  %v4702_v47 = vadd.f32 1.0, %v6580_v53 }
 0x456   :  { %6593 = vrcp.f32 %v4703_v7  ;;  %v4704_v54 = vadd.f32 1.0, %v6582_v26 }
 0x457   :  { %6595 = vrcp.f32 %v4702_v47 }
 0x458   :  { %6597 = vrcp.f32 %v4704_v54 }
 0x45b   :  { %v6584_v16 = vpop.eup %6583 }
 0x45c   :  { %v6586_v50 = vpop.eup %6585 }
 0x45d   :  { %v6588_v55 = vpop.eup %6587 }
 0x45e   :  { %v6590_v21 = vpop.eup %6589 }
 0x45f   :  { %v6592_v56 = vpop.eup %6591  ;;  %v6240_v57 = vpop.f32.mrb[16].mxu0 }
 0x460   :  { %v6594_v58 = vpop.eup %6593  ;;  %v6262_v59 = vpop.f32.mrb[16].mxu1  ;;  %v4741_v31 = vpack.c.bf16 %v6592_v56, %v6584_v16 }
 0x461   :  { %v6241_v18 = vpop.f32.mrb[17].mxu0  ;;  %v6596_v60 = vpop.eup %6595  ;;  %v4743_v2 = vpack.c.bf16 %v6594_v58, %v6586_v50 }
 0x462   :  { %v6242_v61 = vadd.f32 %v6241_v18, %v6240_v57  ;;  %v6263_v23 = vpop.f32.mrb[17].mxu1  ;;  %v6243_v62 = vpop.f32.mrb[18].mxu0  ;;  %v4742_v13 = vpack.c.bf16 %v6596_v60, %v6588_v55 }
 0x463   :  { %v6598_v3 = vpop.eup %6597  ;;  %v6264_v4 = vadd.f32 %v6263_v23, %v6262_v59  ;;  %v6265_v9 = vpop.f32.mrb[18].mxu1 }
 0x464   :  { %v6244_v14 = vpop.f32.mrb[19].mxu0  ;;  %v5299_v19 = vadd.f32 %v6242_v61, %v6155_v17  ;;  %v4744_v20 = vpack.c.bf16 %v6598_v3, %v6590_v21  ;;  %v6266_v24 = vpop.f32.mrb[19].mxu1  ;;  %5378 = vmatprep.mubr.bf16.mxu0 %v4742_v13 }
 0x465   :  { %v6245_v22 = vadd.f32 %v6244_v14, %v6243_v62  ;;  %v6267_v27 = vadd.f32 %v6266_v24, %v6265_v9  ;;  %5379 = vmatmul.mubr.bf16.vlgmr.msra.gmra.mrb[20].mxu0 %v4741_v31 }
 0x466   :  { %v5340_v29 = vadd.f32 %v6264_v4, %v5299_v19  ;;  %5419 = vmatprep.mubr.bf16.mxu1 %v4744_v20  ;;  %6320 = vmatprep.mubr.msk.f32.mxu0 %vm5442_vm0, %v5440_v28 }
 0x467   :  { %v5302_v30 = vadd.f32 %v6245_v22, %v6155_v17  ;;  %5420 = vmatmul.mubr.bf16.vlgmr.msra.gmra.mrb[20].mxu1 %v4743_v2 }
 0x469   :  { %v5343_v42 = vadd.f32 %v6267_v27, %v5302_v30 }
 0x538   :  { %v6284_v25 = vpop.f32.mrb[20].mxu0 }
 0x539   :  { %v6285_v32 = vpop.f32.mrb[21].mxu0 }
 0x53a   :  { %v6306_v63 = vpop.f32.mrb[20].mxu1  ;;  %v6286_v33 = vadd.f32 %v6285_v32, %v6284_v25  ;;  %v6287_v39 = vpop.f32.mrb[22].mxu0 }
 0x53b   :  { %v6307_v34 = vpop.f32.mrb[21].mxu1  ;;  %v6288_v43 = vpop.f32.mrb[23].mxu0 }
 0x53c   :  { %v6308_v35 = vadd.f32 %v6307_v34, %v6306_v63  ;;  %v6309_v36 = vpop.f32.mrb[22].mxu1  ;;  %v5381_v1 = vadd.f32 %v6286_v33, %v5340_v29  ;;  %v6289_v37 = vadd.f32 %v6288_v43, %v6287_v39 }
 0x53d   :  { %v6310_v15 = vpop.f32.mrb[23].mxu1 }
 0x53e   :  { %v6311_v41 = vadd.f32 %v6310_v15, %v6309_v36  ;;  %v5422_v46 = vadd.f32 %v6308_v35, %v5381_v1  ;;  %v5384_v11 = vadd.f32 %v6289_v37, %v5343_v42 }
 0x540   :  { %v6220_v38 = vmul.f32 -1.442695, %v5422_v46  ;;  %v5425_v40 = vadd.f32 %v6311_v41, %v5384_v11 }
 0x542   :  { %6599 = vpow2.f32 %v6220_v38  ;;  %v6221_v44 = vmul.f32 -1.442695, %v5425_v40 }
 0x544   :  { %6601 = vpow2.f32 %v6221_v44 }
 0x54c   :  { %v6600_v45 = vpop.eup %6599 }
 0x54d   :  { %v5434_v0 = vadd.f32 1.0, %v6600_v45 }
 0x54e   :  { %v6602_v48 = vpop.eup %6601 }
 0x54f   :  { %v5435_v49 = vadd.f32 1.0, %v6602_v48  ;;  %6603 = vrcp.f32 %v5434_v0 }
 0x551   :  { %6605 = vrcp.f32 %v5435_v49 }
 0x559   :  { %v6604_v51 = vpop.eup %6603 }
 0x55b   :  { %v6606_v52 = vpop.eup %6605 }
 0x55c   :  { %v6323_v5 = vpack.c.bf16 %v6606_v52, %v6604_v51 }
 0x55e   :  { %6324 = vmatprep.subr.bf16.mxu0 %v6323_v5 }
 0x55f   :  { %6326 = vmatpush3.bf16.msra.mxu0 %v6323_v5 }
 0x562   :  { %6321 = vmatmul.mubr.msk.f32.vlgmr.msra.gmra.mrb[24].mxu0 %vm5442_vm0, %v5441_v6 }
 0x635   :  { %v6322_v8 = vpop.f32.mrb[24].mxu0 }
 0x636   :  { %5525 = vst [vmem:[#allocation16 + $0x8] sm:$0xff] %v6322_v8  ;;  %v5515_v10 = vpop.f32.mrb[25].mxu0 }
 0x637   :  { %5524 = vst [vmem:[#allocation16] sm:$0xff] %v5515_v10 }
 0x638   :  { %6794 = shalt.err (!%p6791_p12)
}
 0x639   :  { %s6795_s16 = scalar_lea.hbm %s7176_s8, 256 }
 0x63a   :  { %p6796_p13 = scmp.ne.s32.totalorder %s7176_s8, %s6795_s16  ;;  %p6799_p0 = scmp.lt.u32.totalorder %s6795_s16, %s7176_s8 }
 0x63c   :  { %p6801_p1 = pnand %p6799_p0, %p6796_p13 }
 0x63e   :  { %6804 = shalt.err (!%p6801_p1)
}
 0x63f   :  { %5537 = dma.vmem_to_hbm [thread:$0]  %s5532_s11, 256, %s7176_s8, [#allocation4], %s6819_s17, %s6819_s17, %s6820_s18  }
 0x640   :  { %6815 = dma.done.wait [#allocation4], 256  }
 0x641   :  { %6816 = vsyncadd [#allocation4], 4294967040 }
 0x642   :  { %5541 = vsyncpa [#allocation3], 1 }
 0x643   :  { %5542 = vsyncpa [#allocation6], 1 }
 0x644   :  { %5543 = vsyncpa [#allocation9], 1 }
 0x645   :  { %5544 = vsyncpa [#allocation12], 1 }
 0x646   :  { %5545 = vsyncpa [#allocation15], 1 }
 0x647   :  { %5546 = vsyncpa [#allocation4], 1 }

</bundles_post_ra>
